<compile_context>
chip_gen: v6e
topology: v6e:2x2x1
jax: 0.10.0
libtpu: 0.0.40
codegen_flags: <defaults>
</compile_context>

<pallas_src>
import jax
import jax.numpy as jnp
from jax import lax
from jax.experimental import pallas as pl
from jax.experimental.pallas import tpu as pltpu

C1 = 32          # conv channel width (fixed by the module)
KSIZE = 5        # conv kernel size


# ----------------------------------------------------------------------------
# Fused kernel: conv1+relu+pool -> conv2+relu+pool -> BiLSTM -> dense -> sigmoid
# All conv activations are kept time-major (time, batch, chan) so every access is a
# full-slab (or strided full-slab) read/write; batch sits on sublanes for the LSTM.
# ----------------------------------------------------------------------------
def fused_cnn_bilstm_kernel(x_ref, w1_ref, b1_ref, w2_ref, b2_ref,
                            win_ref, blstm_ref, whh_ref, wd_ref, bd_ref,
                            out_ref,
                            pad1, pad2):
    f32 = jnp.float32
    L, B, F = x_ref.shape            # time-major input (L, B, F)
    L2 = L // 2                      # length after first maxpool
    T = L2 // 2                      # length after second maxpool (LSTM steps)
    H2 = whh_ref.shape[0]            # 2*H  ([fwd | rev] hidden concat)
    dn = (((2,), (1,)), ((0,), (0,)))   # batched dot: contract chan, batch over time

    # ---- stage conv1 input: zero only the 2+2 halo rows, one interior slab write ----
    pad1[0:2, :, :] = jnp.zeros((2, B, F), f32)
    pad1[L + 2:L + 4, :, :] = jnp.zeros((2, B, F), f32)
    pad1[2:L + 2, :, :] = x_ref[...].astype(f32)

    # ---- conv1 (k=5, s=1, p=2) + ReLU + maxpool(2,2), fused ----
    # Even/odd output-position accumulators: tap k for even outputs reads padded rows
    # k, k+2, ... (strided full-slab read); pooling is then just max(even, odd).
    acc_e = jnp.zeros((L2, B, C1), f32)
    acc_o = jnp.zeros((L2, B, C1), f32)
    for k in range(KSIZE):
        wk = jnp.broadcast_to(w1_ref[k], (L2, F, C1))          # (F,C1) tap, tiled over time
        tap_e = pad1[pl.ds(k, L2, stride=2), :, :]              # (L2, B, F)
        tap_o = pad1[pl.ds(k + 1, L2, stride=2), :, :]
        acc_e = acc_e + lax.dot_general(tap_e, wk, dn, preferred_element_type=f32)
        acc_o = acc_o + lax.dot_general(tap_o, wk, dn, preferred_element_type=f32)
    # relu(max(a,b)+bias) == maxpool(relu(conv+bias)) since relu/max are monotone
    p1 = jnp.maximum(jnp.maximum(acc_e, acc_o) + b1_ref[...], 0.0)   # (L2, B, C1)

    # (dropout: identity at inference)

    # ---- stage conv2 input ----
    pad2[0:2, :, :] = jnp.zeros((2, B, C1), f32)
    pad2[L2 + 2:L2 + 4, :, :] = jnp.zeros((2, B, C1), f32)
    pad2[2:L2 + 2, :, :] = p1

    # ---- conv2 (k=5, s=1, p=2) + ReLU + maxpool(2,2), fused ----
    acc2_e = jnp.zeros((T, B, C1), f32)
    acc2_o = jnp.zeros((T, B, C1), f32)
    for k in range(KSIZE):
        wk = jnp.broadcast_to(w2_ref[k], (T, C1, C1))
        tap_e = pad2[pl.ds(k, T, stride=2), :, :]
        tap_o = pad2[pl.ds(k + 1, T, stride=2), :, :]
        acc2_e = acc2_e + lax.dot_general(tap_e, wk, dn, preferred_element_type=f32)
        acc2_o = acc2_o + lax.dot_general(tap_o, wk, dn, preferred_element_type=f32)
    p2 = jnp.maximum(jnp.maximum(acc2_e, acc2_o) + b2_ref[...], 0.0)  # (T, B, C1), time-major

    # (dropout: identity at inference)

    # ---- BiLSTM ----
    # Hoisted input projection (both directions) as ONE matmul:
    #   xcomb row (t*B + b) lanes = [x_t (fwd input) | x_{T-1-t} (rev input)]
    #   win (2*C1, 8H) maps fwd rows -> fwd gate lanes, rev rows -> rev gate lanes.
    xcomb = jnp.concatenate(
        [jnp.concatenate([p2[t], p2[T - 1 - t]], axis=-1) for t in range(T)],
        axis=0)                                                       # (T*B, 2*C1)
    gx = jnp.dot(xcomb, win_ref[...], preferred_element_type=f32) + blstm_ref[...]  # (T*B, 8H)

    # Recurrence: one dependent matmul per step, fwd+rev fused through the
    # block-diagonal hidden->gate weight whh (2H, 8H). Gate lane layout:
    #   [ i (2H) | f (2H) | g (2H) | o (2H) ], each 2H chunk = [fwd H | rev H].
    whh = whh_ref[...]
    h = jnp.zeros((B, H2), f32)
    c = jnp.zeros((B, H2), f32)
    for t in range(T):                     # T is small & static -> unrolled
        g = gx[t * B:(t + 1) * B, :] + jnp.dot(h, whh, preferred_element_type=f32)
        i_g = jax.nn.sigmoid(g[:, 0 * H2:1 * H2])
        f_g = jax.nn.sigmoid(g[:, 1 * H2:2 * H2])
        g_g = jnp.tanh(g[:, 2 * H2:3 * H2])
        o_g = jax.nn.sigmoid(g[:, 3 * H2:4 * H2])
        c = f_g * c + i_g * g_g
        h = o_g * jnp.tanh(c)
    # h = [ h_fwd after last step | h_rev after full reversed pass ]
    #   == PyTorch [ hidden[:, -1, :H] | hidden[:, 0, H:] ]

    # ---- dense(2H -> 1) + sigmoid (dense bias is a scalar in SMEM) ----
    logit = jnp.sum(h * wd_ref[...], axis=-1, keepdims=True) + bd_ref[0, 0]
    out_ref[...] = jax.nn.sigmoid(logit).astype(out_ref.dtype)


# ----------------------------------------------------------------------------
# Wrapper: one fused pallas_call, no grid, everything resident in VMEM
# ----------------------------------------------------------------------------
def cnn_lstm_forward(x, p):
    B, L, F = x.shape
    assert L % 4 == 0, "two maxpool(2,2) stages require L divisible by 4"
    L2 = L // 2
    # Single tiny layout prep (a few hundred bytes): present the input time-major so every
    # in-kernel access is a full (B, F) slab. (The PyTorch module itself starts with a
    # transpose of the input.)
    x_tm = jnp.transpose(x, (1, 0, 2))      # (L, B, F)

    vmem = pl.BlockSpec(memory_space=pltpu.MemorySpace.VMEM)
    smem = pl.BlockSpec(memory_space=pltpu.MemorySpace.SMEM)

    return pl.pallas_call(
        fused_cnn_bilstm_kernel,
        out_shape=jax.ShapeDtypeStruct((B, 1), jnp.float32),
        in_specs=[vmem] * 9 + [smem],        # bd is a true scalar -> SMEM
        out_specs=vmem,
        scratch_shapes=[
            pltpu.VMEM((L + 4, B, F), jnp.float32),    # padded conv1 input (time-major)
            pltpu.VMEM((L2 + 4, B, C1), jnp.float32),  # padded conv2 input (time-major)
        ],
    )(x_tm, p["w1"], p["b1"], p["w2"], p["b2"],
      p["w_in"], p["b_lstm"], p["w_hh"], p["wd"], p["bd"])


# ----------------------------------------------------------------------------
# Pure-JAX reference (raw per-tap / per-gate weights) for checking
# ----------------------------------------------------------------------------
def reference_forward(x, p):
    B, L, F = x.shape

    def conv(h, w, b):                     # h (B, Lc, Cin), w (K, Cin, Cout)
        Lc = h.shape[1]
        hp = jnp.pad(h, ((0, 0), (2, 2), (0, 0)))
        acc = jnp.zeros((B, Lc, w.shape[2]), jnp.float32)
        for k in range(KSIZE):
            acc = acc + jnp.einsum("blc,co->blo", hp[:, k:k + Lc, :], w[k])
        return acc + b

    h = jnp.maximum(conv(x.astype(jnp.float32), p["w1"], p["b1"]), 0.0)
    h = jnp.maximum(h[:, 0::2, :], h[:, 1::2, :])
    h = jnp.maximum(conv(h, p["w2"], p["b2"]), 0.0)
    h = jnp.maximum(h[:, 0::2, :], h[:, 1::2, :])

    T = h.shape[1]
    H = p["whh_f"].shape[-1]

    def run_dir(seq, wih, whh, bih, bhh):
        hh = jnp.zeros((B, H), jnp.float32)
        cc = jnp.zeros((B, H), jnp.float32)
        for t in range(T):
            xt = seq[:, t, :]
            i = jax.nn.sigmoid(xt @ wih[0] + hh @ whh[0] + bih[0] + bhh[0])
            f = jax.nn.sigmoid(xt @ wih[1] + hh @ whh[1] + bih[1] + bhh[1])
            g = jnp.tanh(xt @ wih[2] + hh @ whh[2] + bih[2] + bhh[2])
            o = jax.nn.sigmoid(xt @ wih[3] + hh @ whh[3] + bih[3] + bhh[3])
            cc = f * cc + i * g
            hh = o * jnp.tanh(cc)
        return hh

    h_f = run_dir(h, p["wih_f"], p["whh_f"], p["bih_f"], p["bhh_f"])
    h_r = run_dir(h[:, ::-1, :], p["wih_r"], p["whh_r"], p["bih_r"], p["bhh_r"])
    feat = jnp.concatenate([h_f, h_r], axis=-1)   # [out_final | out_first]
    return jax.nn.sigmoid(feat @ p["wd"].T + p["bd"])


# ----------------------------------------------------------------------------
# Parameters: raw (PyTorch-like layouts, b_ih + b_hh both present) + host packing
# ----------------------------------------------------------------------------
def make_params(key, features, hidden):
    ks = jax.random.split(key, 14)
    n = lambda k, s, sc=0.1: sc * jax.random.normal(k, s, dtype=jnp.float32)
    return {
        "w1": n(ks[0], (KSIZE, features, C1)),       # conv1 taps (k, in, out)
        "b1": n(ks[1], (1, C1)),
        "w2": n(ks[2], (KSIZE, C1, C1)),
        "b2": n(ks[3], (1, C1)),
        # LSTM, gate-stacked (4, in, H), PyTorch gate order i,f,g,o; separate b_ih / b_hh
        "wih_f": n(ks[4], (4, C1, hidden)), "whh_f": n(ks[5], (4, hidden, hidden)),
        "bih_f": n(ks[6], (4, hidden)), "bhh_f": n(ks[7], (4, hidden)),
        "wih_r": n(ks[8], (4, C1, hidden)), "whh_r": n(ks[9], (4, hidden, hidden)),
        "bih_r": n(ks[10], (4, hidden)), "bhh_r": n(ks[11], (4, hidden)),
        # dense(2H -> 1): columns ordered [forward H | backward H] like the PyTorch concat
        "wd": n(ks[12], (1, 2 * hidden)),
        "bd": n(ks[13], (1, 1)),
    }


def pack_params(p):
    """Host-side repack for the kernel.

    Gate lane layout: [ i (2H) | f (2H) | g (2H) | o (2H) ], each 2H = [fwd H | rev H].
    w_in rows  = [ fwd-direction input chans (C1) ; rev-direction input chans (C1) ]
    w_hh rows  = [ h_fwd (H) ; h_rev (H) ]  (block-diagonal: directions never mix)
    b_lstm     = b_ih + b_hh, both directions.
    """
    H = p["whh_f"].shape[-1]
    cin = p["wih_f"].shape[1]
    zin = jnp.zeros((cin, H), jnp.float32)
    zh = jnp.zeros((H, H), jnp.float32)

    w_in = jnp.concatenate([
        jnp.concatenate([jnp.concatenate([p["wih_f"][q], zin], axis=0),
                         jnp.concatenate([zin, p["wih_r"][q]], axis=0)], axis=1)
        for q in range(4)], axis=1)                                   # (2*C1, 8H)
    w_hh = jnp.concatenate([
        jnp.concatenate([jnp.concatenate([p["whh_f"][q], zh], axis=0),
                         jnp.concatenate([zh, p["whh_r"][q]], axis=0)], axis=1)
        for q in range(4)], axis=1)                                   # (2H, 8H)
    b_lstm = jnp.concatenate([
        jnp.concatenate([(p["bih_f"][q] + p["bhh_f"][q])[None, :],
                         (p["bih_r"][q] + p["bhh_r"][q])[None, :]], axis=1)
        for q in range(4)], axis=1)                                   # (1, 8H)

    return {"w1": p["w1"], "b1": p["b1"], "w2": p["w2"], "b2": p["b2"],
            "w_in": w_in, "w_hh": w_hh, "b_lstm": b_lstm,
            "wd": p["wd"], "bd": p["bd"]}


if __name__ == "__main__":
    B, L, F, H = 2, 16, 4, 32     # batch, seq len, features, lstm_hidden_size

    key = jax.random.PRNGKey(0)
    kx, kp = jax.random.split(key)
    x = jax.random.normal(kx, (B, L, F), dtype=jnp.float32)
    raw = make_params(kp, F, H)
    packed = pack_params(raw)

    out = cnn_lstm_forward(x, packed)
    out = jax.block_until_ready(out)

    ref = reference_forward(x, raw)
    assert out.shape == (B, 1), out.shape
    assert bool(jnp.all(jnp.isfinite(out)))
    assert jnp.allclose(out, ref, rtol=1e-4, atol=1e-4), (out, ref)

    # TODO(synk): nn.Dropout(p=0.4) is an inference-mode identity here (no train-time RNG mask).
    print("KERNEL_OK")
</pallas_src>

<mosaic_0001>
module attributes {stable_mosaic.version = 11 : i64} {
  func.func @fused_cnn_bilstm_kernel(%arg0: memref<16x2x4xf32, #tpu.memory_space<vmem>>, %arg1: memref<5x4x32xf32, #tpu.memory_space<vmem>>, %arg2: memref<1x32xf32, #tpu.memory_space<vmem>>, %arg3: memref<5x32x32xf32, #tpu.memory_space<vmem>>, %arg4: memref<1x32xf32, #tpu.memory_space<vmem>>, %arg5: memref<64x256xf32, #tpu.memory_space<vmem>>, %arg6: memref<1x256xf32, #tpu.memory_space<vmem>>, %arg7: memref<64x256xf32, #tpu.memory_space<vmem>>, %arg8: memref<1x64xf32, #tpu.memory_space<vmem>>, %arg9: memref<1x1xf32, #tpu.memory_space<smem>>, %arg10: memref<2x1xf32, #tpu.memory_space<vmem>>, %arg11: memref<20x2x4xf32, #tpu.memory_space<vmem>>, %arg12: memref<12x2x32xf32, #tpu.memory_space<vmem>>) attributes {dimension_semantics = [], scalar_prefetch = 0 : i64, scratch_operands = 2 : i64, tpu.core_type = #tpu.core_type<tc>} {
    %cst = arith.constant 0.000000e+00 : f32
    %0 = vector.broadcast %cst : f32 to vector<2x2x4xf32>
    %c0 = arith.constant 0 : index
    %c0_0 = arith.constant 0 : index
    %c0_1 = arith.constant 0 : index
    %1 = vector.load %arg11[%c0, %c0_0, %c0_1] : memref<20x2x4xf32, #tpu.memory_space<vmem>>, vector<2x2x4xf32>
    tpu.vector_store %arg11[%c0, %c0_0, %c0_1], %0 {strides = array<i32>} : memref<20x2x4xf32, #tpu.memory_space<vmem>>, vector<2x2x4xf32>,
    %cst_2 = arith.constant 0.000000e+00 : f32
    %2 = vector.broadcast %cst_2 : f32 to vector<2x2x4xf32>
    %c18 = arith.constant 18 : index
    %c0_3 = arith.constant 0 : index
    %c0_4 = arith.constant 0 : index
    %3 = vector.load %arg11[%c18, %c0_3, %c0_4] : memref<20x2x4xf32, #tpu.memory_space<vmem>>, vector<2x2x4xf32>
    tpu.vector_store %arg11[%c18, %c0_3, %c0_4], %2 {strides = array<i32>} : memref<20x2x4xf32, #tpu.memory_space<vmem>>, vector<2x2x4xf32>,
    %c0_5 = arith.constant 0 : index
    %c0_6 = arith.constant 0 : index
    %c0_7 = arith.constant 0 : index
    %4 = vector.load %arg0[%c0_5, %c0_6, %c0_7] : memref<16x2x4xf32, #tpu.memory_space<vmem>>, vector<16x2x4xf32>
    %c2 = arith.constant 2 : index
    %c0_8 = arith.constant 0 : index
    %c0_9 = arith.constant 0 : index
    %5 = vector.load %arg11[%c2, %c0_8, %c0_9] : memref<20x2x4xf32, #tpu.memory_space<vmem>>, vector<16x2x4xf32>
    tpu.vector_store %arg11[%c2, %c0_8, %c0_9], %4 {strides = array<i32>} : memref<20x2x4xf32, #tpu.memory_space<vmem>>, vector<16x2x4xf32>,
    %cst_10 = arith.constant 0.000000e+00 : f32
    %6 = vector.broadcast %cst_10 : f32 to vector<8x2x32xf32>
    %cst_11 = arith.constant 0.000000e+00 : f32
    %7 = vector.broadcast %cst_11 : f32 to vector<8x2x32xf32>
    %c0_12 = arith.constant 0 : index
    %c0_13 = arith.constant 0 : index
    %c0_14 = arith.constant 0 : index
    %8 = vector.load %arg1[%c0_12, %c0_13, %c0_14] : memref<5x4x32xf32, #tpu.memory_space<vmem>>, vector<1x4x32xf32>
    %9 = vector.shape_cast %8 : vector<1x4x32xf32> to vector<4x32xf32>
    %10 = vector.shape_cast %9 : vector<4x32xf32> to vector<1x4x32xf32>
    %11 = vector.broadcast %10 : vector<1x4x32xf32> to vector<8x4x32xf32>
    %c0_15 = arith.constant 0 : index
    %c0_16 = arith.constant 0 : index
    %c0_17 = arith.constant 0 : index
    %12 = tpu.strided_load %arg11[%c0_15, %c0_16, %c0_17] {strides = array<i32: 2, 1, 1>} : memref<20x2x4xf32, #tpu.memory_space<vmem>>, vector<8x2x4xf32>
    %c1 = arith.constant 1 : index
    %c0_18 = arith.constant 0 : index
    %c0_19 = arith.constant 0 : index
    %13 = tpu.strided_load %arg11[%c1, %c0_18, %c0_19] {strides = array<i32: 2, 1, 1>} : memref<20x2x4xf32, #tpu.memory_space<vmem>>, vector<8x2x4xf32>
    %cst_20 = arith.constant dense<0.000000e+00> : vector<8x2x32xf32>
    %14 = tpu.matmul %12, %11, %cst_20 {dimension_numbers = #tpu.dot_dimension_numbers<[2], [1], [1], [2], [0, 0, 0, 1, 1, 2], [0], [0]>} : vector<8x2x4xf32>, vector<8x4x32xf32>, vector<8x2x32xf32> -> vector<8x2x32xf32>
    %15 = arith.addf %6, %14 : vector<8x2x32xf32>
    %cst_21 = arith.constant dense<0.000000e+00> : vector<8x2x32xf32>
    %16 = tpu.matmul %13, %11, %cst_21 {dimension_numbers = #tpu.dot_dimension_numbers<[2], [1], [1], [2], [0, 0, 0, 1, 1, 2], [0], [0]>} : vector<8x2x4xf32>, vector<8x4x32xf32>, vector<8x2x32xf32> -> vector<8x2x32xf32>
    %17 = arith.addf %7, %16 : vector<8x2x32xf32>
    %c1_22 = arith.constant 1 : index
    %c0_23 = arith.constant 0 : index
    %c0_24 = arith.constant 0 : index
    %18 = vector.load %arg1[%c1_22, %c0_23, %c0_24] : memref<5x4x32xf32, #tpu.memory_space<vmem>>, vector<1x4x32xf32>
    %19 = vector.shape_cast %18 : vector<1x4x32xf32> to vector<4x32xf32>
    %20 = vector.shape_cast %19 : vector<4x32xf32> to vector<1x4x32xf32>
    %21 = vector.broadcast %20 : vector<1x4x32xf32> to vector<8x4x32xf32>
    %c1_25 = arith.constant 1 : index
    %c0_26 = arith.constant 0 : index
    %c0_27 = arith.constant 0 : index
    %22 = tpu.strided_load %arg11[%c1_25, %c0_26, %c0_27] {strides = array<i32: 2, 1, 1>} : memref<20x2x4xf32, #tpu.memory_space<vmem>>, vector<8x2x4xf32>
    %c2_28 = arith.constant 2 : index
    %c0_29 = arith.constant 0 : index
    %c0_30 = arith.constant 0 : index
    %23 = tpu.strided_load %arg11[%c2_28, %c0_29, %c0_30] {strides = array<i32: 2, 1, 1>} : memref<20x2x4xf32, #tpu.memory_space<vmem>>, vector<8x2x4xf32>
    %cst_31 = arith.constant dense<0.000000e+00> : vector<8x2x32xf32>
    %24 = tpu.matmul %22, %21, %cst_31 {dimension_numbers = #tpu.dot_dimension_numbers<[2], [1], [1], [2], [0, 0, 0, 1, 1, 2], [0], [0]>} : vector<8x2x4xf32>, vector<8x4x32xf32>, vector<8x2x32xf32> -> vector<8x2x32xf32>
    %25 = arith.addf %15, %24 : vector<8x2x32xf32>
    %cst_32 = arith.constant dense<0.000000e+00> : vector<8x2x32xf32>
    %26 = tpu.matmul %23, %21, %cst_32 {dimension_numbers = #tpu.dot_dimension_numbers<[2], [1], [1], [2], [0, 0, 0, 1, 1, 2], [0], [0]>} : vector<8x2x4xf32>, vector<8x4x32xf32>, vector<8x2x32xf32> -> vector<8x2x32xf32>
    %27 = arith.addf %17, %26 : vector<8x2x32xf32>
    %c2_33 = arith.constant 2 : index
    %c0_34 = arith.constant 0 : index
    %c0_35 = arith.constant 0 : index
    %28 = vector.load %arg1[%c2_33, %c0_34, %c0_35] : memref<5x4x32xf32, #tpu.memory_space<vmem>>, vector<1x4x32xf32>
    %29 = vector.shape_cast %28 : vector<1x4x32xf32> to vector<4x32xf32>
    %30 = vector.shape_cast %29 : vector<4x32xf32> to vector<1x4x32xf32>
    %31 = vector.broadcast %30 : vector<1x4x32xf32> to vector<8x4x32xf32>
    %c2_36 = arith.constant 2 : index
    %c0_37 = arith.constant 0 : index
    %c0_38 = arith.constant 0 : index
    %32 = tpu.strided_load %arg11[%c2_36, %c0_37, %c0_38] {strides = array<i32: 2, 1, 1>} : memref<20x2x4xf32, #tpu.memory_space<vmem>>, vector<8x2x4xf32>
    %c3 = arith.constant 3 : index
    %c0_39 = arith.constant 0 : index
    %c0_40 = arith.constant 0 : index
    %33 = tpu.strided_load %arg11[%c3, %c0_39, %c0_40] {strides = array<i32: 2, 1, 1>} : memref<20x2x4xf32, #tpu.memory_space<vmem>>, vector<8x2x4xf32>
    %cst_41 = arith.constant dense<0.000000e+00> : vector<8x2x32xf32>
    %34 = tpu.matmul %32, %31, %cst_41 {dimension_numbers = #tpu.dot_dimension_numbers<[2], [1], [1], [2], [0, 0, 0, 1, 1, 2], [0], [0]>} : vector<8x2x4xf32>, vector<8x4x32xf32>, vector<8x2x32xf32> -> vector<8x2x32xf32>
    %35 = arith.addf %25, %34 : vector<8x2x32xf32>
    %cst_42 = arith.constant dense<0.000000e+00> : vector<8x2x32xf32>
    %36 = tpu.matmul %33, %31, %cst_42 {dimension_numbers = #tpu.dot_dimension_numbers<[2], [1], [1], [2], [0, 0, 0, 1, 1, 2], [0], [0]>} : vector<8x2x4xf32>, vector<8x4x32xf32>, vector<8x2x32xf32> -> vector<8x2x32xf32>
    %37 = arith.addf %27, %36 : vector<8x2x32xf32>
    %c3_43 = arith.constant 3 : index
    %c0_44 = arith.constant 0 : index
    %c0_45 = arith.constant 0 : index
    %38 = vector.load %arg1[%c3_43, %c0_44, %c0_45] : memref<5x4x32xf32, #tpu.memory_space<vmem>>, vector<1x4x32xf32>
    %39 = vector.shape_cast %38 : vector<1x4x32xf32> to vector<4x32xf32>
    %40 = vector.shape_cast %39 : vector<4x32xf32> to vector<1x4x32xf32>
    %41 = vector.broadcast %40 : vector<1x4x32xf32> to vector<8x4x32xf32>
    %c3_46 = arith.constant 3 : index
    %c0_47 = arith.constant 0 : index
    %c0_48 = arith.constant 0 : index
    %42 = tpu.strided_load %arg11[%c3_46, %c0_47, %c0_48] {strides = array<i32: 2, 1, 1>} : memref<20x2x4xf32, #tpu.memory_space<vmem>>, vector<8x2x4xf32>
    %c4 = arith.constant 4 : index
    %c0_49 = arith.constant 0 : index
    %c0_50 = arith.constant 0 : index
    %43 = tpu.strided_load %arg11[%c4, %c0_49, %c0_50] {strides = array<i32: 2, 1, 1>} : memref<20x2x4xf32, #tpu.memory_space<vmem>>, vector<8x2x4xf32>
    %cst_51 = arith.constant dense<0.000000e+00> : vector<8x2x32xf32>
    %44 = tpu.matmul %42, %41, %cst_51 {dimension_numbers = #tpu.dot_dimension_numbers<[2], [1], [1], [2], [0, 0, 0, 1, 1, 2], [0], [0]>} : vector<8x2x4xf32>, vector<8x4x32xf32>, vector<8x2x32xf32> -> vector<8x2x32xf32>
    %45 = arith.addf %35, %44 : vector<8x2x32xf32>
    %cst_52 = arith.constant dense<0.000000e+00> : vector<8x2x32xf32>
    %46 = tpu.matmul %43, %41, %cst_52 {dimension_numbers = #tpu.dot_dimension_numbers<[2], [1], [1], [2], [0, 0, 0, 1, 1, 2], [0], [0]>} : vector<8x2x4xf32>, vector<8x4x32xf32>, vector<8x2x32xf32> -> vector<8x2x32xf32>
    %47 = arith.addf %37, %46 : vector<8x2x32xf32>
    %c4_53 = arith.constant 4 : index
    %c0_54 = arith.constant 0 : index
    %c0_55 = arith.constant 0 : index
    %48 = vector.load %arg1[%c4_53, %c0_54, %c0_55] : memref<5x4x32xf32, #tpu.memory_space<vmem>>, vector<1x4x32xf32>
    %49 = vector.shape_cast %48 : vector<1x4x32xf32> to vector<4x32xf32>
    %50 = vector.shape_cast %49 : vector<4x32xf32> to vector<1x4x32xf32>
    %51 = vector.broadcast %50 : vector<1x4x32xf32> to vector<8x4x32xf32>
    %c4_56 = arith.constant 4 : index
    %c0_57 = arith.constant 0 : index
    %c0_58 = arith.constant 0 : index
    %52 = tpu.strided_load %arg11[%c4_56, %c0_57, %c0_58] {strides = array<i32: 2, 1, 1>} : memref<20x2x4xf32, #tpu.memory_space<vmem>>, vector<8x2x4xf32>
    %c5 = arith.constant 5 : index
    %c0_59 = arith.constant 0 : index
    %c0_60 = arith.constant 0 : index
    %53 = tpu.strided_load %arg11[%c5, %c0_59, %c0_60] {strides = array<i32: 2, 1, 1>} : memref<20x2x4xf32, #tpu.memory_space<vmem>>, vector<8x2x4xf32>
    %cst_61 = arith.constant dense<0.000000e+00> : vector<8x2x32xf32>
    %54 = tpu.matmul %52, %51, %cst_61 {dimension_numbers = #tpu.dot_dimension_numbers<[2], [1], [1], [2], [0, 0, 0, 1, 1, 2], [0], [0]>} : vector<8x2x4xf32>, vector<8x4x32xf32>, vector<8x2x32xf32> -> vector<8x2x32xf32>
    %55 = arith.addf %45, %54 : vector<8x2x32xf32>
    %cst_62 = arith.constant dense<0.000000e+00> : vector<8x2x32xf32>
    %56 = tpu.matmul %53, %51, %cst_62 {dimension_numbers = #tpu.dot_dimension_numbers<[2], [1], [1], [2], [0, 0, 0, 1, 1, 2], [0], [0]>} : vector<8x2x4xf32>, vector<8x4x32xf32>, vector<8x2x32xf32> -> vector<8x2x32xf32>
    %57 = arith.addf %47, %56 : vector<8x2x32xf32>
    %58 = arith.maximumf %55, %57 : vector<8x2x32xf32>
    %c0_63 = arith.constant 0 : index
    %c0_64 = arith.constant 0 : index
    %59 = vector.load %arg2[%c0_63, %c0_64] : memref<1x32xf32, #tpu.memory_space<vmem>>, vector<1x32xf32>
    %60 = vector.shape_cast %59 : vector<1x32xf32> to vector<1x1x32xf32>
    %61 = vector.broadcast %60 : vector<1x1x32xf32> to vector<8x2x32xf32>
    %62 = arith.addf %58, %61 : vector<8x2x32xf32>
    %cst_65 = arith.constant 0.000000e+00 : f32
    %63 = vector.broadcast %cst_65 : f32 to vector<8x2x32xf32>
    %64 = arith.maximumf %62, %63 : vector<8x2x32xf32>
    %cst_66 = arith.constant 0.000000e+00 : f32
    %65 = vector.broadcast %cst_66 : f32 to vector<2x2x32xf32>
    %c0_67 = arith.constant 0 : index
    %c0_68 = arith.constant 0 : index
    %c0_69 = arith.constant 0 : index
    %66 = vector.load %arg12[%c0_67, %c0_68, %c0_69] : memref<12x2x32xf32, #tpu.memory_space<vmem>>, vector<2x2x32xf32>
    tpu.vector_store %arg12[%c0_67, %c0_68, %c0_69], %65 {strides = array<i32>} : memref<12x2x32xf32, #tpu.memory_space<vmem>>, vector<2x2x32xf32>,
    %cst_70 = arith.constant 0.000000e+00 : f32
    %67 = vector.broadcast %cst_70 : f32 to vector<2x2x32xf32>
    %c10 = arith.constant 10 : index
    %c0_71 = arith.constant 0 : index
    %c0_72 = arith.constant 0 : index
    %68 = vector.load %arg12[%c10, %c0_71, %c0_72] : memref<12x2x32xf32, #tpu.memory_space<vmem>>, vector<2x2x32xf32>
    tpu.vector_store %arg12[%c10, %c0_71, %c0_72], %67 {strides = array<i32>} : memref<12x2x32xf32, #tpu.memory_space<vmem>>, vector<2x2x32xf32>,
    %c2_73 = arith.constant 2 : index
    %c0_74 = arith.constant 0 : index
    %c0_75 = arith.constant 0 : index
    %69 = vector.load %arg12[%c2_73, %c0_74, %c0_75] : memref<12x2x32xf32, #tpu.memory_space<vmem>>, vector<8x2x32xf32>
    tpu.vector_store %arg12[%c2_73, %c0_74, %c0_75], %64 {strides = array<i32>} : memref<12x2x32xf32, #tpu.memory_space<vmem>>, vector<8x2x32xf32>,
    %cst_76 = arith.constant 0.000000e+00 : f32
    %70 = vector.broadcast %cst_76 : f32 to vector<4x2x32xf32>
    %cst_77 = arith.constant 0.000000e+00 : f32
    %71 = vector.broadcast %cst_77 : f32 to vector<4x2x32xf32>
    %c0_78 = arith.constant 0 : index
    %c0_79 = arith.constant 0 : index
    %c0_80 = arith.constant 0 : index
    %72 = vector.load %arg3[%c0_78, %c0_79, %c0_80] : memref<5x32x32xf32, #tpu.memory_space<vmem>>, vector<1x32x32xf32>
    %73 = vector.shape_cast %72 : vector<1x32x32xf32> to vector<32x32xf32>
    %74 = vector.shape_cast %73 : vector<32x32xf32> to vector<1x32x32xf32>
    %75 = vector.broadcast %74 : vector<1x32x32xf32> to vector<4x32x32xf32>
    %c0_81 = arith.constant 0 : index
    %c0_82 = arith.constant 0 : index
    %c0_83 = arith.constant 0 : index
    %76 = tpu.strided_load %arg12[%c0_81, %c0_82, %c0_83] {strides = array<i32: 2, 1, 1>} : memref<12x2x32xf32, #tpu.memory_space<vmem>>, vector<4x2x32xf32>
    %c1_84 = arith.constant 1 : index
    %c0_85 = arith.constant 0 : index
    %c0_86 = arith.constant 0 : index
    %77 = tpu.strided_load %arg12[%c1_84, %c0_85, %c0_86] {strides = array<i32: 2, 1, 1>} : memref<12x2x32xf32, #tpu.memory_space<vmem>>, vector<4x2x32xf32>
    %cst_87 = arith.constant dense<0.000000e+00> : vector<4x2x32xf32>
    %78 = tpu.matmul %76, %75, %cst_87 {dimension_numbers = #tpu.dot_dimension_numbers<[2], [1], [1], [2], [0, 0, 0, 1, 1, 2], [0], [0]>} : vector<4x2x32xf32>, vector<4x32x32xf32>, vector<4x2x32xf32> -> vector<4x2x32xf32>
    %79 = arith.addf %70, %78 : vector<4x2x32xf32>
    %cst_88 = arith.constant dense<0.000000e+00> : vector<4x2x32xf32>
    %80 = tpu.matmul %77, %75, %cst_88 {dimension_numbers = #tpu.dot_dimension_numbers<[2], [1], [1], [2], [0, 0, 0, 1, 1, 2], [0], [0]>} : vector<4x2x32xf32>, vector<4x32x32xf32>, vector<4x2x32xf32> -> vector<4x2x32xf32>
    %81 = arith.addf %71, %80 : vector<4x2x32xf32>
    %c1_89 = arith.constant 1 : index
    %c0_90 = arith.constant 0 : index
    %c0_91 = arith.constant 0 : index
    %82 = vector.load %arg3[%c1_89, %c0_90, %c0_91] : memref<5x32x32xf32, #tpu.memory_space<vmem>>, vector<1x32x32xf32>
    %83 = vector.shape_cast %82 : vector<1x32x32xf32> to vector<32x32xf32>
    %84 = vector.shape_cast %83 : vector<32x32xf32> to vector<1x32x32xf32>
    %85 = vector.broadcast %84 : vector<1x32x32xf32> to vector<4x32x32xf32>
    %c1_92 = arith.constant 1 : index
    %c0_93 = arith.constant 0 : index
    %c0_94 = arith.constant 0 : index
    %86 = tpu.strided_load %arg12[%c1_92, %c0_93, %c0_94] {strides = array<i32: 2, 1, 1>} : memref<12x2x32xf32, #tpu.memory_space<vmem>>, vector<4x2x32xf32>
    %c2_95 = arith.constant 2 : index
    %c0_96 = arith.constant 0 : index
    %c0_97 = arith.constant 0 : index
    %87 = tpu.strided_load %arg12[%c2_95, %c0_96, %c0_97] {strides = array<i32: 2, 1, 1>} : memref<12x2x32xf32, #tpu.memory_space<vmem>>, vector<4x2x32xf32>
    %cst_98 = arith.constant dense<0.000000e+00> : vector<4x2x32xf32>
    %88 = tpu.matmul %86, %85, %cst_98 {dimension_numbers = #tpu.dot_dimension_numbers<[2], [1], [1], [2], [0, 0, 0, 1, 1, 2], [0], [0]>} : vector<4x2x32xf32>, vector<4x32x32xf32>, vector<4x2x32xf32> -> vector<4x2x32xf32>
    %89 = arith.addf %79, %88 : vector<4x2x32xf32>
    %cst_99 = arith.constant dense<0.000000e+00> : vector<4x2x32xf32>
    %90 = tpu.matmul %87, %85, %cst_99 {dimension_numbers = #tpu.dot_dimension_numbers<[2], [1], [1], [2], [0, 0, 0, 1, 1, 2], [0], [0]>} : vector<4x2x32xf32>, vector<4x32x32xf32>, vector<4x2x32xf32> -> vector<4x2x32xf32>
    %91 = arith.addf %81, %90 : vector<4x2x32xf32>
    %c2_100 = arith.constant 2 : index
    %c0_101 = arith.constant 0 : index
    %c0_102 = arith.constant 0 : index
    %92 = vector.load %arg3[%c2_100, %c0_101, %c0_102] : memref<5x32x32xf32, #tpu.memory_space<vmem>>, vector<1x32x32xf32>
    %93 = vector.shape_cast %92 : vector<1x32x32xf32> to vector<32x32xf32>
    %94 = vector.shape_cast %93 : vector<32x32xf32> to vector<1x32x32xf32>
    %95 = vector.broadcast %94 : vector<1x32x32xf32> to vector<4x32x32xf32>
    %c2_103 = arith.constant 2 : index
    %c0_104 = arith.constant 0 : index
    %c0_105 = arith.constant 0 : index
    %96 = tpu.strided_load %arg12[%c2_103, %c0_104, %c0_105] {strides = array<i32: 2, 1, 1>} : memref<12x2x32xf32, #tpu.memory_space<vmem>>, vector<4x2x32xf32>
    %c3_106 = arith.constant 3 : index
    %c0_107 = arith.constant 0 : index
    %c0_108 = arith.constant 0 : index
    %97 = tpu.strided_load %arg12[%c3_106, %c0_107, %c0_108] {strides = array<i32: 2, 1, 1>} : memref<12x2x32xf32, #tpu.memory_space<vmem>>, vector<4x2x32xf32>
    %cst_109 = arith.constant dense<0.000000e+00> : vector<4x2x32xf32>
    %98 = tpu.matmul %96, %95, %cst_109 {dimension_numbers = #tpu.dot_dimension_numbers<[2], [1], [1], [2], [0, 0, 0, 1, 1, 2], [0], [0]>} : vector<4x2x32xf32>, vector<4x32x32xf32>, vector<4x2x32xf32> -> vector<4x2x32xf32>
    %99 = arith.addf %89, %98 : vector<4x2x32xf32>
    %cst_110 = arith.constant dense<0.000000e+00> : vector<4x2x32xf32>
    %100 = tpu.matmul %97, %95, %cst_110 {dimension_numbers = #tpu.dot_dimension_numbers<[2], [1], [1], [2], [0, 0, 0, 1, 1, 2], [0], [0]>} : vector<4x2x32xf32>, vector<4x32x32xf32>, vector<4x2x32xf32> -> vector<4x2x32xf32>
    %101 = arith.addf %91, %100 : vector<4x2x32xf32>
    %c3_111 = arith.constant 3 : index
    %c0_112 = arith.constant 0 : index
    %c0_113 = arith.constant 0 : index
    %102 = vector.load %arg3[%c3_111, %c0_112, %c0_113] : memref<5x32x32xf32, #tpu.memory_space<vmem>>, vector<1x32x32xf32>
    %103 = vector.shape_cast %102 : vector<1x32x32xf32> to vector<32x32xf32>
    %104 = vector.shape_cast %103 : vector<32x32xf32> to vector<1x32x32xf32>
    %105 = vector.broadcast %104 : vector<1x32x32xf32> to vector<4x32x32xf32>
    %c3_114 = arith.constant 3 : index
    %c0_115 = arith.constant 0 : index
    %c0_116 = arith.constant 0 : index
    %106 = tpu.strided_load %arg12[%c3_114, %c0_115, %c0_116] {strides = array<i32: 2, 1, 1>} : memref<12x2x32xf32, #tpu.memory_space<vmem>>, vector<4x2x32xf32>
    %c4_117 = arith.constant 4 : index
    %c0_118 = arith.constant 0 : index
    %c0_119 = arith.constant 0 : index
    %107 = tpu.strided_load %arg12[%c4_117, %c0_118, %c0_119] {strides = array<i32: 2, 1, 1>} : memref<12x2x32xf32, #tpu.memory_space<vmem>>, vector<4x2x32xf32>
    %cst_120 = arith.constant dense<0.000000e+00> : vector<4x2x32xf32>
    %108 = tpu.matmul %106, %105, %cst_120 {dimension_numbers = #tpu.dot_dimension_numbers<[2], [1], [1], [2], [0, 0, 0, 1, 1, 2], [0], [0]>} : vector<4x2x32xf32>, vector<4x32x32xf32>, vector<4x2x32xf32> -> vector<4x2x32xf32>
    %109 = arith.addf %99, %108 : vector<4x2x32xf32>
    %cst_121 = arith.constant dense<0.000000e+00> : vector<4x2x32xf32>
    %110 = tpu.matmul %107, %105, %cst_121 {dimension_numbers = #tpu.dot_dimension_numbers<[2], [1], [1], [2], [0, 0, 0, 1, 1, 2], [0], [0]>} : vector<4x2x32xf32>, vector<4x32x32xf32>, vector<4x2x32xf32> -> vector<4x2x32xf32>
    %111 = arith.addf %101, %110 : vector<4x2x32xf32>
    %c4_122 = arith.constant 4 : index
    %c0_123 = arith.constant 0 : index
    %c0_124 = arith.constant 0 : index
    %112 = vector.load %arg3[%c4_122, %c0_123, %c0_124] : memref<5x32x32xf32, #tpu.memory_space<vmem>>, vector<1x32x32xf32>
    %113 = vector.shape_cast %112 : vector<1x32x32xf32> to vector<32x32xf32>
    %114 = vector.shape_cast %113 : vector<32x32xf32> to vector<1x32x32xf32>
    %115 = vector.broadcast %114 : vector<1x32x32xf32> to vector<4x32x32xf32>
    %c4_125 = arith.constant 4 : index
    %c0_126 = arith.constant 0 : index
    %c0_127 = arith.constant 0 : index
    %116 = tpu.strided_load %arg12[%c4_125, %c0_126, %c0_127] {strides = array<i32: 2, 1, 1>} : memref<12x2x32xf32, #tpu.memory_space<vmem>>, vector<4x2x32xf32>
    %c5_128 = arith.constant 5 : index
    %c0_129 = arith.constant 0 : index
    %c0_130 = arith.constant 0 : index
    %117 = tpu.strided_load %arg12[%c5_128, %c0_129, %c0_130] {strides = array<i32: 2, 1, 1>} : memref<12x2x32xf32, #tpu.memory_space<vmem>>, vector<4x2x32xf32>
    %cst_131 = arith.constant dense<0.000000e+00> : vector<4x2x32xf32>
    %118 = tpu.matmul %116, %115, %cst_131 {dimension_numbers = #tpu.dot_dimension_numbers<[2], [1], [1], [2], [0, 0, 0, 1, 1, 2], [0], [0]>} : vector<4x2x32xf32>, vector<4x32x32xf32>, vector<4x2x32xf32> -> vector<4x2x32xf32>
    %119 = arith.addf %109, %118 : vector<4x2x32xf32>
    %cst_132 = arith.constant dense<0.000000e+00> : vector<4x2x32xf32>
    %120 = tpu.matmul %117, %115, %cst_132 {dimension_numbers = #tpu.dot_dimension_numbers<[2], [1], [1], [2], [0, 0, 0, 1, 1, 2], [0], [0]>} : vector<4x2x32xf32>, vector<4x32x32xf32>, vector<4x2x32xf32> -> vector<4x2x32xf32>
    %121 = arith.addf %111, %120 : vector<4x2x32xf32>
    %122 = arith.maximumf %119, %121 : vector<4x2x32xf32>
    %c0_133 = arith.constant 0 : index
    %c0_134 = arith.constant 0 : index
    %123 = vector.load %arg4[%c0_133, %c0_134] : memref<1x32xf32, #tpu.memory_space<vmem>>, vector<1x32xf32>
    %124 = vector.shape_cast %123 : vector<1x32xf32> to vector<1x1x32xf32>
    %125 = vector.broadcast %124 : vector<1x1x32xf32> to vector<4x2x32xf32>
    %126 = arith.addf %122, %125 : vector<4x2x32xf32>
    %cst_135 = arith.constant 0.000000e+00 : f32
    %127 = vector.broadcast %cst_135 : f32 to vector<4x2x32xf32>
    %128 = arith.maximumf %126, %127 : vector<4x2x32xf32>
    %129 = vector.extract_strided_slice %128 {offsets = [0, 0, 0], sizes = [1, 2, 32], strides = [1, 1, 1]} : vector<4x2x32xf32> to vector<1x2x32xf32>
    %130 = vector.shape_cast %129 : vector<1x2x32xf32> to vector<2x32xf32>
    %131 = vector.extract_strided_slice %128 {offsets = [3, 0, 0], sizes = [1, 2, 32], strides = [1, 1, 1]} : vector<4x2x32xf32> to vector<1x2x32xf32>
    %132 = vector.shape_cast %131 : vector<1x2x32xf32> to vector<2x32xf32>
    %133 = tpu.concatenate %130, %132 in 1 : vector<2x32xf32>, vector<2x32xf32> -> vector<2x64xf32>
    %134 = vector.extract_strided_slice %128 {offsets = [1, 0, 0], sizes = [1, 2, 32], strides = [1, 1, 1]} : vector<4x2x32xf32> to vector<1x2x32xf32>
    %135 = vector.shape_cast %134 : vector<1x2x32xf32> to vector<2x32xf32>
    %136 = vector.extract_strided_slice %128 {offsets = [2, 0, 0], sizes = [1, 2, 32], strides = [1, 1, 1]} : vector<4x2x32xf32> to vector<1x2x32xf32>
    %137 = vector.shape_cast %136 : vector<1x2x32xf32> to vector<2x32xf32>
    %138 = tpu.concatenate %135, %137 in 1 : vector<2x32xf32>, vector<2x32xf32> -> vector<2x64xf32>
    %139 = vector.extract_strided_slice %128 {offsets = [2, 0, 0], sizes = [1, 2, 32], strides = [1, 1, 1]} : vector<4x2x32xf32> to vector<1x2x32xf32>
    %140 = vector.shape_cast %139 : vector<1x2x32xf32> to vector<2x32xf32>
    %141 = vector.extract_strided_slice %128 {offsets = [1, 0, 0], sizes = [1, 2, 32], strides = [1, 1, 1]} : vector<4x2x32xf32> to vector<1x2x32xf32>
    %142 = vector.shape_cast %141 : vector<1x2x32xf32> to vector<2x32xf32>
    %143 = tpu.concatenate %140, %142 in 1 : vector<2x32xf32>, vector<2x32xf32> -> vector<2x64xf32>
    %144 = vector.extract_strided_slice %128 {offsets = [3, 0, 0], sizes = [1, 2, 32], strides = [1, 1, 1]} : vector<4x2x32xf32> to vector<1x2x32xf32>
    %145 = vector.shape_cast %144 : vector<1x2x32xf32> to vector<2x32xf32>
    %146 = vector.extract_strided_slice %128 {offsets = [0, 0, 0], sizes = [1, 2, 32], strides = [1, 1, 1]} : vector<4x2x32xf32> to vector<1x2x32xf32>
    %147 = vector.shape_cast %146 : vector<1x2x32xf32> to vector<2x32xf32>
    %148 = tpu.concatenate %145, %147 in 1 : vector<2x32xf32>, vector<2x32xf32> -> vector<2x64xf32>
    %149 = tpu.concatenate %133, %138, %143, %148 in 0 : vector<2x64xf32>, vector<2x64xf32>, vector<2x64xf32>, vector<2x64xf32> -> vector<8x64xf32>
    %c0_136 = arith.constant 0 : index
    %c0_137 = arith.constant 0 : index
    %150 = vector.load %arg5[%c0_136, %c0_137] : memref<64x256xf32, #tpu.memory_space<vmem>>, vector<64x256xf32>
    %cst_138 = arith.constant dense<0.000000e+00> : vector<8x256xf32>
    %151 = tpu.matmul %149, %150, %cst_138 {dimension_numbers = #tpu.dot_dimension_numbers<[1], [0], [0], [1], [0, 0, 1, 1], [], []>} : vector<8x64xf32>, vector<64x256xf32>, vector<8x256xf32> -> vector<8x256xf32>
    %c0_139 = arith.constant 0 : index
    %c0_140 = arith.constant 0 : index
    %152 = vector.load %arg6[%c0_139, %c0_140] : memref<1x256xf32, #tpu.memory_space<vmem>>, vector<1x256xf32>
    %153 = vector.broadcast %152 : vector<1x256xf32> to vector<8x256xf32>
    %154 = arith.addf %151, %153 : vector<8x256xf32>
    %c0_141 = arith.constant 0 : index
    %c0_142 = arith.constant 0 : index
    %155 = vector.load %arg7[%c0_141, %c0_142] : memref<64x256xf32, #tpu.memory_space<vmem>>, vector<64x256xf32>
    %cst_143 = arith.constant 0.000000e+00 : f32
    %156 = vector.broadcast %cst_143 : f32 to vector<2x64xf32>
    %cst_144 = arith.constant 0.000000e+00 : f32
    %157 = vector.broadcast %cst_144 : f32 to vector<2x64xf32>
    %158 = vector.extract_strided_slice %154 {offsets = [0, 0], sizes = [2, 256], strides = [1, 1]} : vector<8x256xf32> to vector<2x256xf32>
    %cst_145 = arith.constant dense<0.000000e+00> : vector<2x256xf32>
    %159 = tpu.matmul %156, %155, %cst_145 {dimension_numbers = #tpu.dot_dimension_numbers<[1], [0], [0], [1], [0, 0, 1, 1], [], []>} : vector<2x64xf32>, vector<64x256xf32>, vector<2x256xf32> -> vector<2x256xf32>
    %160 = arith.addf %158, %159 : vector<2x256xf32>
    %161 = vector.extract_strided_slice %160 {offsets = [0, 0], sizes = [2, 64], strides = [1, 1]} : vector<2x256xf32> to vector<2x64xf32>
    %162 = arith.negf %161 : vector<2x64xf32>
    %163 = math.exp %162 : vector<2x64xf32>
    %cst_146 = arith.constant 1.000000e+00 : f32
    %164 = vector.broadcast %cst_146 : f32 to vector<2x64xf32>
    %165 = arith.addf %164, %163 : vector<2x64xf32>
    %166 = arith.divf %164, %165 : vector<2x64xf32>
    %167 = vector.extract_strided_slice %160 {offsets = [0, 64], sizes = [2, 64], strides = [1, 1]} : vector<2x256xf32> to vector<2x64xf32>
    %168 = arith.negf %167 : vector<2x64xf32>
    %169 = math.exp %168 : vector<2x64xf32>
    %cst_147 = arith.constant 1.000000e+00 : f32
    %170 = vector.broadcast %cst_147 : f32 to vector<2x64xf32>
    %171 = arith.addf %170, %169 : vector<2x64xf32>
    %172 = arith.divf %170, %171 : vector<2x64xf32>
    %173 = vector.extract_strided_slice %160 {offsets = [0, 128], sizes = [2, 64], strides = [1, 1]} : vector<2x256xf32> to vector<2x64xf32>
    %174 = math.tanh %173 : vector<2x64xf32>
    %175 = vector.extract_strided_slice %160 {offsets = [0, 192], sizes = [2, 64], strides = [1, 1]} : vector<2x256xf32> to vector<2x64xf32>
    %176 = arith.negf %175 : vector<2x64xf32>
    %177 = math.exp %176 : vector<2x64xf32>
    %cst_148 = arith.constant 1.000000e+00 : f32
    %178 = vector.broadcast %cst_148 : f32 to vector<2x64xf32>
    %179 = arith.addf %178, %177 : vector<2x64xf32>
    %180 = arith.divf %178, %179 : vector<2x64xf32>
    %181 = arith.mulf %172, %157 : vector<2x64xf32>
    %182 = arith.mulf %166, %174 : vector<2x64xf32>
    %183 = arith.addf %181, %182 : vector<2x64xf32>
    %184 = math.tanh %183 : vector<2x64xf32>
    %185 = arith.mulf %180, %184 : vector<2x64xf32>
    %186 = vector.extract_strided_slice %154 {offsets = [2, 0], sizes = [2, 256], strides = [1, 1]} : vector<8x256xf32> to vector<2x256xf32>
    %cst_149 = arith.constant dense<0.000000e+00> : vector<2x256xf32>
    %187 = tpu.matmul %185, %155, %cst_149 {dimension_numbers = #tpu.dot_dimension_numbers<[1], [0], [0], [1], [0, 0, 1, 1], [], []>} : vector<2x64xf32>, vector<64x256xf32>, vector<2x256xf32> -> vector<2x256xf32>
    %188 = arith.addf %186, %187 : vector<2x256xf32>
    %189 = vector.extract_strided_slice %188 {offsets = [0, 0], sizes = [2, 64], strides = [1, 1]} : vector<2x256xf32> to vector<2x64xf32>
    %190 = arith.negf %189 : vector<2x64xf32>
    %191 = math.exp %190 : vector<2x64xf32>
    %cst_150 = arith.constant 1.000000e+00 : f32
    %192 = vector.broadcast %cst_150 : f32 to vector<2x64xf32>
    %193 = arith.addf %192, %191 : vector<2x64xf32>
    %194 = arith.divf %192, %193 : vector<2x64xf32>
    %195 = vector.extract_strided_slice %188 {offsets = [0, 64], sizes = [2, 64], strides = [1, 1]} : vector<2x256xf32> to vector<2x64xf32>
    %196 = arith.negf %195 : vector<2x64xf32>
    %197 = math.exp %196 : vector<2x64xf32>
    %cst_151 = arith.constant 1.000000e+00 : f32
    %198 = vector.broadcast %cst_151 : f32 to vector<2x64xf32>
    %199 = arith.addf %198, %197 : vector<2x64xf32>
    %200 = arith.divf %198, %199 : vector<2x64xf32>
    %201 = vector.extract_strided_slice %188 {offsets = [0, 128], sizes = [2, 64], strides = [1, 1]} : vector<2x256xf32> to vector<2x64xf32>
    %202 = math.tanh %201 : vector<2x64xf32>
    %203 = vector.extract_strided_slice %188 {offsets = [0, 192], sizes = [2, 64], strides = [1, 1]} : vector<2x256xf32> to vector<2x64xf32>
    %204 = arith.negf %203 : vector<2x64xf32>
    %205 = math.exp %204 : vector<2x64xf32>
    %cst_152 = arith.constant 1.000000e+00 : f32
    %206 = vector.broadcast %cst_152 : f32 to vector<2x64xf32>
    %207 = arith.addf %206, %205 : vector<2x64xf32>
    %208 = arith.divf %206, %207 : vector<2x64xf32>
    %209 = arith.mulf %200, %183 : vector<2x64xf32>
    %210 = arith.mulf %194, %202 : vector<2x64xf32>
    %211 = arith.addf %209, %210 : vector<2x64xf32>
    %212 = math.tanh %211 : vector<2x64xf32>
    %213 = arith.mulf %208, %212 : vector<2x64xf32>
    %214 = vector.extract_strided_slice %154 {offsets = [4, 0], sizes = [2, 256], strides = [1, 1]} : vector<8x256xf32> to vector<2x256xf32>
    %cst_153 = arith.constant dense<0.000000e+00> : vector<2x256xf32>
    %215 = tpu.matmul %213, %155, %cst_153 {dimension_numbers = #tpu.dot_dimension_numbers<[1], [0], [0], [1], [0, 0, 1, 1], [], []>} : vector<2x64xf32>, vector<64x256xf32>, vector<2x256xf32> -> vector<2x256xf32>
    %216 = arith.addf %214, %215 : vector<2x256xf32>
    %217 = vector.extract_strided_slice %216 {offsets = [0, 0], sizes = [2, 64], strides = [1, 1]} : vector<2x256xf32> to vector<2x64xf32>
    %218 = arith.negf %217 : vector<2x64xf32>
    %219 = math.exp %218 : vector<2x64xf32>
    %cst_154 = arith.constant 1.000000e+00 : f32
    %220 = vector.broadcast %cst_154 : f32 to vector<2x64xf32>
    %221 = arith.addf %220, %219 : vector<2x64xf32>
    %222 = arith.divf %220, %221 : vector<2x64xf32>
    %223 = vector.extract_strided_slice %216 {offsets = [0, 64], sizes = [2, 64], strides = [1, 1]} : vector<2x256xf32> to vector<2x64xf32>
    %224 = arith.negf %223 : vector<2x64xf32>
    %225 = math.exp %224 : vector<2x64xf32>
    %cst_155 = arith.constant 1.000000e+00 : f32
    %226 = vector.broadcast %cst_155 : f32 to vector<2x64xf32>
    %227 = arith.addf %226, %225 : vector<2x64xf32>
    %228 = arith.divf %226, %227 : vector<2x64xf32>
    %229 = vector.extract_strided_slice %216 {offsets = [0, 128], sizes = [2, 64], strides = [1, 1]} : vector<2x256xf32> to vector<2x64xf32>
    %230 = math.tanh %229 : vector<2x64xf32>
    %231 = vector.extract_strided_slice %216 {offsets = [0, 192], sizes = [2, 64], strides = [1, 1]} : vector<2x256xf32> to vector<2x64xf32>
    %232 = arith.negf %231 : vector<2x64xf32>
    %233 = math.exp %232 : vector<2x64xf32>
    %cst_156 = arith.constant 1.000000e+00 : f32
    %234 = vector.broadcast %cst_156 : f32 to vector<2x64xf32>
    %235 = arith.addf %234, %233 : vector<2x64xf32>
    %236 = arith.divf %234, %235 : vector<2x64xf32>
    %237 = arith.mulf %228, %211 : vector<2x64xf32>
    %238 = arith.mulf %222, %230 : vector<2x64xf32>
    %239 = arith.addf %237, %238 : vector<2x64xf32>
    %240 = math.tanh %239 : vector<2x64xf32>
    %241 = arith.mulf %236, %240 : vector<2x64xf32>
    %242 = vector.extract_strided_slice %154 {offsets = [6, 0], sizes = [2, 256], strides = [1, 1]} : vector<8x256xf32> to vector<2x256xf32>
    %cst_157 = arith.constant dense<0.000000e+00> : vector<2x256xf32>
    %243 = tpu.matmul %241, %155, %cst_157 {dimension_numbers = #tpu.dot_dimension_numbers<[1], [0], [0], [1], [0, 0, 1, 1], [], []>} : vector<2x64xf32>, vector<64x256xf32>, vector<2x256xf32> -> vector<2x256xf32>
    %244 = arith.addf %242, %243 : vector<2x256xf32>
    %245 = vector.extract_strided_slice %244 {offsets = [0, 0], sizes = [2, 64], strides = [1, 1]} : vector<2x256xf32> to vector<2x64xf32>
    %246 = arith.negf %245 : vector<2x64xf32>
    %247 = math.exp %246 : vector<2x64xf32>
    %cst_158 = arith.constant 1.000000e+00 : f32
    %248 = vector.broadcast %cst_158 : f32 to vector<2x64xf32>
    %249 = arith.addf %248, %247 : vector<2x64xf32>
    %250 = arith.divf %248, %249 : vector<2x64xf32>
    %251 = vector.extract_strided_slice %244 {offsets = [0, 64], sizes = [2, 64], strides = [1, 1]} : vector<2x256xf32> to vector<2x64xf32>
    %252 = arith.negf %251 : vector<2x64xf32>
    %253 = math.exp %252 : vector<2x64xf32>
    %cst_159 = arith.constant 1.000000e+00 : f32
    %254 = vector.broadcast %cst_159 : f32 to vector<2x64xf32>
    %255 = arith.addf %254, %253 : vector<2x64xf32>
    %256 = arith.divf %254, %255 : vector<2x64xf32>
    %257 = vector.extract_strided_slice %244 {offsets = [0, 128], sizes = [2, 64], strides = [1, 1]} : vector<2x256xf32> to vector<2x64xf32>
    %258 = math.tanh %257 : vector<2x64xf32>
    %259 = vector.extract_strided_slice %244 {offsets = [0, 192], sizes = [2, 64], strides = [1, 1]} : vector<2x256xf32> to vector<2x64xf32>
    %260 = arith.negf %259 : vector<2x64xf32>
    %261 = math.exp %260 : vector<2x64xf32>
    %cst_160 = arith.constant 1.000000e+00 : f32
    %262 = vector.broadcast %cst_160 : f32 to vector<2x64xf32>
    %263 = arith.addf %262, %261 : vector<2x64xf32>
    %264 = arith.divf %262, %263 : vector<2x64xf32>
    %265 = arith.mulf %256, %239 : vector<2x64xf32>
    %266 = arith.mulf %250, %258 : vector<2x64xf32>
    %267 = arith.addf %265, %266 : vector<2x64xf32>
    %268 = math.tanh %267 : vector<2x64xf32>
    %269 = arith.mulf %264, %268 : vector<2x64xf32>
    %c0_161 = arith.constant 0 : index
    %c0_162 = arith.constant 0 : index
    %270 = vector.load %arg8[%c0_161, %c0_162] : memref<1x64xf32, #tpu.memory_space<vmem>>, vector<1x64xf32>
    %271 = vector.broadcast %270 : vector<1x64xf32> to vector<2x64xf32>
    %272 = arith.mulf %269, %271 : vector<2x64xf32>
    %cst_163 = arith.constant dense<0.000000e+00> : vector<2xf32>
    %273 = vector.multi_reduction <add>, %272, %cst_163 [1] : vector<2x64xf32> to vector<2xf32>
    %274 = vector.shape_cast %273 : vector<2xf32> to vector<2x1xf32>
    %c0_164 = arith.constant 0 : index
    %c0_165 = arith.constant 0 : index
    %275 = memref.load %arg9[%c0_164, %c0_165] : memref<1x1xf32, #tpu.memory_space<smem>>
    %276 = vector.broadcast %275 : f32 to vector<2x1xf32>
    %277 = arith.addf %274, %276 : vector<2x1xf32>
    %278 = arith.negf %277 : vector<2x1xf32>
    %279 = math.exp %278 : vector<2x1xf32>
    %cst_166 = arith.constant 1.000000e+00 : f32
    %280 = vector.broadcast %cst_166 : f32 to vector<2x1xf32>
    %281 = arith.addf %280, %279 : vector<2x1xf32>
    %282 = arith.divf %280, %281 : vector<2x1xf32>
    %c0_167 = arith.constant 0 : index
    %c0_168 = arith.constant 0 : index
    %283 = vector.load %arg10[%c0_167, %c0_168] : memref<2x1xf32, #tpu.memory_space<vmem>>, vector<2x1xf32>
    tpu.vector_store %arg10[%c0_167, %c0_168], %282 {strides = array<i32>} : memref<2x1xf32, #tpu.memory_space<vmem>>, vector<2x1xf32>,
    return
  }
}

</mosaic_0001>

<bundles_post_ra>
// kernel: tpu_custom_call.1
= control target key start
LH: loop header
LB: loop body
LE: loop exit
PB: predicated region body
PF: predicated region fallthrough
CT: control target
= control target key end

     0   :  { %16 = vsyncpa [#allocation6], 0  ;;  %s12719_s0 = inlined_call_operand.vmem [shape: f32[16,2,4], index: 0, kind: input, shape index: {}]   ;;  %s12720_s1 = inlined_call_operand.vmem [shape: f32[5,4,32], index: 1, kind: input, shape index: {}]   ;;  %s12721_s2 = inlined_call_operand.vmem [shape: f32[1,32], index: 2, kind: input, shape index: {}]   ;;  %s12722_s3 = inlined_call_operand.hbm [shape: f32[5,32,32], index: 3, kind: input, shape index: {}]   ;;  %s12723_s4 = inlined_call_operand.vmem [shape: f32[1,32], index: 4, kind: input, shape index: {}]   ;;  %s12724_s5 = inlined_call_operand.hbm [shape: f32[64,256], index: 5, kind: input, shape index: {}]   ;;  %s12725_s6 = inlined_call_operand.vmem [shape: f32[1,256], index: 6, kind: input, shape index: {}]   ;;  %s12726_s7 = inlined_call_operand.hbm [shape: f32[64,256], index: 7, kind: input, shape index: {}]   ;;  %s12727_s8 = inlined_call_operand.vmem [shape: f32[1,64], index: 8, kind: input, shape index: {}]   ;;  %s12728_s9 = inlined_call_operand.<no memory space> [shape: f32[1,1], index: 9, kind: input, shape index: {}]   ;;  %s12729_s10 = inlined_call_operand.vmem [shape: f32[2,1], index: 10, kind: output, shape index: {}]  }
   0x1   :  { %17 = vsyncpa [#allocation8], 0  ;;  %s11162_s13 = smov [#allocation7]  }
   0x2   :  { %s43_s14 = sshll.u32 %s11162_s13, 4  ;;  %s44_s14 = int_to_ptr.vmem [resolvable:$true] %s43_s14 }
   0x3   :  { %s11106_s15 = scalar_lea.vmem %s44_s14, 2048  ;;  %p11111_p1 = scmp.lt.s32.totalorder %s44_s14, %s44_s14 }
   0x4   :  { %p11107_p0 = scmp.ne.s32.totalorder %s44_s14, %s11106_s15  ;;  %p11112_p2 = scmp.lt.s32.totalorder %s11106_s15, %s11106_s15 }
   0x6   :  { %p11113_p3 = por %p11112_p2, %p11111_p1 }
   0x8   :  { %p11114_p4 = pnand %p11113_p3, %p11107_p0 }
   0xa   :  { %11117 = shalt.err (!%p11114_p4)
}
   0xb   :  { %s11163_s16 = smov 256   ;;  %s11164_s17 = smov 16  }
   0xc   :  { %49 = dma.hbm_to_vmem [thread:$0]  %s12724_s5, 2048, %s44_s14, [#allocation8], %s11163_s16, %s11163_s16, %s11164_s17  }
   0xd   :  { %s11165_s20 = smov [#allocation5]  }
   0xe   :  { %s29_s21 = sshll.u32 %s11165_s20, 4  ;;  %s30_s21 = int_to_ptr.vmem [resolvable:$true] %s29_s21 }
   0xf   :  { %s11126_s22 = scalar_lea.vmem %s30_s21, 2560  ;;  %p11131_p6 = scmp.lt.s32.totalorder %s30_s21, %s30_s21 }
  0x10   :  { %p11127_p5 = scmp.ne.s32.totalorder %s30_s21, %s11126_s22  ;;  %p11132_p7 = scmp.lt.s32.totalorder %s11126_s22, %s11126_s22 }
  0x12   :  { %p11133_p8 = por %p11132_p7, %p11131_p6 }
  0x14   :  { %p11134_p9 = pnand %p11133_p8, %p11127_p5 }
  0x16   :  { %11137 = shalt.err (!%p11134_p9)
}
  0x17   :  { %s11166_s23 = smov 128   ;;  %s11167_s24 = smov 8  }
  0x18   :  { %35 = dma.hbm_to_vmem [thread:$0]  %s12722_s3, 2560, %s30_s21, [#allocation6], %s11166_s23, %s11166_s23, %s11167_s24  }
  0x19   :  { %s11168_s27 = smov [#allocation9]  }
  0x1a   :  { %s57_s28 = sshll.u32 %s11168_s27, 4  ;;  %s58_s28 = int_to_ptr.vmem [resolvable:$true] %s57_s28 }
  0x1b   :  { %s11146_s5 = scalar_lea.vmem %s58_s28, 2048  ;;  %p11151_p11 = scmp.lt.s32.totalorder %s58_s28, %s58_s28 }
  0x1c   :  { %p11147_p10 = scmp.ne.s32.totalorder %s58_s28, %s11146_s5  ;;  %p11152_p12 = scmp.lt.s32.totalorder %s11146_s5, %s11146_s5 }
  0x1e   :  { %p11153_p13 = por %p11152_p12, %p11151_p11 }
  0x20   :  { %p11154_p0 = pnand %p11153_p13, %p11147_p10 }
  0x22   :  { %11157 = shalt.err (!%p11154_p0)
}
  0x23   :  { %63 = dma.hbm_to_vmem [thread:$0]  %s12726_s7, 2048, %s58_s28, [#allocation8], %s11163_s16, %s11163_s16, %s11164_s17  }
  0x24   :  { %11158 = dma.done.wait [#allocation6], 2560  }
  0x25   :  { %11159 = vsyncadd [#allocation6], 4294964736 }
  0x26   :  { %11160 = dma.done.wait [#allocation8], 4096  }
  0x27   :  { %11161 = vsyncadd [#allocation8], 4294963200  ;;  %vm77_vm0 = vcmask 25600   ;;  %v12730_v0 = vmov 0.0   ;;  %vm11170_vm1 = vmmov 0   ;;  %vm148_vm2 = vcmask 1043456  }
  0x28   :  { %10195 = vmatprep.subr.mxu0 %v12730_v0  ;;  %10197 = vmatprep.mubr.msk.f32.mxu0 %vm11170_vm1, %v12730_v0  ;;  %79 = vst.msk [vmem:[#allocation2 + $0x2] sm:$0x3] %vm77_vm0, %v12730_v0  ;;  %78 = vst.msk [vmem:[#allocation2] sm:$0x3] %vm77_vm0, %v12730_v0  ;;  %vm144_vm3 = vcmask 31744   ;;  %vm6017_vm4 = vcmask 254976  }
  0x29   :  { %81 = vst.msk [vmem:[#allocation2 + $0x24] sm:$0x3] %vm77_vm0, %v12730_v0  ;;  %82 = vst.msk [vmem:[#allocation2 + $0x26] sm:$0x3] %vm77_vm0, %v12730_v0  ;;  %10200 = vmatprep.subr.mxu1 %v12730_v0  ;;  %10202 = vmatprep.mubr.msk.f32.mxu1 %vm11170_vm1, %v12730_v0  ;;  %v11254_v1 = vld [vmem:[%s12720_s1 + $0x4] sm:$0xf] }
  0x2a   :  { %v84_v2 = vld [vmem:[%s12719_s0 + $0x2] sm:$0x3]  ;;  %v86_v3 = vld [vmem:[%s12719_s0 + $0x6] sm:$0x3]  ;;  %10196 = vmatpush3.msk.msra.mxu0 %vm148_vm2, %v11254_v1  ;;  %10201 = vmatpush3.msk.msra.mxu1 %vm148_vm2, %v11254_v1  ;;  %v88_v5 = vld [vmem:[%s12719_s0 + $0xa] sm:$0x3] }
  0x2b   :  { %101 = vst.msk [vmem:[#allocation2 + $0x6] sm:$0x3] %vm77_vm0, %v84_v2  ;;  %103 = vst.msk [vmem:[#allocation2 + $0xa] sm:$0x3] %vm77_vm0, %v86_v3  ;;  %v90_v6 = vld [vmem:[%s12719_s0 + $0xe] sm:$0x3]  ;;  %10205 = vmatprep.subr.mxu0 %v12730_v0  ;;  %10210 = vmatprep.subr.mxu1 %v12730_v0 }
  0x2c   :  { %105 = vst.msk [vmem:[#allocation2 + $0xe] sm:$0x3] %vm77_vm0, %v88_v5  ;;  %107 = vst.msk [vmem:[#allocation2 + $0x12] sm:$0x3] %vm77_vm0, %v90_v6  ;;  %v92_v7 = vld [vmem:[%s12719_s0 + $0x12] sm:$0x3] }
  0x2d   :  { %v94_v8 = vld [vmem:[%s12719_s0 + $0x16] sm:$0x3]  ;;  %109 = vst.msk [vmem:[#allocation2 + $0x16] sm:$0x3] %vm77_vm0, %v92_v7  ;;  %v96_v9 = vld [vmem:[%s12719_s0 + $0x1a] sm:$0x3] }
  0x2e   :  { %111 = vst.msk [vmem:[#allocation2 + $0x1a] sm:$0x3] %vm77_vm0, %v94_v8  ;;  %v83_v10 = vld [vmem:[%s12719_s0] sm:$0x3]  ;;  %113 = vst.msk [vmem:[#allocation2 + $0x1e] sm:$0x3] %vm77_vm0, %v96_v9 }
  0x2f   :  { %v11264_v4 = vld [vmem:[#allocation2 + $0x2] sm:$0x3]  ;;  %100 = vst.msk [vmem:[#allocation2 + $0x4] sm:$0x3] %vm77_vm0, %v83_v10  ;;  %v85_v11 = vld [vmem:[%s12719_s0 + $0x4] sm:$0x3] }
  0x30   :  { %10198 = vmatmul.mubr.msk.f32.vlgmr.msra.gmra.mxu0 %vm144_vm3, %v11264_v4  ;;  %v87_v12 = vld [vmem:[%s12719_s0 + $0x8] sm:$0x3]  ;;  %v89_v13 = vld [vmem:[%s12719_s0 + $0xc] sm:$0x3]  ;;  %102 = vst.msk [vmem:[#allocation2 + $0x8] sm:$0x3] %vm77_vm0, %v85_v11 }
  0x31   :  { %10206 = vmatpush3.msk.msra.mxu0 %vm148_vm2, %v11254_v1  ;;  %10207 = vmatprep.mubr.msk.f32.mxu0 %vm11170_vm1, %v12730_v0  ;;  %104 = vst.msk [vmem:[#allocation2 + $0xc] sm:$0x3] %vm77_vm0, %v87_v12  ;;  %106 = vst.msk [vmem:[#allocation2 + $0x10] sm:$0x3] %vm77_vm0, %v89_v13  ;;  %v91_v14 = vld [vmem:[%s12719_s0 + $0x10] sm:$0x3] }
  0x32   :  { %10215 = vmatprep.subr.mxu0 %v12730_v0  ;;  %v93_v15 = vld [vmem:[%s12719_s0 + $0x14] sm:$0x3]  ;;  %v95_v16 = vld [vmem:[%s12719_s0 + $0x18] sm:$0x3]  ;;  %108 = vst.msk [vmem:[#allocation2 + $0x14] sm:$0x3] %vm77_vm0, %v91_v14 }
  0x33   :  { %110 = vst.msk [vmem:[#allocation2 + $0x18] sm:$0x3] %vm77_vm0, %v93_v15  ;;  %112 = vst.msk [vmem:[#allocation2 + $0x1c] sm:$0x3] %vm77_vm0, %v95_v16  ;;  %v97_v17 = vld [vmem:[%s12719_s0 + $0x1c] sm:$0x3] }
  0x34   :  { %114 = vst.msk [vmem:[#allocation2 + $0x20] sm:$0x3] %vm77_vm0, %v97_v17  ;;  %v98_v18 = vld [vmem:[%s12719_s0 + $0x1e] sm:$0x3]  ;;  %v11334_v19 = vld [vmem:[#allocation2 + $0x6] sm:$0x3] }
  0x35   :  { %v11336_v20 = vld [vmem:[#allocation2 + $0xa] sm:$0x3]  ;;  %115 = vst.msk [vmem:[#allocation2 + $0x22] sm:$0x3] %vm77_vm0, %v98_v18  ;;  %10203 = vmatmul.mubr.msk.f32.vlgmr.msra.gmra.mxu1 %vm144_vm3, %v11334_v19  ;;  %v11347_v21 = vld [vmem:[#allocation2 + $0xe] sm:$0x3] }
  0x36   :  { %10208 = vmatmul.mubr.msk.f32.vlgmr.msra.gmra.mxu0 %vm144_vm3, %v11336_v20  ;;  %10211 = vmatpush3.msk.msra.mxu1 %vm148_vm2, %v11254_v1  ;;  %v11349_v22 = vld [vmem:[#allocation2 + $0x12] sm:$0x3]  ;;  %v11365_v23 = vld [vmem:[#allocation2 + $0x16] sm:$0x3]  ;;  %v11367_v24 = vld [vmem:[#allocation2 + $0x1a] sm:$0x3] }
  0x37   :  { %10212 = vmatprep.mubr.msk.f32.mxu1 %vm11170_vm1, %v12730_v0  ;;  %10216 = vmatpush3.msk.msra.mxu0 %vm148_vm2, %v11254_v1  ;;  %v11378_v25 = vld [vmem:[%s12720_s1] sm:$0xf]  ;;  %v11388_v26 = vld [vmem:[#allocation2 + $0x1e] sm:$0x3]  ;;  %v118_v28 = vld [vmem:[#allocation2 + $0x4] sm:$0x3] }
  0x38   :  { %10217 = vmatprep.mubr.msk.f32.mxu0 %vm11170_vm1, %v12730_v0  ;;  %10220 = vmatprep.subr.mxu1 %v12730_v0  ;;  %v117_v27 = vld [vmem:[#allocation2] sm:$0x3]  ;;  %v119_v29 = vld [vmem:[#allocation2 + $0x8] sm:$0x3]  ;;  %v120_v30 = vld [vmem:[#allocation2 + $0xc] sm:$0x3] }
  0x39   :  { %10225 = vmatprep.subr.mxu0 %v12730_v0  ;;  %10213 = vmatmul.mubr.msk.f32.vlgmr.msra.gmra.mxu1 %vm144_vm3, %v11347_v21  ;;  %v121_v31 = vld [vmem:[#allocation2 + $0x10] sm:$0x3]  ;;  %v122_v32 = vld [vmem:[#allocation2 + $0x14] sm:$0x3]  ;;  %v11439_v35 = vld [vmem:[#allocation2 + $0x4] sm:$0x3] }
  0x3a   :  { %10218 = vmatmul.mubr.msk.f32.vlgmr.msra.gmra.mxu0 %vm144_vm3, %v11349_v22  ;;  %10221 = vmatpush3.msk.msra.mxu1 %vm148_vm2, %v11254_v1  ;;  %v123_v33 = vld [vmem:[#allocation2 + $0x18] sm:$0x3]  ;;  %v124_v34 = vld [vmem:[#allocation2 + $0x1c] sm:$0x3]  ;;  %v11454_v36 = vld [vmem:[#allocation2 + $0x8] sm:$0x3] }
  0x3b   :  { %10222 = vmatprep.mubr.msk.f32.mxu1 %vm11170_vm1, %v12730_v0  ;;  %10226 = vmatpush3.msk.msra.mxu0 %vm148_vm2, %v11254_v1  ;;  %v11456_v37 = vld [vmem:[#allocation2 + $0xc] sm:$0x3]  ;;  %v11472_v38 = vld [vmem:[#allocation2 + $0x10] sm:$0x3]  ;;  %v11474_v39 = vld [vmem:[#allocation2 + $0x14] sm:$0x3] }
  0x3c   :  { %10227 = vmatprep.mubr.msk.f32.mxu0 %vm11170_vm1, %v12730_v0  ;;  %10230 = vmatprep.subr.mxu1 %v12730_v0  ;;  %v11490_v40 = vld [vmem:[#allocation2 + $0x18] sm:$0x3]  ;;  %v11492_v41 = vld [vmem:[#allocation2 + $0x1c] sm:$0x3]  ;;  %v11508_v42 = vld [vmem:[#allocation2 + $0x20] sm:$0x3] }
  0x3d   :  { %10235 = vmatprep.subr.mxu0 %v12730_v0  ;;  %10223 = vmatmul.mubr.msk.f32.vlgmr.msra.gmra.mxu1 %vm144_vm3, %v11365_v23  ;;  %v11561_v43 = vld [vmem:[%s12720_s1 + $0x8] sm:$0xf]  ;;  %v2467_v44 = vld [vmem:[#allocation2 + $0x6] sm:$0x3]  ;;  %v2469_v46 = vld [vmem:[#allocation2 + $0xe] sm:$0x3] }
  0x3e   :  { %10228 = vmatmul.mubr.msk.f32.vlgmr.msra.gmra.mxu0 %vm144_vm3, %v11367_v24  ;;  %10231 = vmatpush3.msk.msra.mxu1 %vm148_vm2, %v11254_v1  ;;  %v2468_v45 = vld [vmem:[#allocation2 + $0xa] sm:$0x3]  ;;  %v2470_v47 = vld [vmem:[#allocation2 + $0x12] sm:$0x3]  ;;  %v2471_v48 = vld [vmem:[#allocation2 + $0x16] sm:$0x3] }
  0x3f   :  { %10232 = vmatprep.mubr.msk.f32.mxu1 %vm11170_vm1, %v12730_v0  ;;  %10236 = vmatpush3.msk.msra.mxu0 %vm148_vm2, %v11378_v25  ;;  %v2472_v49 = vld [vmem:[#allocation2 + $0x1a] sm:$0x3]  ;;  %v2473_v50 = vld [vmem:[#allocation2 + $0x1e] sm:$0x3]  ;;  %v11673_v51 = vld [vmem:[%s12720_s1 + $0xc] sm:$0xf] }
  0x40   :  { %10237 = vmatprep.mubr.msk.f32.mxu0 %vm11170_vm1, %v12730_v0  ;;  %10240 = vmatprep.subr.mxu1 %v12730_v0  ;;  %v2474_v52 = vld [vmem:[#allocation2 + $0x22] sm:$0x3]  ;;  %v3641_v53 = vld [vmem:[#allocation2 + $0x8] sm:$0x3]  ;;  %v3642_v54 = vld [vmem:[#allocation2 + $0xc] sm:$0x3] }
  0x41   :  { %10245 = vmatprep.subr.mxu0 %v12730_v0  ;;  %10233 = vmatmul.mubr.msk.f32.vlgmr.msra.gmra.mxu1 %vm144_vm3, %v11388_v26  ;;  %v3643_v55 = vld [vmem:[#allocation2 + $0x10] sm:$0x3]  ;;  %v3644_v56 = vld [vmem:[#allocation2 + $0x14] sm:$0x3]  ;;  %v3645_v57 = vld [vmem:[#allocation2 + $0x18] sm:$0x3] }
  0x42   :  { %10238 = vmatmul.mubr.msk.f32.vlgmr.msra.gmra.mxu0 %vm144_vm3, %v117_v27  ;;  %10241 = vmatpush3.msk.msra.mxu1 %vm148_vm2, %v11378_v25  ;;  %v3646_v58 = vld [vmem:[#allocation2 + $0x1c] sm:$0x3]  ;;  %v3647_v59 = vld [vmem:[#allocation2 + $0x20] sm:$0x3]  ;;  %v11774_v60 = vld [vmem:[%s12720_s1 + $0x10] sm:$0xf] }
  0x43   :  { %10242 = vmatprep.mubr.msk.f32.mxu1 %vm11170_vm1, %v12730_v0  ;;  %10246 = vmatpush3.msk.msra.mxu0 %vm148_vm2, %v11378_v25  ;;  %v3648_v61 = vld [vmem:[#allocation2 + $0x24] sm:$0x3]  ;;  %v4815_v62 = vld [vmem:[#allocation2 + $0xa] sm:$0x3]  ;;  %v4816_v63 = vld [vmem:[#allocation2 + $0xe] sm:$0x3] }
  0x44   :  { %10247 = vmatprep.mubr.msk.f32.mxu0 %vm11170_vm1, %v12730_v0  ;;  %10250 = vmatprep.subr.mxu1 %v12730_v0  ;;  %v4818_v2 = vld [vmem:[#allocation2 + $0x16] sm:$0x3]  ;;  %v4819_v3 = vld [vmem:[#allocation2 + $0x1a] sm:$0x3]  ;;  %v4821_v5 = vld [vmem:[#allocation2 + $0x22] sm:$0x3] }
  0x45   :  { %10255 = vmatprep.subr.mxu0 %v12730_v0  ;;  %10243 = vmatmul.mubr.msk.f32.vlgmr.msra.gmra.mxu1 %vm144_vm3, %v118_v28  ;;  %v4822_v6 = vld [vmem:[#allocation2 + $0x26] sm:$0x3]  ;;  %6018 = vst.msk [vmem:[#allocation3] sm:$0x3] %vm6017_vm4, %v12730_v0  ;;  %6019 = vst.msk [vmem:[#allocation3 + $0x2] sm:$0x3] %vm6017_vm4, %v12730_v0 }
  0x46   :  { %10248 = vmatmul.mubr.msk.f32.vlgmr.msra.gmra.mxu0 %vm144_vm3, %v119_v29  ;;  %10251 = vmatpush3.msk.msra.mxu1 %vm148_vm2, %v11378_v25  ;;  %6021 = vst.msk [vmem:[#allocation3 + $0x14] sm:$0x3] %vm6017_vm4, %v12730_v0  ;;  %6022 = vst.msk [vmem:[#allocation3 + $0x16] sm:$0x3] %vm6017_vm4, %v12730_v0  ;;  %vm6054_vm5 = vcmask 261120   ;;  %vm9029_vm6 = vcmask 1041408  }
  0x47   :  { %10252 = vmatprep.mubr.msk.f32.mxu1 %vm11170_vm1, %v12730_v0  ;;  %10256 = vmatpush3.msk.msra.mxu0 %vm148_vm2, %v11378_v25  ;;  %vm9032_vm7 = vcmask 1045504   ;;  %vm9062_vm8 = vcmask 523264   ;;  %vm9594_vm9 = vcmask 523270   ;;  %vm9607_vm10 = vcmask 7174  }
  0x48   :  { %10257 = vmatprep.mubr.msk.f32.mxu0 %vm11170_vm1, %v12730_v0  ;;  %10260 = vmatprep.subr.mxu1 %v12730_v0 }
  0x49   :  { %10265 = vmatprep.subr.mxu0 %v12730_v0  ;;  %10253 = vmatmul.mubr.msk.f32.vlgmr.msra.gmra.mxu1 %vm144_vm3, %v120_v30 }
  0x4a   :  { %10258 = vmatmul.mubr.msk.f32.vlgmr.msra.gmra.mxu0 %vm144_vm3, %v121_v31  ;;  %10261 = vmatpush3.msk.msra.mxu1 %vm148_vm2, %v11378_v25  ;;  %v11903_v31 = vld [vmem:[#allocation5 + $0x30] sm:$0xff] }
  0x4b   :  { %10262 = vmatprep.mubr.msk.f32.mxu1 %vm11170_vm1, %v12730_v0  ;;  %10266 = vmatpush3.msk.msra.mxu0 %vm148_vm2, %v11378_v25 }
  0x4c   :  { %10267 = vmatprep.mubr.msk.f32.mxu0 %vm11170_vm1, %v12730_v0  ;;  %10270 = vmatprep.subr.mxu1 %v12730_v0 }
  0x4d   :  { %10275 = vmatprep.subr.mxu0 %v12730_v0  ;;  %10263 = vmatmul.mubr.msk.f32.vlgmr.msra.gmra.mxu1 %vm144_vm3, %v122_v32 }
  0x4e   :  { %10268 = vmatmul.mubr.msk.f32.vlgmr.msra.gmra.mxu0 %vm144_vm3, %v123_v33  ;;  %10271 = vmatpush3.msk.msra.mxu1 %vm148_vm2, %v11378_v25 }
  0x4f   :  { %10272 = vmatprep.mubr.msk.f32.mxu1 %vm11170_vm1, %v12730_v0  ;;  %10276 = vmatpush3.msk.msra.mxu0 %vm148_vm2, %v11254_v1 }
  0x50   :  { %10277 = vmatprep.mubr.msk.f32.mxu0 %vm11170_vm1, %v12730_v0  ;;  %10280 = vmatprep.subr.mxu1 %v12730_v0 }
  0x51   :  { %10285 = vmatprep.subr.mxu0 %v12730_v0  ;;  %10273 = vmatmul.mubr.msk.f32.vlgmr.msra.gmra.mxu1 %vm144_vm3, %v124_v34  ;;  %v11909_v34 = vld [vmem:[#allocation5 + $0x28] sm:$0xff] }
  0x52   :  { %10278 = vmatmul.mubr.msk.f32.vlgmr.msra.gmra.mxu0 %vm144_vm3, %v11439_v35  ;;  %10281 = vmatpush3.msk.msra.mxu1 %vm148_vm2, %v11254_v1 }
  0x53   :  { %10282 = vmatprep.mubr.msk.f32.mxu1 %vm11170_vm1, %v12730_v0  ;;  %10286 = vmatpush3.msk.msra.mxu0 %vm148_vm2, %v11254_v1 }
  0x54   :  { %10287 = vmatprep.mubr.msk.f32.mxu0 %vm11170_vm1, %v12730_v0  ;;  %10290 = vmatprep.subr.mxu1 %v12730_v0 }
  0x55   :  { %10295 = vmatprep.subr.mxu0 %v12730_v0  ;;  %10283 = vmatmul.mubr.msk.f32.vlgmr.msra.gmra.mxu1 %vm144_vm3, %v11454_v36 }
  0x56   :  { %10288 = vmatmul.mubr.msk.f32.vlgmr.msra.gmra.mxu0 %vm144_vm3, %v11456_v37  ;;  %10291 = vmatpush3.msk.msra.mxu1 %vm148_vm2, %v11254_v1 }
  0x57   :  { %10292 = vmatprep.mubr.msk.f32.mxu1 %vm11170_vm1, %v12730_v0  ;;  %10296 = vmatpush3.msk.msra.mxu0 %vm148_vm2, %v11254_v1 }
  0x58   :  { %10297 = vmatprep.mubr.msk.f32.mxu0 %vm11170_vm1, %v12730_v0  ;;  %10300 = vmatprep.subr.mxu1 %v12730_v0 }
  0x59   :  { %10305 = vmatprep.subr.mxu0 %v12730_v0  ;;  %10293 = vmatmul.mubr.msk.f32.vlgmr.msra.gmra.mxu1 %vm144_vm3, %v11472_v38 }
  0x5a   :  { %10298 = vmatmul.mubr.msk.f32.vlgmr.msra.gmra.mxu0 %vm144_vm3, %v11474_v39  ;;  %10301 = vmatpush3.msk.msra.mxu1 %vm148_vm2, %v11254_v1 }
  0x5b   :  { %10302 = vmatprep.mubr.msk.f32.mxu1 %vm11170_vm1, %v12730_v0  ;;  %10306 = vmatpush3.msk.msra.mxu0 %vm148_vm2, %v11254_v1 }
  0x5c   :  { %10307 = vmatprep.mubr.msk.f32.mxu0 %vm11170_vm1, %v12730_v0  ;;  %10310 = vmatprep.subr.mxu1 %v12730_v0 }
  0x5d   :  { %10315 = vmatprep.subr.mxu0 %v12730_v0  ;;  %10303 = vmatmul.mubr.msk.f32.vlgmr.msra.gmra.mxu1 %vm144_vm3, %v11490_v40 }
  0x5e   :  { %10308 = vmatmul.mubr.msk.f32.vlgmr.msra.gmra.mxu0 %vm144_vm3, %v11492_v41  ;;  %10311 = vmatpush3.msk.msra.mxu1 %vm148_vm2, %v11254_v1  ;;  %v4817_v1 = vld [vmem:[#allocation2 + $0x12] sm:$0x3] }
  0x5f   :  { %10312 = vmatprep.mubr.msk.f32.mxu1 %vm11170_vm1, %v12730_v0  ;;  %10316 = vmatpush3.msk.msra.mxu0 %vm148_vm2, %v11378_v25 }
  0x60   :  { %10317 = vmatprep.mubr.msk.f32.mxu0 %vm11170_vm1, %v12730_v0  ;;  %10320 = vmatprep.subr.mxu1 %v12730_v0 }
  0x61   :  { %10325 = vmatprep.subr.mxu0 %v12730_v0  ;;  %10313 = vmatmul.mubr.msk.f32.vlgmr.msra.gmra.mxu1 %vm144_vm3, %v11508_v42 }
  0x62   :  { %10318 = vmatmul.mubr.msk.f32.vlgmr.msra.gmra.mxu0 %vm144_vm3, %v11264_v4  ;;  %10321 = vmatpush3.msk.msra.mxu1 %vm148_vm2, %v11378_v25  ;;  %v4820_v4 = vld [vmem:[#allocation2 + $0x1e] sm:$0x3] }
  0x63   :  { %10322 = vmatprep.mubr.msk.f32.mxu1 %vm11170_vm1, %v12730_v0  ;;  %10326 = vmatpush3.msk.msra.mxu0 %vm148_vm2, %v11378_v25 }
  0x64   :  { %10327 = vmatprep.mubr.msk.f32.mxu0 %vm11170_vm1, %v12730_v0  ;;  %10330 = vmatprep.subr.mxu1 %v12730_v0 }
  0x65   :  { %10335 = vmatprep.subr.mxu0 %v12730_v0  ;;  %10323 = vmatmul.mubr.msk.f32.vlgmr.msra.gmra.mxu1 %vm144_vm3, %v11334_v19 }
  0x66   :  { %10328 = vmatmul.mubr.msk.f32.vlgmr.msra.gmra.mxu0 %vm144_vm3, %v11336_v20  ;;  %10331 = vmatpush3.msk.msra.mxu1 %vm148_vm2, %v11378_v25 }
  0x67   :  { %10332 = vmatprep.mubr.msk.f32.mxu1 %vm11170_vm1, %v12730_v0  ;;  %10336 = vmatpush3.msk.msra.mxu0 %vm148_vm2, %v11378_v25 }
  0x68   :  { %10337 = vmatprep.mubr.msk.f32.mxu0 %vm11170_vm1, %v12730_v0  ;;  %10340 = vmatprep.subr.mxu1 %v12730_v0 }
  0x69   :  { %10345 = vmatprep.subr.mxu0 %v12730_v0  ;;  %10333 = vmatmul.mubr.msk.f32.vlgmr.msra.gmra.mxu1 %vm144_vm3, %v11347_v21 }
  0x6a   :  { %10338 = vmatmul.mubr.msk.f32.vlgmr.msra.gmra.mxu0 %vm144_vm3, %v11349_v22  ;;  %10341 = vmatpush3.msk.msra.mxu1 %vm148_vm2, %v11378_v25 }
  0x6b   :  { %10342 = vmatprep.mubr.msk.f32.mxu1 %vm11170_vm1, %v12730_v0  ;;  %10346 = vmatpush3.msk.msra.mxu0 %vm148_vm2, %v11378_v25 }
  0x6c   :  { %10347 = vmatprep.mubr.msk.f32.mxu0 %vm11170_vm1, %v12730_v0  ;;  %10350 = vmatprep.subr.mxu1 %v12730_v0 }
  0x6d   :  { %10355 = vmatprep.subr.mxu0 %v12730_v0  ;;  %10343 = vmatmul.mubr.msk.f32.vlgmr.msra.gmra.mxu1 %vm144_vm3, %v11365_v23 }
  0x6e   :  { %10348 = vmatmul.mubr.msk.f32.vlgmr.msra.gmra.mxu0 %vm144_vm3, %v11367_v24  ;;  %10351 = vmatpush3.msk.msra.mxu1 %vm148_vm2, %v11378_v25 }
  0x6f   :  { %10352 = vmatprep.mubr.msk.f32.mxu1 %vm11170_vm1, %v12730_v0  ;;  %10356 = vmatpush3.msk.msra.mxu0 %vm148_vm2, %v11561_v43 }
  0x70   :  { %10357 = vmatprep.mubr.msk.f32.mxu0 %vm11170_vm1, %v12730_v0  ;;  %10360 = vmatprep.subr.mxu1 %v12730_v0 }
  0x71   :  { %10365 = vmatprep.subr.mxu0 %v12730_v0  ;;  %10353 = vmatmul.mubr.msk.f32.vlgmr.msra.gmra.mxu1 %vm144_vm3, %v11388_v26  ;;  %v11894_v26 = vld [vmem:[#allocation5 + $0x38] sm:$0xff] }
  0x72   :  { %10358 = vmatmul.mubr.msk.f32.vlgmr.msra.gmra.mxu0 %vm144_vm3, %v11439_v35  ;;  %10361 = vmatpush3.msk.msra.mxu1 %vm148_vm2, %v11561_v43 }
  0x73   :  { %10362 = vmatprep.mubr.msk.f32.mxu1 %vm11170_vm1, %v12730_v0  ;;  %10366 = vmatpush3.msk.msra.mxu0 %vm148_vm2, %v11561_v43 }
  0x74   :  { %10367 = vmatprep.mubr.msk.f32.mxu0 %vm11170_vm1, %v12730_v0  ;;  %10370 = vmatprep.subr.mxu1 %v12730_v0 }
  0x75   :  { %10375 = vmatprep.subr.mxu0 %v12730_v0  ;;  %10363 = vmatmul.mubr.msk.f32.vlgmr.msra.gmra.mxu1 %vm144_vm3, %v11454_v36 }
  0x76   :  { %10368 = vmatmul.mubr.msk.f32.vlgmr.msra.gmra.mxu0 %vm144_vm3, %v11456_v37  ;;  %10371 = vmatpush3.msk.msra.mxu1 %vm148_vm2, %v11561_v43 }
  0x77   :  { %10372 = vmatprep.mubr.msk.f32.mxu1 %vm11170_vm1, %v12730_v0  ;;  %10376 = vmatpush3.msk.msra.mxu0 %vm148_vm2, %v11561_v43 }
  0x78   :  { %10377 = vmatprep.mubr.msk.f32.mxu0 %vm11170_vm1, %v12730_v0  ;;  %10380 = vmatprep.subr.mxu1 %v12730_v0 }
  0x79   :  { %10385 = vmatprep.subr.mxu0 %v12730_v0  ;;  %10373 = vmatmul.mubr.msk.f32.vlgmr.msra.gmra.mxu1 %vm144_vm3, %v11472_v38 }
  0x7a   :  { %10378 = vmatmul.mubr.msk.f32.vlgmr.msra.gmra.mxu0 %vm144_vm3, %v11474_v39  ;;  %10381 = vmatpush3.msk.msra.mxu1 %vm148_vm2, %v11561_v43  ;;  %v11919_v39 = vld [vmem:[#allocation5 + $0x20] sm:$0xff] }
  0x7b   :  { %10382 = vmatprep.mubr.msk.f32.mxu1 %vm11170_vm1, %v12730_v0  ;;  %10386 = vmatpush3.msk.msra.mxu0 %vm148_vm2, %v11561_v43 }
  0x7c   :  { %10387 = vmatprep.mubr.msk.f32.mxu0 %vm11170_vm1, %v12730_v0  ;;  %10390 = vmatprep.subr.mxu1 %v12730_v0 }
  0x7d   :  { %10395 = vmatprep.subr.mxu0 %v12730_v0  ;;  %10383 = vmatmul.mubr.msk.f32.vlgmr.msra.gmra.mxu1 %vm144_vm3, %v11490_v40 }
  0x7e   :  { %10388 = vmatmul.mubr.msk.f32.vlgmr.msra.gmra.mxu0 %vm144_vm3, %v11492_v41  ;;  %10391 = vmatpush3.msk.msra.mxu1 %vm148_vm2, %v11561_v43 }
  0x7f   :  { %10392 = vmatprep.mubr.msk.f32.mxu1 %vm11170_vm1, %v12730_v0  ;;  %10396 = vmatpush3.msk.msra.mxu0 %vm148_vm2, %v11561_v43 }
  0x80   :  { %10397 = vmatprep.mubr.msk.f32.mxu0 %vm11170_vm1, %v12730_v0  ;;  %10400 = vmatprep.subr.mxu1 %v12730_v0 }
  0x81   :  { %10405 = vmatprep.subr.mxu0 %v12730_v0  ;;  %10393 = vmatmul.mubr.msk.f32.vlgmr.msra.gmra.mxu1 %vm144_vm3, %v11508_v42  ;;  %v11923_v42 = vld [vmem:[#allocation3 + $0x2] sm:$0x3] }
  0x82   :  { %10398 = vmatmul.mubr.msk.f32.vlgmr.msra.gmra.mxu0 %vm144_vm3, %v2467_v44  ;;  %10401 = vmatpush3.msk.msra.mxu1 %vm148_vm2, %v11561_v43 }
  0x83   :  { %10402 = vmatprep.mubr.msk.f32.mxu1 %vm11170_vm1, %v12730_v0  ;;  %10406 = vmatpush3.msk.msra.mxu0 %vm148_vm2, %v11561_v43 }
  0x84   :  { %10407 = vmatprep.mubr.msk.f32.mxu0 %vm11170_vm1, %v12730_v0  ;;  %10410 = vmatprep.subr.mxu1 %v12730_v0 }
  0x85   :  { %10415 = vmatprep.subr.mxu0 %v12730_v0  ;;  %10403 = vmatmul.mubr.msk.f32.vlgmr.msra.gmra.mxu1 %vm144_vm3, %v2468_v45 }
  0x86   :  { %10408 = vmatmul.mubr.msk.f32.vlgmr.msra.gmra.mxu0 %vm144_vm3, %v2469_v46  ;;  %10411 = vmatpush3.msk.msra.mxu1 %vm148_vm2, %v11561_v43 }
  0x87   :  { %10412 = vmatprep.mubr.msk.f32.mxu1 %vm11170_vm1, %v12730_v0  ;;  %10416 = vmatpush3.msk.msra.mxu0 %vm148_vm2, %v11561_v43 }
  0x88   :  { %10417 = vmatprep.mubr.msk.f32.mxu0 %vm11170_vm1, %v12730_v0  ;;  %10420 = vmatprep.subr.mxu1 %v12730_v0 }
  0x89   :  { %10425 = vmatprep.subr.mxu0 %v12730_v0  ;;  %10413 = vmatmul.mubr.msk.f32.vlgmr.msra.gmra.mxu1 %vm144_vm3, %v2470_v47 }
  0x8a   :  { %10418 = vmatmul.mubr.msk.f32.vlgmr.msra.gmra.mxu0 %vm144_vm3, %v2471_v48  ;;  %10421 = vmatpush3.msk.msra.mxu1 %vm148_vm2, %v11561_v43 }
  0x8b   :  { %10422 = vmatprep.mubr.msk.f32.mxu1 %vm11170_vm1, %v12730_v0  ;;  %10426 = vmatpush3.msk.msra.mxu0 %vm148_vm2, %v11561_v43 }
  0x8c   :  { %10427 = vmatprep.mubr.msk.f32.mxu0 %vm11170_vm1, %v12730_v0  ;;  %10430 = vmatprep.subr.mxu1 %v12730_v0 }
  0x8d   :  { %10435 = vmatprep.subr.mxu0 %v12730_v0  ;;  %10423 = vmatmul.mubr.msk.f32.vlgmr.msra.gmra.mxu1 %vm144_vm3, %v2472_v49 }
  0x8e   :  { %10428 = vmatmul.mubr.msk.f32.vlgmr.msra.gmra.mxu0 %vm144_vm3, %v2473_v50  ;;  %10431 = vmatpush3.msk.msra.mxu1 %vm148_vm2, %v11561_v43 }
  0x8f   :  { %10432 = vmatprep.mubr.msk.f32.mxu1 %vm11170_vm1, %v12730_v0  ;;  %10436 = vmatpush3.msk.msra.mxu0 %vm148_vm2, %v11673_v51 }
  0x90   :  { %10437 = vmatprep.mubr.msk.f32.mxu0 %vm11170_vm1, %v12730_v0  ;;  %10440 = vmatprep.subr.mxu1 %v12730_v0 }
  0x91   :  { %10445 = vmatprep.subr.mxu0 %v12730_v0  ;;  %10433 = vmatmul.mubr.msk.f32.vlgmr.msra.gmra.mxu1 %vm144_vm3, %v2474_v52 }
  0x92   :  { %10438 = vmatmul.mubr.msk.f32.vlgmr.msra.gmra.mxu0 %vm144_vm3, %v2467_v44  ;;  %10441 = vmatpush3.msk.msra.mxu1 %vm148_vm2, %v11673_v51 }
  0x93   :  { %10442 = vmatprep.mubr.msk.f32.mxu1 %vm11170_vm1, %v12730_v0  ;;  %10446 = vmatpush3.msk.msra.mxu0 %vm148_vm2, %v11673_v51 }
  0x94   :  { %10447 = vmatprep.mubr.msk.f32.mxu0 %vm11170_vm1, %v12730_v0  ;;  %10450 = vmatprep.subr.mxu1 %v12730_v0 }
  0x95   :  { %10455 = vmatprep.subr.mxu0 %v12730_v0  ;;  %10443 = vmatmul.mubr.msk.f32.vlgmr.msra.gmra.mxu1 %vm144_vm3, %v2468_v45 }
  0x96   :  { %10448 = vmatmul.mubr.msk.f32.vlgmr.msra.gmra.mxu0 %vm144_vm3, %v2469_v46  ;;  %10451 = vmatpush3.msk.msra.mxu1 %vm148_vm2, %v11673_v51 }
  0x97   :  { %10452 = vmatprep.mubr.msk.f32.mxu1 %vm11170_vm1, %v12730_v0  ;;  %10456 = vmatpush3.msk.msra.mxu0 %vm148_vm2, %v11673_v51 }
  0x98   :  { %10457 = vmatprep.mubr.msk.f32.mxu0 %vm11170_vm1, %v12730_v0  ;;  %10460 = vmatprep.subr.mxu1 %v12730_v0 }
  0x99   :  { %10465 = vmatprep.subr.mxu0 %v12730_v0  ;;  %10453 = vmatmul.mubr.msk.f32.vlgmr.msra.gmra.mxu1 %vm144_vm3, %v2470_v47 }
  0x9a   :  { %10458 = vmatmul.mubr.msk.f32.vlgmr.msra.gmra.mxu0 %vm144_vm3, %v2471_v48  ;;  %10461 = vmatpush3.msk.msra.mxu1 %vm148_vm2, %v11673_v51 }
  0x9b   :  { %10462 = vmatprep.mubr.msk.f32.mxu1 %vm11170_vm1, %v12730_v0  ;;  %10466 = vmatpush3.msk.msra.mxu0 %vm148_vm2, %v11673_v51 }
  0x9c   :  { %10467 = vmatprep.mubr.msk.f32.mxu0 %vm11170_vm1, %v12730_v0  ;;  %10470 = vmatprep.subr.mxu1 %v12730_v0 }
  0x9d   :  { %10475 = vmatprep.subr.mxu0 %v12730_v0  ;;  %10463 = vmatmul.mubr.msk.f32.vlgmr.msra.gmra.mxu1 %vm144_vm3, %v2472_v49 }
  0x9e   :  { %10468 = vmatmul.mubr.msk.f32.vlgmr.msra.gmra.mxu0 %vm144_vm3, %v2473_v50  ;;  %10471 = vmatpush3.msk.msra.mxu1 %vm148_vm2, %v11673_v51 }
  0x9f   :  { %10472 = vmatprep.mubr.msk.f32.mxu1 %vm11170_vm1, %v12730_v0  ;;  %10476 = vmatpush3.msk.msra.mxu0 %vm148_vm2, %v11673_v51 }
  0xa0   :  { %10477 = vmatprep.mubr.msk.f32.mxu0 %vm11170_vm1, %v12730_v0  ;;  %10480 = vmatprep.subr.mxu1 %v12730_v0 }
  0xa1   :  { %10485 = vmatprep.subr.mxu0 %v12730_v0  ;;  %10473 = vmatmul.mubr.msk.f32.vlgmr.msra.gmra.mxu1 %vm144_vm3, %v2474_v52 }
  0xa2   :  { %10478 = vmatmul.mubr.msk.f32.vlgmr.msra.gmra.mxu0 %vm144_vm3, %v3641_v53  ;;  %10481 = vmatpush3.msk.msra.mxu1 %vm148_vm2, %v11673_v51 }
  0xa3   :  { %10482 = vmatprep.mubr.msk.f32.mxu1 %vm11170_vm1, %v12730_v0  ;;  %10486 = vmatpush3.msk.msra.mxu0 %vm148_vm2, %v11673_v51 }
  0xa4   :  { %10487 = vmatprep.mubr.msk.f32.mxu0 %vm11170_vm1, %v12730_v0  ;;  %10490 = vmatprep.subr.mxu1 %v12730_v0 }
  0xa5   :  { %10495 = vmatprep.subr.mxu0 %v12730_v0  ;;  %10483 = vmatmul.mubr.msk.f32.vlgmr.msra.gmra.mxu1 %vm144_vm3, %v3642_v54 }
  0xa6   :  { %10488 = vmatmul.mubr.msk.f32.vlgmr.msra.gmra.mxu0 %vm144_vm3, %v3643_v55  ;;  %10491 = vmatpush3.msk.msra.mxu1 %vm148_vm2, %v11673_v51 }
  0xa7   :  { %10492 = vmatprep.mubr.msk.f32.mxu1 %vm11170_vm1, %v12730_v0  ;;  %10496 = vmatpush3.msk.msra.mxu0 %vm148_vm2, %v11673_v51 }
  0xa8   :  { %10497 = vmatprep.mubr.msk.f32.mxu0 %vm11170_vm1, %v12730_v0  ;;  %10500 = vmatprep.subr.mxu1 %v12730_v0 }
  0xa9   :  { %10505 = vmatprep.subr.mxu0 %v12730_v0  ;;  %10493 = vmatmul.mubr.msk.f32.vlgmr.msra.gmra.mxu1 %vm144_vm3, %v3644_v56 }
  0xaa   :  { %10498 = vmatmul.mubr.msk.f32.vlgmr.msra.gmra.mxu0 %vm144_vm3, %v3645_v57  ;;  %10501 = vmatpush3.msk.msra.mxu1 %vm148_vm2, %v11673_v51 }
  0xab   :  { %10502 = vmatprep.mubr.msk.f32.mxu1 %vm11170_vm1, %v12730_v0  ;;  %10506 = vmatpush3.msk.msra.mxu0 %vm148_vm2, %v11673_v51 }
  0xac   :  { %10507 = vmatprep.mubr.msk.f32.mxu0 %vm11170_vm1, %v12730_v0  ;;  %10510 = vmatprep.subr.mxu1 %v12730_v0 }
  0xad   :  { %10515 = vmatprep.subr.mxu0 %v12730_v0  ;;  %10503 = vmatmul.mubr.msk.f32.vlgmr.msra.gmra.mxu1 %vm144_vm3, %v3646_v58 }
  0xae   :  { %10508 = vmatmul.mubr.msk.f32.vlgmr.msra.gmra.mxu0 %vm144_vm3, %v3647_v59  ;;  %10511 = vmatpush3.msk.msra.mxu1 %vm148_vm2, %v11673_v51 }
  0xaf   :  { %10512 = vmatprep.mubr.msk.f32.mxu1 %vm11170_vm1, %v12730_v0  ;;  %10516 = vmatpush3.msk.msra.mxu0 %vm148_vm2, %v11774_v60 }
  0xb0   :  { %10517 = vmatprep.mubr.msk.f32.mxu0 %vm11170_vm1, %v12730_v0  ;;  %10520 = vmatprep.subr.mxu1 %v12730_v0 }
  0xb1   :  { %10525 = vmatprep.subr.mxu0 %v12730_v0  ;;  %10513 = vmatmul.mubr.msk.f32.vlgmr.msra.gmra.mxu1 %vm144_vm3, %v3648_v61 }
  0xb2   :  { %10518 = vmatmul.mubr.msk.f32.vlgmr.msra.gmra.mxu0 %vm144_vm3, %v3641_v53  ;;  %10521 = vmatpush3.msk.msra.mxu1 %vm148_vm2, %v11774_v60 }
  0xb3   :  { %10522 = vmatprep.mubr.msk.f32.mxu1 %vm11170_vm1, %v12730_v0  ;;  %10526 = vmatpush3.msk.msra.mxu0 %vm148_vm2, %v11774_v60 }
  0xb4   :  { %10527 = vmatprep.mubr.msk.f32.mxu0 %vm11170_vm1, %v12730_v0  ;;  %10530 = vmatprep.subr.mxu1 %v12730_v0 }
  0xb5   :  { %10535 = vmatprep.subr.mxu0 %v12730_v0  ;;  %10523 = vmatmul.mubr.msk.f32.vlgmr.msra.gmra.mxu1 %vm144_vm3, %v3642_v54 }
  0xb6   :  { %10528 = vmatmul.mubr.msk.f32.vlgmr.msra.gmra.mxu0 %vm144_vm3, %v3643_v55  ;;  %10531 = vmatpush3.msk.msra.mxu1 %vm148_vm2, %v11774_v60 }
  0xb7   :  { %10532 = vmatprep.mubr.msk.f32.mxu1 %vm11170_vm1, %v12730_v0  ;;  %10536 = vmatpush3.msk.msra.mxu0 %vm148_vm2, %v11774_v60 }
  0xb8   :  { %10537 = vmatprep.mubr.msk.f32.mxu0 %vm11170_vm1, %v12730_v0  ;;  %10540 = vmatprep.subr.mxu1 %v12730_v0 }
  0xb9   :  { %10545 = vmatprep.subr.mxu0 %v12730_v0  ;;  %10533 = vmatmul.mubr.msk.f32.vlgmr.msra.gmra.mxu1 %vm144_vm3, %v3644_v56 }
  0xba   :  { %10538 = vmatmul.mubr.msk.f32.vlgmr.msra.gmra.mxu0 %vm144_vm3, %v3645_v57  ;;  %10541 = vmatpush3.msk.msra.mxu1 %vm148_vm2, %v11774_v60 }
  0xbb   :  { %10542 = vmatprep.mubr.msk.f32.mxu1 %vm11170_vm1, %v12730_v0  ;;  %10546 = vmatpush3.msk.msra.mxu0 %vm148_vm2, %v11774_v60 }
  0xbc   :  { %10547 = vmatprep.mubr.msk.f32.mxu0 %vm11170_vm1, %v12730_v0  ;;  %10550 = vmatprep.subr.mxu1 %v12730_v0 }
  0xbd   :  { %10555 = vmatprep.subr.mxu0 %v12730_v0  ;;  %10543 = vmatmul.mubr.msk.f32.vlgmr.msra.gmra.mxu1 %vm144_vm3, %v3646_v58 }
  0xbe   :  { %10548 = vmatmul.mubr.msk.f32.vlgmr.msra.gmra.mxu0 %vm144_vm3, %v3647_v59  ;;  %10551 = vmatpush3.msk.msra.mxu1 %vm148_vm2, %v11774_v60 }
  0xbf   :  { %10552 = vmatprep.mubr.msk.f32.mxu1 %vm11170_vm1, %v12730_v0  ;;  %10556 = vmatpush3.msk.msra.mxu0 %vm148_vm2, %v11774_v60 }
  0xc0   :  { %10557 = vmatprep.mubr.msk.f32.mxu0 %vm11170_vm1, %v12730_v0  ;;  %10560 = vmatprep.subr.mxu1 %v12730_v0 }
  0xc1   :  { %10565 = vmatprep.subr.mxu0 %v12730_v0  ;;  %10553 = vmatmul.mubr.msk.f32.vlgmr.msra.gmra.mxu1 %vm144_vm3, %v3648_v61 }
  0xc2   :  { %10558 = vmatmul.mubr.msk.f32.vlgmr.msra.gmra.mxu0 %vm144_vm3, %v4815_v62  ;;  %10561 = vmatpush3.msk.msra.mxu1 %vm148_vm2, %v11774_v60 }
  0xc3   :  { %10562 = vmatprep.mubr.msk.f32.mxu1 %vm11170_vm1, %v12730_v0  ;;  %10566 = vmatpush3.msk.msra.mxu0 %vm148_vm2, %v11774_v60 }
  0xc4   :  { %10567 = vmatprep.mubr.msk.f32.mxu0 %vm11170_vm1, %v12730_v0  ;;  %10570 = vmatprep.subr.mxu1 %v12730_v0 }
  0xc5   :  { %10575 = vmatprep.subr.mxu0 %v12730_v0  ;;  %10563 = vmatmul.mubr.msk.f32.vlgmr.msra.gmra.mxu1 %vm144_vm3, %v4816_v63 }
  0xc6   :  { %10568 = vmatmul.mubr.msk.f32.vlgmr.msra.gmra.mxu0 %vm144_vm3, %v4817_v1  ;;  %10571 = vmatpush3.msk.msra.mxu1 %vm148_vm2, %v11774_v60 }
  0xc7   :  { %10572 = vmatprep.mubr.msk.f32.mxu1 %vm11170_vm1, %v12730_v0  ;;  %10576 = vmatpush3.msk.msra.mxu0 %vm148_vm2, %v11774_v60 }
  0xc8   :  { %10577 = vmatprep.mubr.msk.f32.mxu0 %vm11170_vm1, %v12730_v0  ;;  %10580 = vmatprep.subr.mxu1 %v12730_v0 }
  0xc9   :  { %10585 = vmatprep.subr.mxu0 %v12730_v0  ;;  %10573 = vmatmul.mubr.msk.f32.vlgmr.msra.gmra.mxu1 %vm144_vm3, %v4818_v2 }
  0xca   :  { %10578 = vmatmul.mubr.msk.f32.vlgmr.msra.gmra.mxu0 %vm144_vm3, %v4819_v3  ;;  %10581 = vmatpush3.msk.msra.mxu1 %vm148_vm2, %v11774_v60 }
  0xcb   :  { %10582 = vmatprep.mubr.msk.f32.mxu1 %vm11170_vm1, %v12730_v0  ;;  %10586 = vmatpush3.msk.msra.mxu0 %vm148_vm2, %v11774_v60 }
  0xcc   :  { %10587 = vmatprep.mubr.msk.f32.mxu0 %vm11170_vm1, %v12730_v0  ;;  %10590 = vmatprep.subr.mxu1 %v12730_v0 }
  0xcd   :  { %10617 = vmatprep.subr.mxu0 %v12730_v0  ;;  %10583 = vmatmul.mubr.msk.f32.vlgmr.msra.gmra.mxu1 %vm144_vm3, %v4820_v4 }
  0xce   :  { %10588 = vmatmul.mubr.msk.f32.vlgmr.msra.gmra.mxu0 %vm144_vm3, %v4821_v5  ;;  %10591 = vmatpush3.msk.msra.mxu1 %vm148_vm2, %v11774_v60 }
  0xcf   :  { %10592 = vmatprep.mubr.msk.f32.mxu1 %vm11170_vm1, %v12730_v0  ;;  %10595 = vmatprep.subr.mxu1 %v12730_v0 }
  0xd0   :  { %10625 = vmatprep.mubr.msk.f32.mxu0 %vm11170_vm1, %v12730_v0  ;;  %10618 = vmatpush3.msra.mxu0 %v11894_v26 }
  0xd1   :  { %10593 = vmatmul.mubr.msk.f32.vlgmr.msra.gmra.mxu1 %vm144_vm3, %v4822_v6  ;;  %10619 = vmatprep.subr.mxu0 %v12730_v0 }
  0xd2   :  { %10603 = vmatprep.mubr.msk.f32.mxu1 %vm11170_vm1, %v12730_v0  ;;  %10596 = vmatpush3.msra.mxu1 %v11894_v26 }
  0xd3   :  { %10597 = vmatprep.subr.mxu1 %v12730_v0  ;;  %10620 = vmatpush3.msra.mxu0 %v11903_v31 }
  0xd4   :  { %10598 = vmatpush3.msra.mxu1 %v11903_v31  ;;  %10621 = vmatprep.subr.mxu0 %v12730_v0 }
  0xd5   :  { %10599 = vmatprep.subr.mxu1 %v12730_v0  ;;  %10622 = vmatpush3.msra.mxu0 %v11909_v34 }
  0xd6   :  { %10600 = vmatpush3.msra.mxu1 %v11909_v34  ;;  %10623 = vmatprep.subr.mxu0 %v12730_v0 }
  0xd7   :  { %10601 = vmatprep.subr.mxu1 %v12730_v0  ;;  %10624 = vmatpush3.msra.mxu0 %v11919_v39 }
  0xd8   :  { %10602 = vmatpush3.msra.mxu1 %v11919_v39  ;;  %10639 = vmatprep.subr.mxu0 %v12730_v0 }
  0xd9   :  { %10604 = vmatmul.mubr.msk.f32.vlgmr.msra.gmra.mxu1 %vm6054_vm5, %v11923_v42  ;;  %10606 = vmatprep.subr.mxu1 %v12730_v0 }
  0xda   :  { %10607 = vmatpush3.msra.mxu1 %v11894_v26  ;;  %10614 = vmatprep.mubr.msk.f32.mxu1 %vm11170_vm1, %v12730_v0 }
  0xdb   :  { %10608 = vmatprep.subr.mxu1 %v12730_v0 }
  0xdc   :  { %10609 = vmatpush3.msra.mxu1 %v11903_v31 }
  0xdd   :  { %10610 = vmatprep.subr.mxu1 %v12730_v0 }
  0xde   :  { %10611 = vmatpush3.msra.mxu1 %v11909_v34 }
  0xdf   :  { %10612 = vmatprep.subr.mxu1 %v12730_v0 }
  0xe0   :  { %10613 = vmatpush3.msra.mxu1 %v11919_v39 }
  0xe1   :  { %10628 = vmatprep.subr.mxu1 %v12730_v0 }
  0xf0   :  { %v218_v7 = vpop.f32.mrf.mxu0 }
  0xf2   :  { %v10199_v8 = vpop.f32.mrf.mxu0 }
  0xf5   :  { %v291_v9 = vpop.f32.mrf.mxu1 }
  0xf6   :  { %v364_v10 = vpop.f32.mrf.mxu0 }
  0xf7   :  { %v10204_v11 = vpop.f32.mrf.mxu1 }
  0xf8   :  { %v10209_v12 = vpop.f32.mrf.mxu0 }
  0xf9   :  { %v437_v13 = vpop.f32.mrf.mxu1 }
  0xfa   :  { %v510_v14 = vpop.f32.mrf.mxu0 }
  0xfb   :  { %v10214_v15 = vpop.f32.mrf.mxu1 }
  0xfc   :  { %v10219_v16 = vpop.f32.mrf.mxu0 }
  0xfd   :  { %v583_v17 = vpop.f32.mrf.mxu1 }
  0xfe   :  { %v656_v18 = vpop.f32.mrf.mxu0 }
  0xff   :  { %v10224_v19 = vpop.f32.mrf.mxu1 }
 0x100   :  { %v10229_v20 = vpop.f32.mrf.mxu0 }
 0x101   :  { %v729_v21 = vpop.f32.mrf.mxu1 }
 0x102   :  { %v805_v22 = vpop.f32.mrf.mxu0 }
 0x103   :  { %v11884_v23 = vadd.f32 %v805_v22, %v218_v7  ;;  %v10234_v24 = vpop.f32.mrf.mxu1 }
 0x104   :  { %v10239_v25 = vpop.f32.mrf.mxu0 }
 0x105   :  { %v878_v27 = vpop.f32.mrf.mxu1 }
 0x106   :  { %v951_v28 = vpop.f32.mrf.mxu0  ;;  %v11898_v29 = vadd.f32 %v878_v27, %v291_v9 }
 0x107   :  { %v11900_v30 = vadd.f32 %v951_v28, %v364_v10  ;;  %v10244_v32 = vpop.f32.mrf.mxu1 }
 0x108   :  { %v10249_v33 = vpop.f32.mrf.mxu0 }
 0x109   :  { %v1024_v35 = vpop.f32.mrf.mxu1 }
 0x10a   :  { %v1097_v36 = vpop.f32.mrf.mxu0  ;;  %v11914_v37 = vadd.f32 %v1024_v35, %v437_v13 }
 0x10b   :  { %v11916_v38 = vadd.f32 %v1097_v36, %v510_v14  ;;  %v10254_v40 = vpop.f32.mrf.mxu1 }
 0x10c   :  { %v10259_v41 = vpop.f32.mrf.mxu0 }
 0x10d   :  { %v1170_v43 = vpop.f32.mrf.mxu1 }
 0x10e   :  { %v1243_v44 = vpop.f32.mrf.mxu0  ;;  %v11932_v45 = vadd.f32 %v1170_v43, %v583_v17 }
 0x10f   :  { %v11934_v46 = vadd.f32 %v1243_v44, %v656_v18  ;;  %v10264_v47 = vpop.f32.mrf.mxu1 }
 0x110   :  { %v10269_v48 = vpop.f32.mrf.mxu0 }
 0x111   :  { %v1316_v49 = vpop.f32.mrf.mxu1 }
 0x112   :  { %v1389_v50 = vpop.f32.mrf.mxu0  ;;  %v11941_v51 = vadd.f32 %v1316_v49, %v729_v21 }
 0x113   :  { %v10274_v52 = vpop.f32.mrf.mxu1 }
 0x114   :  { %v10279_v53 = vpop.f32.mrf.mxu0 }
 0x115   :  { %v1462_v54 = vpop.f32.mrf.mxu1 }
 0x116   :  { %v1535_v55 = vpop.f32.mrf.mxu0 }
 0x117   :  { %v10284_v56 = vpop.f32.mrf.mxu1 }
 0x118   :  { %v10289_v57 = vpop.f32.mrf.mxu0 }
 0x119   :  { %v1608_v58 = vpop.f32.mrf.mxu1 }
 0x11a   :  { %v1681_v59 = vpop.f32.mrf.mxu0 }
 0x11b   :  { %v10294_v60 = vpop.f32.mrf.mxu1 }
 0x11c   :  { %v10299_v61 = vpop.f32.mrf.mxu0 }
 0x11d   :  { %v1754_v62 = vpop.f32.mrf.mxu1 }
 0x11e   :  { %v1827_v63 = vpop.f32.mrf.mxu0 }
 0x11f   :  { %v10304_v1 = vpop.f32.mrf.mxu1 }
 0x120   :  { %v10309_v2 = vpop.f32.mrf.mxu0 }
 0x121   :  { %v1900_v3 = vpop.f32.mrf.mxu1 }
 0x122   :  { %v1970_v4 = vpop.f32.mrf.mxu0 }
 0x123   :  { %v11946_v5 = vadd.f32 %v1970_v4, %v1389_v50  ;;  %v10314_v6 = vpop.f32.mrf.mxu1 }
 0x124   :  { %v10319_v7 = vpop.f32.mrf.mxu0 }
 0x125   :  { %v2040_v8 = vpop.f32.mrf.mxu1 }
 0x126   :  { %v2110_v9 = vpop.f32.mrf.mxu0  ;;  %v11948_v10 = vadd.f32 %v2040_v8, %v1462_v54 }
 0x127   :  { %v11950_v11 = vadd.f32 %v2110_v9, %v1535_v55  ;;  %v10324_v12 = vpop.f32.mrf.mxu1 }
 0x128   :  { %v10329_v13 = vpop.f32.mrf.mxu0 }
 0x129   :  { %v2180_v14 = vpop.f32.mrf.mxu1 }
 0x12a   :  { %v2250_v15 = vpop.f32.mrf.mxu0  ;;  %v11952_v16 = vadd.f32 %v2180_v14, %v1608_v58 }
 0x12b   :  { %v11954_v17 = vadd.f32 %v2250_v15, %v1681_v59  ;;  %v10334_v18 = vpop.f32.mrf.mxu1 }
 0x12c   :  { %v10339_v19 = vpop.f32.mrf.mxu0 }
 0x12d   :  { %v2320_v20 = vpop.f32.mrf.mxu1 }
 0x12e   :  { %v2390_v21 = vpop.f32.mrf.mxu0  ;;  %v11956_v22 = vadd.f32 %v2320_v20, %v1754_v62 }
 0x12f   :  { %v11958_v24 = vadd.f32 %v2390_v21, %v1827_v63  ;;  %v10344_v25 = vpop.f32.mrf.mxu1 }
 0x130   :  { %v10349_v27 = vpop.f32.mrf.mxu0 }
 0x131   :  { %v2460_v28 = vpop.f32.mrf.mxu1 }
 0x132   :  { %v2544_v32 = vpop.f32.mrf.mxu0  ;;  %v11960_v33 = vadd.f32 %v2460_v28, %v1900_v3 }
 0x133   :  { %v11963_v35 = vadd.f32 %v2544_v32, %v11884_v23  ;;  %v10354_v36 = vpop.f32.mrf.mxu1 }
 0x134   :  { %v10359_v40 = vpop.f32.mrf.mxu0 }
 0x135   :  { %v2614_v41 = vpop.f32.mrf.mxu1 }
 0x136   :  { %v2684_v43 = vpop.f32.mrf.mxu0  ;;  %v11966_v44 = vadd.f32 %v2614_v41, %v11898_v29 }
 0x137   :  { %v11969_v47 = vadd.f32 %v2684_v43, %v11900_v30  ;;  %v10364_v48 = vpop.f32.mrf.mxu1 }
 0x138   :  { %v10369_v49 = vpop.f32.mrf.mxu0 }
 0x139   :  { %v2754_v50 = vpop.f32.mrf.mxu1 }
 0x13a   :  { %v2824_v52 = vpop.f32.mrf.mxu0  ;;  %v11972_v53 = vadd.f32 %v2754_v50, %v11914_v37 }
 0x13b   :  { %v11975_v23 = vadd.f32 %v2824_v52, %v11916_v38  ;;  %v10374_v54 = vpop.f32.mrf.mxu1 }
 0x13c   :  { %v10379_v55 = vpop.f32.mrf.mxu0 }
 0x13d   :  { %v2894_v56 = vpop.f32.mrf.mxu1 }
 0x13e   :  { %v2964_v57 = vpop.f32.mrf.mxu0  ;;  %v11978_v29 = vadd.f32 %v2894_v56, %v11932_v45 }
 0x13f   :  { %v11981_v30 = vadd.f32 %v2964_v57, %v11934_v46  ;;  %v10384_v58 = vpop.f32.mrf.mxu1 }
 0x140   :  { %v10389_v59 = vpop.f32.mrf.mxu0 }
 0x141   :  { %v3034_v60 = vpop.f32.mrf.mxu1 }
 0x142   :  { %v3115_v61 = vpop.f32.mrf.mxu0  ;;  %v11984_v37 = vadd.f32 %v3034_v60, %v11941_v51 }
 0x143   :  { %v10394_v62 = vpop.f32.mrf.mxu1 }
 0x144   :  { %v10399_v38 = vpop.f32.mrf.mxu0 }
 0x145   :  { %v11986_v63 = vpop.f32.mrf.mxu1 }
 0x146   :  { %v11988_v1 = vpop.f32.mrf.mxu0 }
 0x147   :  { %v10404_v2 = vpop.f32.mrf.mxu1 }
 0x148   :  { %v10409_v3 = vpop.f32.mrf.mxu0 }
 0x149   :  { %v11990_v45 = vpop.f32.mrf.mxu1 }
 0x14a   :  { %v11992_v4 = vpop.f32.mrf.mxu0 }
 0x14b   :  { %v10414_v46 = vpop.f32.mrf.mxu1 }
 0x14c   :  { %v10419_v6 = vpop.f32.mrf.mxu0 }
 0x14d   :  { %v11994_v7 = vpop.f32.mrf.mxu1 }
 0x14e   :  { %v11996_v8 = vpop.f32.mrf.mxu0 }
 0x14f   :  { %v10424_v51 = vpop.f32.mrf.mxu1 }
 0x150   :  { %v10429_v9 = vpop.f32.mrf.mxu0 }
 0x151   :  { %v11998_v12 = vpop.f32.mrf.mxu1 }
 0x152   :  { %v3718_v13 = vpop.f32.mrf.mxu0 }
 0x153   :  { %v10434_v14 = vpop.f32.mrf.mxu1 }
 0x154   :  { %v10439_v15 = vpop.f32.mrf.mxu0 }
 0x155   :  { %v3788_v18 = vpop.f32.mrf.mxu1 }
 0x156   :  { %v3858_v19 = vpop.f32.mrf.mxu0 }
 0x157   :  { %v10444_v20 = vpop.f32.mrf.mxu1 }
 0x158   :  { %v10449_v21 = vpop.f32.mrf.mxu0 }
 0x159   :  { %v12000_v25 = vpop.f32.mrf.mxu1 }
 0x15a   :  { %v12002_v27 = vpop.f32.mrf.mxu0 }
 0x15b   :  { %v10454_v28 = vpop.f32.mrf.mxu1 }
 0x15c   :  { %v10459_v32 = vpop.f32.mrf.mxu0 }
 0x15d   :  { %v12004_v36 = vpop.f32.mrf.mxu1 }
 0x15e   :  { %v12006_v40 = vpop.f32.mrf.mxu0 }
 0x15f   :  { %v10464_v41 = vpop.f32.mrf.mxu1 }
 0x160   :  { %v10469_v43 = vpop.f32.mrf.mxu0 }
 0x161   :  { %v12008_v48 = vpop.f32.mrf.mxu1 }
 0x162   :  { %v4289_v49 = vpop.f32.mrf.mxu0 }
 0x163   :  { %v10474_v50 = vpop.f32.mrf.mxu1 }
 0x164   :  { %v10479_v52 = vpop.f32.mrf.mxu0 }
 0x165   :  { %v4362_v54 = vpop.f32.mrf.mxu1 }
 0x166   :  { %v4435_v55 = vpop.f32.mrf.mxu0 }
 0x167   :  { %v10484_v56 = vpop.f32.mrf.mxu1 }
 0x168   :  { %v10489_v57 = vpop.f32.mrf.mxu0 }
 0x169   :  { %v4508_v58 = vpop.f32.mrf.mxu1  ;;  %v3630_v57 = vadd.f32 %v3115_v61, %v11946_v5  ;;  %v12028_v5 = vld [vmem:[%s12721_s2] ss:$0 sm:$0xff] }
 0x16a   :  { %v4581_v59 = vpop.f32.mrf.mxu0 }
 0x16b   :  { %v10494_v60 = vpop.f32.mrf.mxu1 }
 0x16c   :  { %v10499_v62 = vpop.f32.mrf.mxu0 }
 0x16d   :  { %v12010_v38 = vpop.f32.mrf.mxu1 }
 0x16e   :  { %v12012_v2 = vpop.f32.mrf.mxu0 }
 0x16f   :  { %v10504_v3 = vpop.f32.mrf.mxu1 }
 0x170   :  { %v10509_v46 = vpop.f32.mrf.mxu0  ;;  %v4212_v3 = vadd.f32 %v3718_v13, %v11963_v35  ;;  %v4214_v13 = vadd.f32 %v3858_v19, %v11969_v47  ;;  %v4215_v47 = vadd.f32 %v12000_v25, %v11972_v53  ;;  %v4216_v19 = vadd.f32 %v12002_v27, %v11975_v23 }
 0x171   :  { %v12014_v6 = vpop.f32.mrf.mxu1  ;;  %v4804_v46 = vadd.f32 %v4289_v49, %v3630_v57 }
 0x172   :  { %v4892_v51 = vpop.f32.mrf.mxu0 }
 0x173   :  { %v10514_v9 = vpop.f32.mrf.mxu1 }
 0x174   :  { %v10519_v14 = vpop.f32.mrf.mxu0 }
 0x175   :  { %v4962_v15 = vpop.f32.mrf.mxu1  ;;  %v3631_v14 = vadd.f32 %v11986_v63, %v11948_v10  ;;  %v3633_v10 = vadd.f32 %v11990_v45, %v11952_v16 }
 0x176   :  { %v5032_v20 = vpop.f32.mrf.mxu0 }
 0x177   :  { %v10524_v21 = vpop.f32.mrf.mxu1  ;;  %v4805_v49 = vadd.f32 %v4362_v54, %v3631_v14  ;;  %v4807_v54 = vadd.f32 %v4508_v58, %v3633_v10 }
 0x178   :  { %v10529_v28 = vpop.f32.mrf.mxu0  ;;  %v3632_v21 = vadd.f32 %v11988_v1, %v11950_v11  ;;  %v3634_v11 = vadd.f32 %v11992_v4, %v11954_v17 }
 0x179   :  { %v5102_v32 = vpop.f32.mrf.mxu1  ;;  %v5386_v28 = vadd.f32 %v4892_v51, %v4212_v3 }
 0x17a   :  { %v5172_v41 = vpop.f32.mrf.mxu0  ;;  %v4806_v57 = vadd.f32 %v4435_v55, %v3632_v21  ;;  %v4808_v45 = vadd.f32 %v4581_v59, %v3634_v11  ;;  %v4217_v59 = vadd.f32 %v12004_v36, %v11978_v29 }
 0x17b   :  { %v10534_v43 = vpop.f32.mrf.mxu1  ;;  %v5390_v14 = vadd.f32 %v5172_v41, %v4216_v19  ;;  %v12078_v19 = vld [vmem:[#allocation5 + $0x18] sm:$0xff] }
 0x17c   :  { %v10539_v50 = vpop.f32.mrf.mxu0 }
 0x17d   :  { %v5242_v52 = vpop.f32.mrf.mxu1  ;;  %v4213_v50 = vadd.f32 %v3788_v18, %v11966_v44  ;;  %v5388_v18 = vadd.f32 %v5032_v20, %v4214_v13  ;;  %v3636_v20 = vadd.f32 %v11996_v8, %v11958_v24 }
 0x17e   :  { %v5312_v56 = vpop.f32.mrf.mxu0 }
 0x17f   :  { %v10544_v60 = vpop.f32.mrf.mxu1  ;;  %v5387_v63 = vadd.f32 %v4962_v15, %v4213_v50  ;;  %v3635_v15 = vadd.f32 %v11994_v7, %v11956_v22  ;;  %v4218_v22 = vadd.f32 %v12006_v40, %v11981_v30  ;;  %v4810_v7 = vadd.f32 %v12012_v2, %v3636_v20 }
 0x180   :  { %v10549_v62 = vpop.f32.mrf.mxu0  ;;  %v4219_v2 = vadd.f32 %v12008_v48, %v11984_v37 }
 0x181   :  { %v12018_v0 = vpop.f32.mrf.mxu1  ;;  %v4809_v24 = vadd.f32 %v12010_v38, %v3635_v15  ;;  %v5392_v13 = vadd.f32 %v5312_v56, %v4218_v22  ;;  %v12353_v22 = vld [vmem:[#allocation5 + $0x68] sm:$0xff] }
 0x182   :  { %v5463_v9 = vpop.f32.mrf.mxu0 }
 0x183   :  { %v5978_v43 = vadd.f32 %v5463_v9, %v4804_v46  ;;  %v10554_v35 = vpop.f32.mrf.mxu1  ;;  %v5389_v9 = vadd.f32 %v5102_v32, %v4215_v47 }
 0x184   :  { %v10559_v61 = vpop.f32.mrf.mxu0  ;;  %v3637_v35 = vadd.f32 %v11998_v12, %v11960_v33 }
 0x185   :  { %v5986_v60 = vmax.f32 %v5386_v28, %v5978_v43  ;;  %v5536_v44 = vpop.f32.mrf.mxu1  ;;  %v5391_v61 = vadd.f32 %v5242_v52, %v4217_v59  ;;  %v12347_v59 = vld [vmem:[#allocation5 + $0x70] sm:$0xff] }
 0x186   :  { %v5609_v1 = vpop.f32.mrf.mxu0  ;;  %v5979_v62 = vadd.f32 %v5536_v44, %v4805_v49 }
 0x187   :  { %v6001_v51 = vadd.f32 %v12028_v5, %v5986_v60  ;;  %v5980_v3 = vadd.f32 %v5609_v1, %v4806_v57  ;;  %v10564_v55 = vpop.f32.mrf.mxu1  ;;  %v4811_v57 = vadd.f32 %v12014_v6, %v3637_v35  ;;  %v12449_v35 = vld [vmem:[#allocation5 + $0x88] sm:$0xff] }
 0x188   :  { %v10569_v16 = vpop.f32.mrf.mxu0  ;;  %v5987_v17 = vmax.f32 %v5387_v63, %v5979_v62  ;;  %v5393_v63 = vadd.f32 %v12018_v0, %v4219_v2  ;;  %v12093_v55 = vld [vmem:[#allocation5 + $0x8] sm:$0xff] }
 0x189   :  { %v6009_v46 = vmax.f32 %v6001_v51, 0.0  ;;  %v5988_v4 = vmax.f32 %v5388_v18, %v5980_v3  ;;  %v5682_v21 = vpop.f32.mrf.mxu1  ;;  %v12732_v3 = vmov 0.0  }
 0x18a   :  { %v5755_v53 = vpop.f32.mrf.mxu0  ;;  %v6002_v23 = vadd.f32 %v12028_v5, %v5987_v17  ;;  %v5981_v27 = vadd.f32 %v5682_v21, %v4807_v54  ;;  %v12252_v21 = vld [vmem:[#allocation5 + $0x48] sm:$0xff] }
 0x18b   :  { %6024 = vst.msk [vmem:[#allocation3 + $0x4] sm:$0x3] %vm6017_vm4, %v6009_v46  ;;  %v6003_v25 = vadd.f32 %v12028_v5, %v5988_v4  ;;  %v5982_v58 = vadd.f32 %v5755_v53, %v4808_v45  ;;  %v10574_v8 = vpop.f32.mrf.mxu1  ;;  %v12101_v45 = vld [vmem:[#allocation5] sm:$0xff]  ;;  %v6036_v46 = vld [vmem:[#allocation3] sm:$0x3] }
 0x18c   :  { %v10579_v32 = vpop.f32.mrf.mxu0  ;;  %v6010_v41 = vmax.f32 %v6002_v23, 0.0  ;;  %v5989_v43 = vmax.f32 %v5389_v9, %v5981_v27  ;;  %v12260_v53 = vld [vmem:[#allocation5 + $0x40] sm:$0xff] }
 0x18d   :  { %v6011_v28 = vmax.f32 %v6003_v25, 0.0  ;;  %v5990_v50 = vmax.f32 %v5390_v14, %v5982_v58  ;;  %v5828_v49 = vpop.f32.mrf.mxu1  ;;  %v12341_v58 = vld [vmem:[#allocation5 + $0x78] sm:$0xff] }
 0x18e   :  { %v5901_v29 = vpop.f32.mrf.mxu0  ;;  %6025 = vst.msk [vmem:[#allocation3 + $0x6] sm:$0x3] %vm6017_vm4, %v6010_v41  ;;  %v6004_v30 = vadd.f32 %v12028_v5, %v5989_v43  ;;  %v5983_v40 = vadd.f32 %v5828_v49, %v4809_v24  ;;  %v12443_v43 = vld [vmem:[#allocation5 + $0x90] sm:$0xff] }
 0x18f   :  { %6026 = vst.msk [vmem:[#allocation3 + $0x8] sm:$0x3] %vm6017_vm4, %v6011_v28  ;;  %v6005_v36 = vadd.f32 %v12028_v5, %v5990_v50  ;;  %v5984_v38 = vadd.f32 %v5901_v29, %v4810_v7  ;;  %v10584_v33 = vpop.f32.mrf.mxu1  ;;  %v12360_v7 = vld [vmem:[#allocation5 + $0x60] sm:$0xff]  ;;  %v12437_v28 = vld [vmem:[#allocation5 + $0x98] sm:$0xff] }
 0x190   :  { %v10589_v12 = vpop.f32.mrf.mxu0  ;;  %v6012_v52 = vmax.f32 %v6004_v30, 0.0  ;;  %v5991_v60 = vmax.f32 %v5391_v61, %v5983_v40  ;;  %v7810_v50 = vld [vmem:[#allocation3 + $0x14] sm:$0x3]  ;;  %v12456_v61 = vld [vmem:[#allocation5 + $0x80] sm:$0xff]  ;;  %v8400_v30 = vld [vmem:[#allocation3 + $0x16] sm:$0x3] }
 0x191   :  { %v6013_v56 = vmax.f32 %v6005_v36, 0.0  ;;  %v5992_v10 = vmax.f32 %v5392_v13, %v5984_v38  ;;  %v5974_v11 = vpop.f32.mrf.mxu1 }
 0x192   :  { %6027 = vst.msk [vmem:[#allocation3 + $0xa] sm:$0x3] %vm6017_vm4, %v6012_v52  ;;  %v6006_v44 = vadd.f32 %v12028_v5, %v5991_v60  ;;  %v5985_v37 = vadd.f32 %v5974_v11, %v4811_v57  ;;  %v6037_v17 = vld [vmem:[#allocation3 + $0x4] sm:$0x3] }
 0x193   :  { %6028 = vst.msk [vmem:[#allocation3 + $0xc] sm:$0x3] %vm6017_vm4, %v6013_v56  ;;  %v6007_v1 = vadd.f32 %v12028_v5, %v5992_v10  ;;  %v10594_v48 = vpop.f32.mrf.mxu1  ;;  %v12157_v20 = vld [vmem:[#allocation3 + $0x4] sm:$0x3] }
 0x194   :  { %v6014_v6 = vmax.f32 %v6006_v44, 0.0  ;;  %v5993_v51 = vmax.f32 %v5393_v63, %v5985_v37 }
 0x195   :  { %v6015_v18 = vmax.f32 %v6007_v1, 0.0  ;;  %v12067_v62 = vld [vmem:[#allocation3 + $0x6] sm:$0x3] }
 0x196   :  { %6029 = vst.msk [vmem:[#allocation3 + $0xe] sm:$0x3] %vm6017_vm4, %v6014_v6  ;;  %v6008_v0 = vadd.f32 %v12028_v5, %v5993_v51  ;;  %10615 = vmatmul.mubr.msk.f32.vlgmr.msra.gmra.mxu1 %vm6054_vm5, %v12067_v62  ;;  %v12087_v5 = vld [vmem:[#allocation5 + $0x10] sm:$0xff]  ;;  %v7217_v23 = vld [vmem:[#allocation3 + $0x6] sm:$0x3] }
 0x197   :  { %6030 = vst.msk [vmem:[#allocation3 + $0x10] sm:$0x3] %vm6017_vm4, %v6015_v18  ;;  %10629 = vmatpush3.msra.mxu1 %v11894_v26  ;;  %10636 = vmatprep.mubr.msk.f32.mxu1 %vm11170_vm1, %v12732_v3  ;;  %v6038_v4 = vld [vmem:[#allocation3 + $0x8] sm:$0x3] }
 0x198   :  { %v6016_v47 = vmax.f32 %v6008_v0, 0.0  ;;  %10630 = vmatprep.subr.mxu1 %v12732_v3  ;;  %v12171_v9 = vld [vmem:[#allocation3 + $0x8] sm:$0x3] }
 0x199   :  { %10631 = vmatpush3.msra.mxu1 %v11903_v31  ;;  %v12081_v54 = vld [vmem:[#allocation3 + $0xa] sm:$0x3]  ;;  %v7807_v8 = vld [vmem:[#allocation3 + $0x8] sm:$0x3] }
 0x19a   :  { %6031 = vst.msk [vmem:[#allocation3 + $0x12] sm:$0x3] %vm6017_vm4, %v6016_v47  ;;  %10632 = vmatprep.subr.mxu1 %v12732_v3  ;;  %10626 = vmatmul.mubr.msk.f32.vlgmr.msra.gmra.mxu0 %vm6054_vm5, %v12081_v54  ;;  %v6039_v15 = vld [vmem:[#allocation3 + $0xc] sm:$0x3]  ;;  %v7218_v25 = vld [vmem:[#allocation3 + $0xa] sm:$0x3] }
 0x19b   :  { %10633 = vmatpush3.msra.mxu1 %v11909_v34  ;;  %10640 = vmatpush3.msra.mxu0 %v12078_v19  ;;  %v12185_v14 = vld [vmem:[#allocation3 + $0xc] sm:$0x3]  ;;  %v8397_v13 = vld [vmem:[#allocation3 + $0xa] sm:$0x3] }
 0x19c   :  { %10634 = vmatprep.subr.mxu1 %v12732_v3  ;;  %10641 = vmatprep.subr.mxu0 %v12732_v3  ;;  %v7808_v32 = vld [vmem:[#allocation3 + $0xc] sm:$0x3] }
 0x19d   :  { %10635 = vmatpush3.msra.mxu1 %v11919_v39  ;;  %10642 = vmatpush3.msra.mxu0 %v12087_v5  ;;  %v12097_v16 = vld [vmem:[#allocation3 + $0xe] sm:$0x3] }
 0x19e   :  { %10643 = vmatprep.subr.mxu0 %v12732_v3  ;;  %10650 = vmatprep.subr.mxu1 %v12732_v3  ;;  %v7219_v27 = vld [vmem:[#allocation3 + $0xe] sm:$0x3]  ;;  %v7809_v41 = vld [vmem:[#allocation3 + $0x10] sm:$0x3] }
 0x19f   :  { %10637 = vmatmul.mubr.msk.f32.vlgmr.msra.gmra.mxu1 %vm6054_vm5, %v12097_v16  ;;  %10644 = vmatpush3.msra.mxu0 %v12093_v55  ;;  %v8398_v49 = vld [vmem:[#allocation3 + $0xe] sm:$0x3] }
 0x1a0   :  { %10651 = vmatpush3.msra.mxu1 %v12078_v19  ;;  %10645 = vmatprep.subr.mxu0 %v12732_v3 }
 0x1a1   :  { %10652 = vmatprep.subr.mxu1 %v12732_v3  ;;  %10646 = vmatpush3.msra.mxu0 %v12101_v45  ;;  %v7220_v24 = vld [vmem:[#allocation3 + $0x12] sm:$0x3] }
 0x1a2   :  { %10647 = vmatprep.mubr.msk.f32.mxu0 %vm11170_vm1, %v12732_v3  ;;  %10653 = vmatpush3.msra.mxu1 %v12087_v5  ;;  %v8399_v29 = vld [vmem:[#allocation3 + $0x12] sm:$0x3] }
 0x1a3   :  { %10648 = vmatmul.mubr.msk.f32.vlgmr.msra.gmra.mxu0 %vm6054_vm5, %v6036_v46  ;;  %10654 = vmatprep.subr.mxu1 %v12732_v3 }
 0x1a4   :  { %10661 = vmatprep.subr.mxu0 %v12732_v3  ;;  %10655 = vmatpush3.msra.mxu1 %v12093_v55 }
 0x1a5   :  { %10662 = vmatpush3.msra.mxu0 %v12078_v19  ;;  %10656 = vmatprep.subr.mxu1 %v12732_v3 }
 0x1a6   :  { %10663 = vmatprep.subr.mxu0 %v12732_v3  ;;  %10657 = vmatpush3.msra.mxu1 %v12101_v45 }
 0x1a7   :  { %10658 = vmatprep.mubr.msk.f32.mxu1 %vm11170_vm1, %v12732_v3  ;;  %10664 = vmatpush3.msra.mxu0 %v12087_v5 }
 0x1a8   :  { %10659 = vmatmul.mubr.msk.f32.vlgmr.msra.gmra.mxu1 %vm6054_vm5, %v6037_v17  ;;  %10665 = vmatprep.subr.mxu0 %v12732_v3 }
 0x1a9   :  { %10672 = vmatprep.subr.mxu1 %v12732_v3  ;;  %10666 = vmatpush3.msra.mxu0 %v12093_v55 }
 0x1aa   :  { %10673 = vmatpush3.msra.mxu1 %v12078_v19  ;;  %10667 = vmatprep.subr.mxu0 %v12732_v3 }
 0x1ab   :  { %10674 = vmatprep.subr.mxu1 %v12732_v3  ;;  %10668 = vmatpush3.msra.mxu0 %v12101_v45 }
 0x1ac   :  { %10669 = vmatprep.mubr.msk.f32.mxu0 %vm11170_vm1, %v12732_v3  ;;  %10675 = vmatpush3.msra.mxu1 %v12087_v5 }
 0x1ad   :  { %10670 = vmatmul.mubr.msk.f32.vlgmr.msra.gmra.mxu0 %vm6054_vm5, %v6038_v4  ;;  %10676 = vmatprep.subr.mxu1 %v12732_v3 }
 0x1ae   :  { %10683 = vmatprep.subr.mxu0 %v12732_v3  ;;  %10677 = vmatpush3.msra.mxu1 %v12093_v55 }
 0x1af   :  { %10684 = vmatpush3.msra.mxu0 %v11894_v26  ;;  %10678 = vmatprep.subr.mxu1 %v12732_v3 }
 0x1b0   :  { %10685 = vmatprep.subr.mxu0 %v12732_v3  ;;  %10679 = vmatpush3.msra.mxu1 %v12101_v45 }
 0x1b1   :  { %10680 = vmatprep.mubr.msk.f32.mxu1 %vm11170_vm1, %v12732_v3  ;;  %10686 = vmatpush3.msra.mxu0 %v11903_v31 }
 0x1b2   :  { %10681 = vmatmul.mubr.msk.f32.vlgmr.msra.gmra.mxu1 %vm6054_vm5, %v6039_v15  ;;  %10687 = vmatprep.subr.mxu0 %v12732_v3 }
 0x1b3   :  { %10694 = vmatprep.subr.mxu1 %v12732_v3  ;;  %10688 = vmatpush3.msra.mxu0 %v11909_v34 }
 0x1b4   :  { %10695 = vmatpush3.msra.mxu1 %v11894_v26  ;;  %10689 = vmatprep.subr.mxu0 %v12732_v3 }
 0x1b5   :  { %10696 = vmatprep.subr.mxu1 %v12732_v3  ;;  %10690 = vmatpush3.msra.mxu0 %v11919_v39 }
 0x1b6   :  { %10691 = vmatprep.mubr.msk.f32.mxu0 %vm11170_vm1, %v12732_v3  ;;  %10697 = vmatpush3.msra.mxu1 %v11903_v31 }
 0x1b7   :  { %10692 = vmatmul.mubr.msk.f32.vlgmr.msra.gmra.mxu0 %vm6054_vm5, %v12157_v20  ;;  %10698 = vmatprep.subr.mxu1 %v12732_v3 }
 0x1b8   :  { %10705 = vmatprep.subr.mxu0 %v12732_v3  ;;  %10699 = vmatpush3.msra.mxu1 %v11909_v34 }
 0x1b9   :  { %10706 = vmatpush3.msra.mxu0 %v11894_v26  ;;  %10700 = vmatprep.subr.mxu1 %v12732_v3 }
 0x1ba   :  { %10707 = vmatprep.subr.mxu0 %v12732_v3  ;;  %10701 = vmatpush3.msra.mxu1 %v11919_v39 }
 0x1bb   :  { %10702 = vmatprep.mubr.msk.f32.mxu1 %vm11170_vm1, %v12732_v3  ;;  %10708 = vmatpush3.msra.mxu0 %v11903_v31 }
 0x1bc   :  { %10703 = vmatmul.mubr.msk.f32.vlgmr.msra.gmra.mxu1 %vm6054_vm5, %v12171_v9  ;;  %10709 = vmatprep.subr.mxu0 %v12732_v3 }
 0x1bd   :  { %10716 = vmatprep.subr.mxu1 %v12732_v3  ;;  %10710 = vmatpush3.msra.mxu0 %v11909_v34 }
 0x1be   :  { %10717 = vmatpush3.msra.mxu1 %v11894_v26  ;;  %10711 = vmatprep.subr.mxu0 %v12732_v3  ;;  %v12199_v26 = vld [vmem:[#allocation3 + $0x10] sm:$0x3] }
 0x1bf   :  { %10718 = vmatprep.subr.mxu1 %v12732_v3  ;;  %10712 = vmatpush3.msra.mxu0 %v11919_v39 }
 0x1c0   :  { %10713 = vmatprep.mubr.msk.f32.mxu0 %vm11170_vm1, %v12732_v3  ;;  %10719 = vmatpush3.msra.mxu1 %v11903_v31  ;;  %v12230_v31 = vpop.f32.mrf.mxu1 }
 0x1c1   :  { %10714 = vmatmul.mubr.msk.f32.vlgmr.msra.gmra.mxu0 %vm6054_vm5, %v12185_v14  ;;  %10720 = vmatprep.subr.mxu1 %v12732_v3 }
 0x1c2   :  { %10727 = vmatprep.subr.mxu0 %v12732_v3  ;;  %10721 = vmatpush3.msra.mxu1 %v11909_v34  ;;  %v10605_v34 = vpop.f32.mrf.mxu1 }
 0x1c3   :  { %10728 = vmatpush3.msra.mxu0 %v12078_v19  ;;  %10722 = vmatprep.subr.mxu1 %v12732_v3 }
 0x1c4   :  { %10729 = vmatprep.subr.mxu0 %v12732_v3  ;;  %10723 = vmatpush3.msra.mxu1 %v11919_v39  ;;  %v12239_v39 = vld [vmem:[#allocation5 + $0x58] sm:$0xff] }
 0x1c5   :  { %10724 = vmatprep.mubr.msk.f32.mxu1 %vm11170_vm1, %v12732_v3  ;;  %10730 = vmatpush3.msra.mxu0 %v12087_v5 }
 0x1c6   :  { %10725 = vmatmul.mubr.msk.f32.vlgmr.msra.gmra.mxu1 %vm6054_vm5, %v12199_v26  ;;  %10731 = vmatprep.subr.mxu0 %v12732_v3 }
 0x1c7   :  { %10738 = vmatprep.subr.mxu1 %v12732_v3  ;;  %10732 = vmatpush3.msra.mxu0 %v12093_v55 }
 0x1c8   :  { %10739 = vmatpush3.msra.mxu1 %v12078_v19  ;;  %10733 = vmatprep.subr.mxu0 %v12732_v3 }
 0x1c9   :  { %10740 = vmatprep.subr.mxu1 %v12732_v3  ;;  %10734 = vmatpush3.msra.mxu0 %v12101_v45 }
 0x1ca   :  { %10735 = vmatprep.mubr.msk.f32.mxu0 %vm11170_vm1, %v12732_v3  ;;  %10741 = vmatpush3.msra.mxu1 %v12087_v5 }
 0x1cb   :  { %10736 = vmatmul.mubr.msk.f32.vlgmr.msra.gmra.mxu0 %vm6054_vm5, %v11923_v42  ;;  %10742 = vmatprep.subr.mxu1 %v12732_v3  ;;  %v12246_v42 = vld [vmem:[#allocation5 + $0x50] sm:$0xff] }
 0x1cc   :  { %10749 = vmatprep.subr.mxu0 %v12732_v3  ;;  %10743 = vmatpush3.msra.mxu1 %v12093_v55 }
 0x1cd   :  { %10750 = vmatpush3.msra.mxu0 %v12078_v19  ;;  %10744 = vmatprep.subr.mxu1 %v12732_v3 }
 0x1ce   :  { %10751 = vmatprep.subr.mxu0 %v12732_v3  ;;  %10745 = vmatpush3.msra.mxu1 %v12101_v45 }
 0x1cf   :  { %10746 = vmatprep.mubr.msk.f32.mxu1 %vm11170_vm1, %v12732_v3  ;;  %10752 = vmatpush3.msra.mxu0 %v12087_v5 }
 0x1d0   :  { %10747 = vmatmul.mubr.msk.f32.vlgmr.msra.gmra.mxu1 %vm6054_vm5, %v12067_v62  ;;  %10753 = vmatprep.subr.mxu0 %v12732_v3 }
 0x1d1   :  { %10760 = vmatprep.subr.mxu1 %v12732_v3  ;;  %10754 = vmatpush3.msra.mxu0 %v12093_v55 }
 0x1d2   :  { %10761 = vmatpush3.msra.mxu1 %v12078_v19  ;;  %10755 = vmatprep.subr.mxu0 %v12732_v3 }
 0x1d3   :  { %10762 = vmatprep.subr.mxu1 %v12732_v3  ;;  %10756 = vmatpush3.msra.mxu0 %v12101_v45 }
 0x1d4   :  { %10757 = vmatprep.mubr.msk.f32.mxu0 %vm11170_vm1, %v12732_v3  ;;  %10763 = vmatpush3.msra.mxu1 %v12087_v5 }
 0x1d5   :  { %10758 = vmatmul.mubr.msk.f32.vlgmr.msra.gmra.mxu0 %vm6054_vm5, %v12081_v54  ;;  %10764 = vmatprep.subr.mxu1 %v12732_v3 }
 0x1d6   :  { %10771 = vmatprep.subr.mxu0 %v12732_v3  ;;  %10765 = vmatpush3.msra.mxu1 %v12093_v55 }
 0x1d7   :  { %10772 = vmatpush3.msra.mxu0 %v12239_v39  ;;  %10766 = vmatprep.subr.mxu1 %v12732_v3 }
 0x1d8   :  { %10773 = vmatprep.subr.mxu0 %v12732_v3  ;;  %10767 = vmatpush3.msra.mxu1 %v12101_v45 }
 0x1d9   :  { %10768 = vmatprep.mubr.msk.f32.mxu1 %vm11170_vm1, %v12732_v3  ;;  %10774 = vmatpush3.msra.mxu0 %v12246_v42 }
 0x1da   :  { %10769 = vmatmul.mubr.msk.f32.vlgmr.msra.gmra.mxu1 %vm6054_vm5, %v12097_v16  ;;  %10775 = vmatprep.subr.mxu0 %v12732_v3 }
 0x1db   :  { %10782 = vmatprep.subr.mxu1 %v12732_v3  ;;  %10776 = vmatpush3.msra.mxu0 %v12252_v21 }
 0x1dc   :  { %10783 = vmatpush3.msra.mxu1 %v12239_v39  ;;  %10777 = vmatprep.subr.mxu0 %v12732_v3 }
 0x1dd   :  { %10784 = vmatprep.subr.mxu1 %v12732_v3  ;;  %10778 = vmatpush3.msra.mxu0 %v12260_v53 }
 0x1de   :  { %10779 = vmatprep.mubr.msk.f32.mxu0 %vm11170_vm1, %v12732_v3  ;;  %10785 = vmatpush3.msra.mxu1 %v12246_v42 }
 0x1df   :  { %10780 = vmatmul.mubr.msk.f32.vlgmr.msra.gmra.mxu0 %vm6054_vm5, %v12157_v20  ;;  %10786 = vmatprep.subr.mxu1 %v12732_v3 }
 0x1e0   :  { %10793 = vmatprep.subr.mxu0 %v12732_v3  ;;  %10787 = vmatpush3.msra.mxu1 %v12252_v21 }
 0x1e1   :  { %10794 = vmatpush3.msra.mxu0 %v12239_v39  ;;  %10788 = vmatprep.subr.mxu1 %v12732_v3 }
 0x1e2   :  { %10795 = vmatprep.subr.mxu0 %v12732_v3  ;;  %10789 = vmatpush3.msra.mxu1 %v12260_v53 }
 0x1e3   :  { %10790 = vmatprep.mubr.msk.f32.mxu1 %vm11170_vm1, %v12732_v3  ;;  %10796 = vmatpush3.msra.mxu0 %v12246_v42 }
 0x1e4   :  { %10791 = vmatmul.mubr.msk.f32.vlgmr.msra.gmra.mxu1 %vm6054_vm5, %v12171_v9  ;;  %10797 = vmatprep.subr.mxu0 %v12732_v3 }
 0x1e5   :  { %10804 = vmatprep.subr.mxu1 %v12732_v3  ;;  %10798 = vmatpush3.msra.mxu0 %v12252_v21 }
 0x1e6   :  { %10805 = vmatpush3.msra.mxu1 %v12239_v39  ;;  %10799 = vmatprep.subr.mxu0 %v12732_v3 }
 0x1e7   :  { %10806 = vmatprep.subr.mxu1 %v12732_v3  ;;  %10800 = vmatpush3.msra.mxu0 %v12260_v53 }
 0x1e8   :  { %10801 = vmatprep.mubr.msk.f32.mxu0 %vm11170_vm1, %v12732_v3  ;;  %10807 = vmatpush3.msra.mxu1 %v12246_v42 }
 0x1e9   :  { %10802 = vmatmul.mubr.msk.f32.vlgmr.msra.gmra.mxu0 %vm6054_vm5, %v12185_v14  ;;  %10808 = vmatprep.subr.mxu1 %v12732_v3 }
 0x1ea   :  { %10815 = vmatprep.subr.mxu0 %v12732_v3  ;;  %10809 = vmatpush3.msra.mxu1 %v12252_v21 }
 0x1eb   :  { %10816 = vmatpush3.msra.mxu0 %v12239_v39  ;;  %10810 = vmatprep.subr.mxu1 %v12732_v3 }
 0x1ec   :  { %10817 = vmatprep.subr.mxu0 %v12732_v3  ;;  %10811 = vmatpush3.msra.mxu1 %v12260_v53 }
 0x1ed   :  { %10812 = vmatprep.mubr.msk.f32.mxu1 %vm11170_vm1, %v12732_v3  ;;  %10818 = vmatpush3.msra.mxu0 %v12246_v42 }
 0x1ee   :  { %10813 = vmatmul.mubr.msk.f32.vlgmr.msra.gmra.mxu1 %vm6054_vm5, %v12199_v26  ;;  %10819 = vmatprep.subr.mxu0 %v12732_v3 }
 0x1ef   :  { %10826 = vmatprep.subr.mxu1 %v12732_v3  ;;  %10820 = vmatpush3.msra.mxu0 %v12252_v21 }
 0x1f0   :  { %10827 = vmatpush3.msra.mxu1 %v12239_v39  ;;  %10821 = vmatprep.subr.mxu0 %v12732_v3 }
 0x1f1   :  { %10828 = vmatprep.subr.mxu1 %v12732_v3  ;;  %10822 = vmatpush3.msra.mxu0 %v12260_v53 }
 0x1f2   :  { %10823 = vmatprep.mubr.msk.f32.mxu0 %vm11170_vm1, %v12732_v3  ;;  %10829 = vmatpush3.msra.mxu1 %v12246_v42 }
 0x1f3   :  { %10824 = vmatmul.mubr.msk.f32.vlgmr.msra.gmra.mxu0 %vm6054_vm5, %v7217_v23  ;;  %10830 = vmatprep.subr.mxu1 %v12732_v3 }
 0x1f4   :  { %10837 = vmatprep.subr.mxu0 %v12732_v3  ;;  %10831 = vmatpush3.msra.mxu1 %v12252_v21 }
 0x1f5   :  { %10838 = vmatpush3.msra.mxu0 %v12239_v39  ;;  %10832 = vmatprep.subr.mxu1 %v12732_v3 }
 0x1f6   :  { %10839 = vmatprep.subr.mxu0 %v12732_v3  ;;  %10833 = vmatpush3.msra.mxu1 %v12260_v53 }
 0x1f7   :  { %10834 = vmatprep.mubr.msk.f32.mxu1 %vm11170_vm1, %v12732_v3  ;;  %10840 = vmatpush3.msra.mxu0 %v12246_v42 }
 0x1f8   :  { %10835 = vmatmul.mubr.msk.f32.vlgmr.msra.gmra.mxu1 %vm6054_vm5, %v7218_v25  ;;  %10841 = vmatprep.subr.mxu0 %v12732_v3 }
 0x1f9   :  { %10848 = vmatprep.subr.mxu1 %v12732_v3  ;;  %10842 = vmatpush3.msra.mxu0 %v12252_v21 }
 0x1fa   :  { %10849 = vmatpush3.msra.mxu1 %v12239_v39  ;;  %10843 = vmatprep.subr.mxu0 %v12732_v3  ;;  %v9049_v39 = vld [vmem:[#allocation7 + $0x78] sm:$0xff] }
 0x1fb   :  { %10850 = vmatprep.subr.mxu1 %v12732_v3  ;;  %10844 = vmatpush3.msra.mxu0 %v12260_v53 }
 0x1fc   :  { %10845 = vmatprep.mubr.msk.f32.mxu0 %vm11170_vm1, %v12732_v3  ;;  %10851 = vmatpush3.msra.mxu1 %v12246_v42  ;;  %v12544_v42 = vld [vmem:[#allocation9 + $0x78] sm:$0xff] }
 0x1fd   :  { %10846 = vmatmul.mubr.msk.f32.vlgmr.msra.gmra.mxu0 %vm6054_vm5, %v7219_v27  ;;  %10852 = vmatprep.subr.mxu1 %v12732_v3 }
 0x1fe   :  { %10859 = vmatprep.subr.mxu0 %v12732_v3  ;;  %10853 = vmatpush3.msra.mxu1 %v12252_v21  ;;  %v9048_v21 = vld [vmem:[#allocation7 + $0x70] sm:$0xff] }
 0x1ff   :  { %10860 = vmatpush3.msra.mxu0 %v12341_v58  ;;  %10854 = vmatprep.subr.mxu1 %v12732_v3 }
 0x200   :  { %10861 = vmatprep.subr.mxu0 %v12732_v3  ;;  %10855 = vmatpush3.msra.mxu1 %v12260_v53 }
 0x201   :  { %10856 = vmatprep.mubr.msk.f32.mxu1 %vm11170_vm1, %v12732_v3  ;;  %10862 = vmatpush3.msra.mxu0 %v12347_v59 }
 0x202   :  { %10857 = vmatmul.mubr.msk.f32.vlgmr.msra.gmra.mxu1 %vm6054_vm5, %v7220_v24  ;;  %10863 = vmatprep.subr.mxu0 %v12732_v3 }
 0x203   :  { %10870 = vmatprep.subr.mxu1 %v12732_v3  ;;  %10864 = vmatpush3.msra.mxu0 %v12353_v22 }
 0x204   :  { %10871 = vmatpush3.msra.mxu1 %v12341_v58  ;;  %10865 = vmatprep.subr.mxu0 %v12732_v3 }
 0x205   :  { %10872 = vmatprep.subr.mxu1 %v12732_v3  ;;  %10866 = vmatpush3.msra.mxu0 %v12360_v7 }
 0x206   :  { %10867 = vmatprep.mubr.msk.f32.mxu0 %vm11170_vm1, %v12732_v3  ;;  %10873 = vmatpush3.msra.mxu1 %v12347_v59 }
 0x207   :  { %10868 = vmatmul.mubr.msk.f32.vlgmr.msra.gmra.mxu0 %vm6054_vm5, %v7217_v23  ;;  %10874 = vmatprep.subr.mxu1 %v12732_v3  ;;  %v12547_v23 = vld [vmem:[#allocation9 + $0x70] sm:$0xff] }
 0x208   :  { %10881 = vmatprep.subr.mxu0 %v12732_v3  ;;  %10875 = vmatpush3.msra.mxu1 %v12353_v22 }
 0x209   :  { %10882 = vmatpush3.msra.mxu0 %v12341_v58  ;;  %10876 = vmatprep.subr.mxu1 %v12732_v3 }
 0x20a   :  { %10883 = vmatprep.subr.mxu0 %v12732_v3  ;;  %10877 = vmatpush3.msra.mxu1 %v12360_v7 }
 0x20b   :  { %10878 = vmatprep.mubr.msk.f32.mxu1 %vm11170_vm1, %v12732_v3  ;;  %10884 = vmatpush3.msra.mxu0 %v12347_v59 }
 0x20c   :  { %10879 = vmatmul.mubr.msk.f32.vlgmr.msra.gmra.mxu1 %vm6054_vm5, %v7218_v25  ;;  %10885 = vmatprep.subr.mxu0 %v12732_v3  ;;  %v9047_v25 = vld [vmem:[#allocation7 + $0x68] sm:$0xff] }
 0x20d   :  { %10892 = vmatprep.subr.mxu1 %v12732_v3  ;;  %10886 = vmatpush3.msra.mxu0 %v12353_v22 }
 0x20e   :  { %10893 = vmatpush3.msra.mxu1 %v12341_v58  ;;  %10887 = vmatprep.subr.mxu0 %v12732_v3 }
 0x20f   :  { %10894 = vmatprep.subr.mxu1 %v12732_v3  ;;  %10888 = vmatpush3.msra.mxu0 %v12360_v7 }
 0x210   :  { %10889 = vmatprep.mubr.msk.f32.mxu0 %vm11170_vm1, %v12732_v3  ;;  %10895 = vmatpush3.msra.mxu1 %v12347_v59 }
 0x211   :  { %10890 = vmatmul.mubr.msk.f32.vlgmr.msra.gmra.mxu0 %vm6054_vm5, %v7219_v27  ;;  %10896 = vmatprep.subr.mxu1 %v12732_v3  ;;  %v12549_v27 = vld [vmem:[#allocation9 + $0x68] sm:$0xff] }
 0x212   :  { %10903 = vmatprep.subr.mxu0 %v12732_v3  ;;  %10897 = vmatpush3.msra.mxu1 %v12353_v22 }
 0x213   :  { %10904 = vmatpush3.msra.mxu0 %v12341_v58  ;;  %10898 = vmatprep.subr.mxu1 %v12732_v3 }
 0x214   :  { %10905 = vmatprep.subr.mxu0 %v12732_v3  ;;  %10899 = vmatpush3.msra.mxu1 %v12360_v7 }
 0x215   :  { %10900 = vmatprep.mubr.msk.f32.mxu1 %vm11170_vm1, %v12732_v3  ;;  %10906 = vmatpush3.msra.mxu0 %v12347_v59 }
 0x216   :  { %10901 = vmatmul.mubr.msk.f32.vlgmr.msra.gmra.mxu1 %vm6054_vm5, %v7220_v24  ;;  %10907 = vmatprep.subr.mxu0 %v12732_v3 }
 0x217   :  { %10914 = vmatprep.subr.mxu1 %v12732_v3  ;;  %10908 = vmatpush3.msra.mxu0 %v12353_v22 }
 0x218   :  { %10915 = vmatpush3.msra.mxu1 %v12341_v58  ;;  %10909 = vmatprep.subr.mxu0 %v12732_v3 }
 0x219   :  { %10916 = vmatprep.subr.mxu1 %v12732_v3  ;;  %10910 = vmatpush3.msra.mxu0 %v12360_v7 }
 0x21a   :  { %10911 = vmatprep.mubr.msk.f32.mxu0 %vm11170_vm1, %v12732_v3  ;;  %10917 = vmatpush3.msra.mxu1 %v12347_v59 }
 0x21b   :  { %10912 = vmatmul.mubr.msk.f32.vlgmr.msra.gmra.mxu0 %vm6054_vm5, %v7807_v8  ;;  %10918 = vmatprep.subr.mxu1 %v12732_v3 }
 0x21c   :  { %10925 = vmatprep.subr.mxu0 %v12732_v3  ;;  %10919 = vmatpush3.msra.mxu1 %v12353_v22 }
 0x21d   :  { %10926 = vmatpush3.msra.mxu0 %v12341_v58  ;;  %10920 = vmatprep.subr.mxu1 %v12732_v3 }
 0x21e   :  { %10927 = vmatprep.subr.mxu0 %v12732_v3  ;;  %10921 = vmatpush3.msra.mxu1 %v12360_v7 }
 0x21f   :  { %10922 = vmatprep.mubr.msk.f32.mxu1 %vm11170_vm1, %v12732_v3  ;;  %10928 = vmatpush3.msra.mxu0 %v12347_v59 }
 0x220   :  { %10923 = vmatmul.mubr.msk.f32.vlgmr.msra.gmra.mxu1 %vm6054_vm5, %v7808_v32  ;;  %10929 = vmatprep.subr.mxu0 %v12732_v3 }
 0x221   :  { %10936 = vmatprep.subr.mxu1 %v12732_v3  ;;  %10930 = vmatpush3.msra.mxu0 %v12353_v22 }
 0x222   :  { %10937 = vmatpush3.msra.mxu1 %v12341_v58  ;;  %10931 = vmatprep.subr.mxu0 %v12732_v3 }
 0x223   :  { %10938 = vmatprep.subr.mxu1 %v12732_v3  ;;  %10932 = vmatpush3.msra.mxu0 %v12360_v7 }
 0x224   :  { %10933 = vmatprep.mubr.msk.f32.mxu0 %vm11170_vm1, %v12732_v3  ;;  %10939 = vmatpush3.msra.mxu1 %v12347_v59  ;;  %v9046_v59 = vld [vmem:[#allocation7 + $0x60] sm:$0xff] }
 0x225   :  { %10934 = vmatmul.mubr.msk.f32.vlgmr.msra.gmra.mxu0 %vm6054_vm5, %v7809_v41  ;;  %10940 = vmatprep.subr.mxu1 %v12732_v3 }
 0x226   :  { %10947 = vmatprep.subr.mxu0 %v12732_v3  ;;  %10941 = vmatpush3.msra.mxu1 %v12353_v22  ;;  %v12552_v22 = vld [vmem:[#allocation9 + $0x60] sm:$0xff] }
 0x227   :  { %10948 = vmatpush3.msra.mxu0 %v12437_v28  ;;  %10942 = vmatprep.subr.mxu1 %v12732_v3 }
 0x228   :  { %10949 = vmatprep.subr.mxu0 %v12732_v3  ;;  %10943 = vmatpush3.msra.mxu1 %v12360_v7 }
 0x229   :  { %10944 = vmatprep.mubr.msk.f32.mxu1 %vm11170_vm1, %v12732_v3  ;;  %10950 = vmatpush3.msra.mxu0 %v12443_v43 }
 0x22a   :  { %10945 = vmatmul.mubr.msk.f32.vlgmr.msra.gmra.mxu1 %vm6054_vm5, %v7810_v50  ;;  %10951 = vmatprep.subr.mxu0 %v12732_v3 }
 0x22b   :  { %10958 = vmatprep.subr.mxu1 %v12732_v3  ;;  %10952 = vmatpush3.msra.mxu0 %v12449_v35 }
 0x22c   :  { %10959 = vmatpush3.msra.mxu1 %v12437_v28  ;;  %10953 = vmatprep.subr.mxu0 %v12732_v3 }
 0x22d   :  { %10960 = vmatprep.subr.mxu1 %v12732_v3  ;;  %10954 = vmatpush3.msra.mxu0 %v12456_v61 }
 0x22e   :  { %10955 = vmatprep.mubr.msk.f32.mxu0 %vm11170_vm1, %v12732_v3  ;;  %10961 = vmatpush3.msra.mxu1 %v12443_v43 }
 0x22f   :  { %10956 = vmatmul.mubr.msk.f32.vlgmr.msra.gmra.mxu0 %vm6054_vm5, %v7807_v8  ;;  %10962 = vmatprep.subr.mxu1 %v12732_v3 }
 0x230   :  { %10969 = vmatprep.subr.mxu0 %v12732_v3  ;;  %10963 = vmatpush3.msra.mxu1 %v12449_v35 }
 0x231   :  { %10970 = vmatpush3.msra.mxu0 %v12437_v28  ;;  %10964 = vmatprep.subr.mxu1 %v12732_v3 }
 0x232   :  { %10971 = vmatprep.subr.mxu0 %v12732_v3  ;;  %10965 = vmatpush3.msra.mxu1 %v12456_v61 }
 0x233   :  { %10966 = vmatprep.mubr.msk.f32.mxu1 %vm11170_vm1, %v12732_v3  ;;  %10972 = vmatpush3.msra.mxu0 %v12443_v43 }
 0x234   :  { %10967 = vmatmul.mubr.msk.f32.vlgmr.msra.gmra.mxu1 %vm6054_vm5, %v7808_v32  ;;  %10973 = vmatprep.subr.mxu0 %v12732_v3 }
 0x235   :  { %10980 = vmatprep.subr.mxu1 %v12732_v3  ;;  %10974 = vmatpush3.msra.mxu0 %v12449_v35 }
 0x236   :  { %10981 = vmatpush3.msra.mxu1 %v12437_v28  ;;  %10975 = vmatprep.subr.mxu0 %v12732_v3 }
 0x237   :  { %10982 = vmatprep.subr.mxu1 %v12732_v3  ;;  %10976 = vmatpush3.msra.mxu0 %v12456_v61 }
 0x238   :  { %10977 = vmatprep.mubr.msk.f32.mxu0 %vm11170_vm1, %v12732_v3  ;;  %10983 = vmatpush3.msra.mxu1 %v12443_v43 }
 0x239   :  { %10978 = vmatmul.mubr.msk.f32.vlgmr.msra.gmra.mxu0 %vm6054_vm5, %v7809_v41  ;;  %10984 = vmatprep.subr.mxu1 %v12732_v3 }
 0x23a   :  { %10991 = vmatprep.subr.mxu0 %v12732_v3  ;;  %10985 = vmatpush3.msra.mxu1 %v12449_v35 }
 0x23b   :  { %10992 = vmatpush3.msra.mxu0 %v12437_v28  ;;  %10986 = vmatprep.subr.mxu1 %v12732_v3 }
 0x23c   :  { %10993 = vmatprep.subr.mxu0 %v12732_v3  ;;  %10987 = vmatpush3.msra.mxu1 %v12456_v61 }
 0x23d   :  { %10988 = vmatprep.mubr.msk.f32.mxu1 %vm11170_vm1, %v12732_v3  ;;  %10994 = vmatpush3.msra.mxu0 %v12443_v43 }
 0x23e   :  { %10989 = vmatmul.mubr.msk.f32.vlgmr.msra.gmra.mxu1 %vm6054_vm5, %v7810_v50  ;;  %10995 = vmatprep.subr.mxu0 %v12732_v3 }
 0x23f   :  { %11002 = vmatprep.subr.mxu1 %v12732_v3  ;;  %10996 = vmatpush3.msra.mxu0 %v12449_v35 }
 0x240   :  { %11003 = vmatpush3.msra.mxu1 %v12437_v28  ;;  %10997 = vmatprep.subr.mxu0 %v12732_v3 }
 0x241   :  { %11004 = vmatprep.subr.mxu1 %v12732_v3  ;;  %10998 = vmatpush3.msra.mxu0 %v12456_v61 }
 0x242   :  { %10999 = vmatprep.mubr.msk.f32.mxu0 %vm11170_vm1, %v12732_v3  ;;  %11005 = vmatpush3.msra.mxu1 %v12443_v43 }
 0x243   :  { %11000 = vmatmul.mubr.msk.f32.vlgmr.msra.gmra.mxu0 %vm6054_vm5, %v8397_v13  ;;  %11006 = vmatprep.subr.mxu1 %v12732_v3 }
 0x244   :  { %11013 = vmatprep.subr.mxu0 %v12732_v3  ;;  %11007 = vmatpush3.msra.mxu1 %v12449_v35 }
 0x245   :  { %11014 = vmatpush3.msra.mxu0 %v12437_v28  ;;  %11008 = vmatprep.subr.mxu1 %v12732_v3 }
 0x246   :  { %11015 = vmatprep.subr.mxu0 %v12732_v3  ;;  %11009 = vmatpush3.msra.mxu1 %v12456_v61 }
 0x247   :  { %11010 = vmatprep.mubr.msk.f32.mxu1 %vm11170_vm1, %v12732_v3  ;;  %11016 = vmatpush3.msra.mxu0 %v12443_v43 }
 0x248   :  { %11011 = vmatmul.mubr.msk.f32.vlgmr.msra.gmra.mxu1 %vm6054_vm5, %v8398_v49  ;;  %11017 = vmatprep.subr.mxu0 %v12732_v3 }
 0x249   :  { %11024 = vmatprep.subr.mxu1 %v12732_v3  ;;  %11018 = vmatpush3.msra.mxu0 %v12449_v35 }
 0x24a   :  { %11025 = vmatpush3.msra.mxu1 %v12437_v28  ;;  %11019 = vmatprep.subr.mxu0 %v12732_v3 }
 0x24b   :  { %11026 = vmatprep.subr.mxu1 %v12732_v3  ;;  %11020 = vmatpush3.msra.mxu0 %v12456_v61 }
 0x24c   :  { %11021 = vmatprep.mubr.msk.f32.mxu0 %vm11170_vm1, %v12732_v3  ;;  %11027 = vmatpush3.msra.mxu1 %v12443_v43 }
 0x24d   :  { %11022 = vmatmul.mubr.msk.f32.vlgmr.msra.gmra.mxu0 %vm6054_vm5, %v8399_v29  ;;  %11028 = vmatprep.subr.mxu1 %v12732_v3 }
 0x24e   :  { %11029 = vmatpush3.msra.mxu1 %v12449_v35  ;;  %11032 = vmatprep.mubr.msk.f32.mxu1 %vm11170_vm1, %v12732_v3 }
 0x24f   :  { %11030 = vmatprep.subr.mxu1 %v12732_v3  ;;  %9130 = vmatprep.mubr.f32.mxu0 %v12732_v3 }
 0x250   :  { %11031 = vmatpush3.msra.mxu1 %v12456_v61  ;;  %9082 = vmatprep.subr.mxu0 %v9049_v39 }
 0x251   :  { %11033 = vmatmul.mubr.msk.f32.vlgmr.msra.gmra.mxu1 %vm6054_vm5, %v8400_v30  ;;  %9172 = vmatprep.subr.mxu1 %v12544_v42 }
 0x252   :  { %9220 = vmatprep.mubr.f32.mxu1 %v12732_v3  ;;  %9083 = vmatpush1.msra.mxu0 %v9048_v21 }
 0x253   :  { %9173 = vmatpush1.msra.mxu1 %v12547_v23  ;;  %9084 = vmatprep.subr.mxu0 %v9047_v25  ;;  %v9045_v25 = vld [vmem:[#allocation7 + $0x58] sm:$0xff] }
 0x254   :  { %9174 = vmatprep.subr.mxu1 %v12549_v27  ;;  %9085 = vmatpush1.msra.mxu0 %v9046_v59 }
 0x255   :  { %9175 = vmatpush1.msra.mxu1 %v12552_v22  ;;  %9086 = vmatprep.subr.mxu0 %v9045_v25 }
 0x256   :  { %v6197_v36 = vpop.f32.mrf.mxu1 }
 0x258   :  { %v10616_v40 = vpop.f32.mrf.mxu1 }
 0x25a   :  { %v6270_v38 = vpop.f32.mrf.mxu0 }
 0x25c   :  { %v10627_v2 = vpop.f32.mrf.mxu0 }
 0x25f   :  { %v6343_v57 = vpop.f32.mrf.mxu1 }
 0x261   :  { %v10638_v33 = vpop.f32.mrf.mxu1 }
 0x263   :  { %v6416_v12 = vpop.f32.mrf.mxu0 }
 0x264   :  { %v6417_v34 = vadd.f32 %v6416_v12, %v12230_v31 }
 0x265   :  { %v10649_v52 = vpop.f32.mrf.mxu0 }
 0x268   :  { %v6489_v56 = vpop.f32.mrf.mxu1 }
 0x269   :  { %v6490_v60 = vadd.f32 %v6489_v56, %v6197_v36 }
 0x26a   :  { %v10660_v10 = vpop.f32.mrf.mxu1 }
 0x26d   :  { %v6562_v11 = vpop.f32.mrf.mxu0 }
 0x26e   :  { %v6563_v63 = vadd.f32 %v6562_v11, %v6270_v38 }
 0x26f   :  { %v10671_v44 = vpop.f32.mrf.mxu0 }
 0x272   :  { %v6635_v1 = vpop.f32.mrf.mxu1 }
 0x273   :  { %v6636_v37 = vadd.f32 %v6635_v1, %v6343_v57 }
 0x274   :  { %v10682_v48 = vpop.f32.mrf.mxu1 }
 0x277   :  { %v6708_v6 = vpop.f32.mrf.mxu0 }
 0x279   :  { %v10693_v18 = vpop.f32.mrf.mxu0 }
 0x27c   :  { %v6781_v51 = vpop.f32.mrf.mxu1 }
 0x27e   :  { %v10704_v62 = vpop.f32.mrf.mxu1 }
 0x281   :  { %v6854_v0 = vpop.f32.mrf.mxu0 }
 0x283   :  { %v10715_v47 = vpop.f32.mrf.mxu0 }
 0x286   :  { %v6927_v19 = vpop.f32.mrf.mxu1 }
 0x288   :  { %v10726_v54 = vpop.f32.mrf.mxu1 }
 0x28b   :  { %v6997_v5 = vpop.f32.mrf.mxu0 }
 0x28c   :  { %v6998_v55 = vadd.f32 %v6997_v5, %v6708_v6 }
 0x28d   :  { %v10737_v16 = vpop.f32.mrf.mxu0 }
 0x290   :  { %v7067_v45 = vpop.f32.mrf.mxu1 }
 0x291   :  { %v7068_v46 = vadd.f32 %v7067_v45, %v6781_v51 }
 0x292   :  { %v10748_v17 = vpop.f32.mrf.mxu1 }
 0x295   :  { %v7137_v4 = vpop.f32.mrf.mxu0 }
 0x296   :  { %v7138_v15 = vadd.f32 %v7137_v4, %v6854_v0 }
 0x297   :  { %v10759_v20 = vpop.f32.mrf.mxu0 }
 0x29a   :  { %v7207_v9 = vpop.f32.mrf.mxu1 }
 0x29b   :  { %v7208_v14 = vadd.f32 %v7207_v9, %v6927_v19 }
 0x29c   :  { %v10770_v26 = vpop.f32.mrf.mxu1 }
 0x29f   :  { %v7287_v53 = vpop.f32.mrf.mxu0 }
 0x2a0   :  { %v7501_v58 = vadd.f32 %v7287_v53, %v6417_v34 }
 0x2a1   :  { %v10781_v31 = vpop.f32.mrf.mxu0 }
 0x2a4   :  { %v7357_v24 = vpop.f32.mrf.mxu1 }
 0x2a5   :  { %v7502_v7 = vadd.f32 %v7357_v24, %v6490_v60  ;;  %v9044_v24 = vld [vmem:[#allocation7 + $0x50] sm:$0xff] }
 0x2a6   :  { %v10792_v8 = vpop.f32.mrf.mxu1  ;;  %9087 = vmatpush1.msra.mxu0 %v9044_v24 }
 0x2a9   :  { %v7427_v32 = vpop.f32.mrf.mxu0 }
 0x2aa   :  { %v12556_v41 = vadd.f32 %v7427_v32, %v6563_v63  ;;  %v9043_v32 = vld [vmem:[#allocation7 + $0x48] sm:$0xff] }
 0x2ab   :  { %v10803_v28 = vpop.f32.mrf.mxu0  ;;  %9088 = vmatprep.subr.mxu0 %v9043_v32 }
 0x2ac   :  { %v12582_v28 = vld [vmem:[#allocation9 + $0x48] sm:$0xff] }
 0x2ae   :  { %v7497_v43 = vpop.f32.mrf.mxu1 }
 0x2af   :  { %v12558_v50 = vadd.f32 %v7497_v43, %v6636_v37  ;;  %v9042_v43 = vld [vmem:[#allocation7 + $0x40] sm:$0xff] }
 0x2b0   :  { %v10814_v35 = vpop.f32.mrf.mxu1  ;;  %9089 = vmatpush1.msra.mxu0 %v9042_v43  ;;  %v9052_v43 = vlaneseq }
 0x2b3   :  { %v7574_v61 = vpop.f32.mrf.mxu0 }
 0x2b4   :  { %v7797_v13 = vadd.f32 %v7574_v61, %v6998_v55  ;;  %v12587_v61 = vld [vmem:[#allocation9 + $0x40] sm:$0xff] }
 0x2b5   :  { %v10825_v49 = vpop.f32.mrf.mxu0 }
 0x2b8   :  { %v7647_v29 = vpop.f32.mrf.mxu1 }
 0x2b9   :  { %v7798_v30 = vadd.f32 %v7647_v29, %v7068_v46  ;;  %v9041_v29 = vld [vmem:[#allocation7 + $0x38] sm:$0xff] }
 0x2ba   :  { %v10836_v36 = vpop.f32.mrf.mxu1  ;;  %9090 = vmatprep.subr.mxu0 %v9041_v29 }
 0x2bd   :  { %v7720_v40 = vpop.f32.mrf.mxu0 }
 0x2be   :  { %v7799_v38 = vadd.f32 %v7720_v40, %v7138_v15  ;;  %v9040_v40 = vld [vmem:[#allocation7 + $0x30] sm:$0xff] }
 0x2bf   :  { %v10847_v2 = vpop.f32.mrf.mxu0  ;;  %9091 = vmatpush1.msra.mxu0 %v9040_v40 }
 0x2c0   :  { %v12594_v2 = vld [vmem:[#allocation9 + $0x30] sm:$0xff] }
 0x2c2   :  { %v7793_v57 = vpop.f32.mrf.mxu1 }
 0x2c3   :  { %v12560_v33 = vadd.f32 %v7793_v57, %v7208_v14 }
 0x2c4   :  { %v10858_v12 = vpop.f32.mrf.mxu1 }
 0x2c7   :  { %v7877_v52 = vpop.f32.mrf.mxu0 }
 0x2c8   :  { %v8091_v56 = vadd.f32 %v7877_v52, %v7501_v58  ;;  %v12572_v58 = vld [vmem:[#allocation9 + $0x58] sm:$0xff] }
 0x2c9   :  { %v10869_v60 = vpop.f32.mrf.mxu0  ;;  %9176 = vmatprep.subr.mxu1 %v12572_v58 }
 0x2ca   :  { %v12600_v60 = vld [vmem:[#allocation9 + $0x20] sm:$0xff] }
 0x2cc   :  { %v7947_v10 = vpop.f32.mrf.mxu1 }
 0x2cd   :  { %v8092_v11 = vadd.f32 %v7947_v10, %v7502_v7  ;;  %v12579_v7 = vld [vmem:[#allocation9 + $0x50] sm:$0xff] }
 0x2ce   :  { %v10880_v63 = vpop.f32.mrf.mxu1  ;;  %9177 = vmatpush1.msra.mxu1 %v12579_v7 }
 0x2cf   :  { %9178 = vmatprep.subr.mxu1 %v12582_v28 }
 0x2d0   :  { %9179 = vmatpush1.msra.mxu1 %v12587_v61 }
 0x2d1   :  { %v8017_v44 = vpop.f32.mrf.mxu0 }
 0x2d3   :  { %v10891_v1 = vpop.f32.mrf.mxu0 }
 0x2d4   :  { %v12606_v1 = vld [vmem:[#allocation9 + $0x18] sm:$0xff] }
 0x2d6   :  { %v12562_v37 = vpop.f32.mrf.mxu1 }
 0x2d7   :  { %v8094_v10 = vadd.f32 %v12562_v37, %v12558_v50 }
 0x2d8   :  { %v10902_v48 = vpop.f32.mrf.mxu1 }
 0x2db   :  { %v8164_v6 = vpop.f32.mrf.mxu0 }
 0x2dc   :  { %v8387_v20 = vadd.f32 %v8164_v6, %v7797_v13  ;;  %v8093_v13 = vadd.f32 %v8017_v44, %v12556_v41  ;;  %v9039_v41 = vld [vmem:[#allocation7 + $0x28] sm:$0xff]  ;;  %v9037_v44 = vld [vmem:[#allocation7 + $0x18] sm:$0xff]  ;;  %v9820_v6 = vld [vmem:[%s12723_s4] ss:$0 sm:$0xff]  ;;  %s11171_s4 = smov 32  }
 0x2dd   :  { %v10913_v18 = vpop.f32.mrf.mxu0  ;;  %9092 = vmatprep.subr.mxu0 %v9039_v41 }
 0x2de   :  { %v9036_v18 = vld [vmem:[#allocation7 + $0x10] sm:$0xff] }
 0x2e0   :  { %v8237_v51 = vpop.f32.mrf.mxu1 }
 0x2e1   :  { %v8388_v21 = vadd.f32 %v8237_v51, %v7798_v30  ;;  %v12591_v30 = vld [vmem:[#allocation9 + $0x38] sm:$0xff]  ;;  %v12612_v51 = vld [vmem:[#allocation9 + $0x10] sm:$0xff] }
 0x2e2   :  { %v10924_v62 = vpop.f32.mrf.mxu1  ;;  %9180 = vmatprep.subr.mxu1 %v12591_v30 }
 0x2e3   :  { %9181 = vmatpush1.msra.mxu1 %v12594_v2  ;;  %v9035_v62 = vld [vmem:[#allocation7 + $0x8] sm:$0xff] }
 0x2e5   :  { %v8310_v0 = vpop.f32.mrf.mxu0 }
 0x2e6   :  { %v8389_v49 = vadd.f32 %v8310_v0, %v7799_v38  ;;  %v12597_v38 = vld [vmem:[#allocation9 + $0x28] sm:$0xff] }
 0x2e7   :  { %v10935_v47 = vpop.f32.mrf.mxu0  ;;  %9182 = vmatprep.subr.mxu1 %v12597_v38  ;;  %v12616_v0 = vld [vmem:[#allocation9 + $0x8] sm:$0xff] }
 0x2e8   :  { %9183 = vmatpush1.msra.mxu1 %v12600_v60 }
 0x2e9   :  { %9184 = vmatprep.subr.mxu1 %v12606_v1 }
 0x2ea   :  { %v8383_v19 = vpop.f32.mrf.mxu1  ;;  %9185 = vmatpush1.msra.mxu1 %v12612_v51 }
 0x2eb   :  { %9186 = vmatprep.subr.mxu1 %v12616_v0 }
 0x2ec   :  { %v10946_v54 = vpop.f32.mrf.mxu1 }
 0x2ed   :  { %v12619_v54 = vld [vmem:[#allocation9] sm:$0xff] }
 0x2ee   :  { %9187 = vmatpush1.msra.mxu1 %v12619_v54 }
 0x2ef   :  { %v8467_v5 = vpop.f32.mrf.mxu0  ;;  %9221 = vmatmul.mubr.f32.vlgmr.msra.gmra.mxu1 %v12732_v3  ;;  %9382 = vmatprep.subr.mxu1 %v12544_v42 }
 0x2f0   :  { %v12566_v14 = vadd.f32 %v8467_v5, %v8091_v56  ;;  %v9038_v56 = vld [vmem:[#allocation7 + $0x20] sm:$0xff]  ;;  %9383 = vmatpush1.msra.mxu1 %v12547_v23  ;;  %9430 = vmatprep.mubr.f32.mxu1 %v12732_v3 }
 0x2f1   :  { %v10957_v55 = vpop.f32.mrf.mxu0  ;;  %9093 = vmatpush1.msra.mxu0 %v9038_v56  ;;  %9384 = vmatprep.subr.mxu1 %v12549_v27 }
 0x2f2   :  { %9094 = vmatprep.subr.mxu0 %v9037_v44  ;;  %9385 = vmatpush1.msra.mxu1 %v12552_v22 }
 0x2f3   :  { %9095 = vmatpush1.msra.mxu0 %v9036_v18  ;;  %9386 = vmatprep.subr.mxu1 %v12572_v58 }
 0x2f4   :  { %v8537_v16 = vpop.f32.mrf.mxu1  ;;  %9096 = vmatprep.subr.mxu0 %v9035_v62  ;;  %9387 = vmatpush1.msra.mxu1 %v12579_v7 }
 0x2f5   :  { %v12574_v59 = vadd.f32 %v8537_v16, %v8092_v11  ;;  %v8390_v11 = vadd.f32 %v8383_v19, %v12560_v33  ;;  %v9034_v19 = vld [vmem:[#allocation7] sm:$0xff]  ;;  %9388 = vmatprep.subr.mxu1 %v12582_v28 }
 0x2f6   :  { %v10968_v45 = vpop.f32.mrf.mxu1  ;;  %9097 = vmatpush1.msra.mxu0 %v9034_v19  ;;  %9389 = vmatpush1.msra.mxu1 %v12587_v61 }
 0x2f7   :  { %9272 = vmatprep.subr.mxu0 %v12544_v42  ;;  %9390 = vmatprep.subr.mxu1 %v12591_v30 }
 0x2f8   :  { %9391 = vmatpush1.msra.mxu1 %v12594_v2 }
 0x2f9   :  { %v8607_v46 = vpop.f32.mrf.mxu0  ;;  %9392 = vmatprep.subr.mxu1 %v12597_v38 }
 0x2fa   :  { %v8683_v57 = vadd.f32 %v8607_v46, %v8093_v13  ;;  %9393 = vmatpush1.msra.mxu1 %v12600_v60 }
 0x2fb   :  { %v10979_v17 = vpop.f32.mrf.mxu0  ;;  %9394 = vmatprep.subr.mxu1 %v12606_v1 }
 0x2fc   :  { %9395 = vmatpush1.msra.mxu1 %v12612_v51 }
 0x2fd   :  { %9396 = vmatprep.subr.mxu1 %v12616_v0 }
 0x2fe   :  { %v12564_v4 = vpop.f32.mrf.mxu1  ;;  %9397 = vmatpush1.msra.mxu1 %v12619_v54 }
 0x2ff   :  { %v8684_v50 = vadd.f32 %v12564_v4, %v8094_v10 }
 0x300   :  { %v10990_v15 = vpop.f32.mrf.mxu1 }
 0x303   :  { %v8754_v9 = vpop.f32.mrf.mxu0 }
 0x304   :  { %v12568_v26 = vadd.f32 %v8754_v9, %v8387_v20 }
 0x305   :  { %v11001_v34 = vpop.f32.mrf.mxu0 }
 0x306   :  { %v8981_v39 = vmax.f32 %v12566_v14, %v12568_v26 }
 0x308   :  { %v8827_v53 = vpop.f32.mrf.mxu1  ;;  %v8992_v4 = vadd.f32 %v9820_v6, %v8981_v39 }
 0x309   :  { %v12576_v31 = vadd.f32 %v8827_v53, %v8388_v21 }
 0x30a   :  { %v11012_v8 = vpop.f32.mrf.mxu1  ;;  %v8996_v15 = vmax.f32 %v8992_v4, 0.0 }
 0x30b   :  { %v8982_v35 = vmax.f32 %v12574_v59, %v12576_v31 }
 0x30d   :  { %v8900_v36 = vpop.f32.mrf.mxu0  ;;  %v8993_v16 = vadd.f32 %v9820_v6, %v8982_v35  ;;  %v9053_v35 = vshrl.u32 %v9052_v43, 7 }
 0x30e   :  { %v8979_v12 = vadd.f32 %v8900_v36, %v8389_v49  ;;  %v9050_v49 = vld [vmem:[%s12725_s6] sm:$0x3]  ;;  %s11172_s6 = smov 64  }
 0x30f   :  { %v11023_v52 = vpop.f32.mrf.mxu0  ;;  %v8997_v17 = vmax.f32 %v8993_v16, 0.0  ;;  %v9054_v13 = vsub.s32 0, %v9053_v35 }
 0x310   :  { %v8983_v63 = vmax.f32 %v8683_v57, %v8979_v12  ;;  %v9058_v52 = vsub.s32 1, %v9053_v35 }
 0x311   :  { %v8973_v48 = vpop.f32.mrf.mxu1  ;;  %v9055_v29 = vrot.slane %v9050_v49, %v9054_v13 }
 0x312   :  { %v8980_v33 = vadd.f32 %v8973_v48, %v8390_v11  ;;  %v8994_v37 = vadd.f32 %v9820_v6, %v8983_v63  ;;  %v9059_v56 = vrot.slane %v9050_v49, %v9058_v52 }
 0x313   :  { %v11034_v47 = vpop.f32.mrf.mxu1 }
 0x314   :  { %v8984_v5 = vmax.f32 %v8684_v50, %v8980_v33  ;;  %v8998_v55 = vmax.f32 %v8994_v37, 0.0 }
 0x316   :  { %9006 = vrot.lane.b32.xlu0 %v8998_v55, %s11171_s4  ;;  %v8995_v45 = vadd.f32 %v9820_v6, %v8984_v5 }
 0x318   :  { %v8999_v46 = vmax.f32 %v8995_v45, 0.0 }
 0x31a   :  { %9001 = vrot.lane.b32.xlu1 %v8999_v46, %s11171_s4  ;;  %9011 = vrot.lane.b32.xlu0 %v8997_v17, %s11171_s4 }
 0x31e   :  { %9016 = vrot.lane.b32.xlu1 %v8996_v15, %s11171_s4 }
 0x388   :  { %v9007_v20 = vpop.permute.xlu0 %9006 }
 0x389   :  { %v9009_v9 = vsel %vm6054_vm5, %v8997_v17, %v9007_v20 }
 0x38a   :  { %v9021_v21 = vrot.slane %v9009_v9, 6 }
 0x38c   :  { %v9002_v14 = vpop.permute.xlu1 %9001  ;;  %v9012_v26 = vpop.permute.xlu0 %9011 }
 0x38d   :  { %v9004_v34 = vsel %vm6054_vm5, %v8996_v15, %v9002_v14  ;;  %v9014_v39 = vsel %vm6054_vm5, %v8998_v55, %v9012_v26 }
 0x38e   :  { %v9024_v53 = vrot.slane %v9014_v39, 4  ;;  %v9030_v25 = vsel %vm9029_vm6, %v9004_v34, %v9021_v21 }
 0x390   :  { %v9017_v59 = vpop.permute.xlu1 %9016  ;;  %v9031_v8 = vsel %vm148_vm2, %v9030_v25, %v9024_v53 }
 0x391   :  { %v9019_v31 = vsel %vm6054_vm5, %v8999_v46, %v9017_v59 }
 0x392   :  { %v9027_v24 = vrot.slane %v9019_v31, 2 }
 0x394   :  { %v9033_v32 = vsel %vm9032_vm7, %v9031_v8, %v9027_v24 }
 0x395   :  { %9821 = vmatmul.mubr.msk.f32.vlgmr.msra.gmra.mxu0 %vm9062_vm8, %v9033_v32 }
 0x396   :  { %9273 = vmatpush1.msra.mxu0 %v12547_v23  ;;  %9320 = vmatprep.mubr.f32.mxu0 %v12732_v3 }
 0x397   :  { %9274 = vmatprep.subr.mxu0 %v12549_v27 }
 0x398   :  { %9275 = vmatpush1.msra.mxu0 %v12552_v22 }
 0x399   :  { %9276 = vmatprep.subr.mxu0 %v12572_v58 }
 0x39a   :  { %9277 = vmatpush1.msra.mxu0 %v12579_v7 }
 0x39b   :  { %9278 = vmatprep.subr.mxu0 %v12582_v28 }
 0x39c   :  { %9279 = vmatpush1.msra.mxu0 %v12587_v61 }
 0x39d   :  { %9280 = vmatprep.subr.mxu0 %v12591_v30 }
 0x39e   :  { %9281 = vmatpush1.msra.mxu0 %v12594_v2 }
 0x39f   :  { %9282 = vmatprep.subr.mxu0 %v12597_v38 }
 0x3a0   :  { %9283 = vmatpush1.msra.mxu0 %v12600_v60 }
 0x3a1   :  { %9284 = vmatprep.subr.mxu0 %v12606_v1 }
 0x3a2   :  { %9285 = vmatpush1.msra.mxu0 %v12612_v51 }
 0x3a3   :  { %9286 = vmatprep.subr.mxu0 %v12616_v0 }
 0x3a4   :  { %9287 = vmatpush1.msra.mxu0 %v12619_v54 }
 0x3a5   :  { %9492 = vmatprep.subr.mxu0 %v12544_v42 }
 0x3af   :  { %v9222_v57 = vpop.f32.mrf.mxu1 }
 0x3b1   :  { %v9224_v11 = vpop.f32.mrf.mxu1 }
 0x455   :  { %v9132_v36 = vpop.f32.mrf.mxu0 }
 0x456   :  { %v12670_v40 = vadd.f32 %v9132_v36, %v9055_v29 }
 0x457   :  { %v9134_v10 = vpop.f32.mrf.mxu0 }
 0x458   :  { %v9227_v12 = vadd.f32 %v9222_v57, %v12670_v40  ;;  %v12673_v42 = vadd.f32 %v9134_v10, %v9059_v56 }
 0x45a   :  { %v9822_v41 = vmul.f32 -1.442695, %v9227_v12  ;;  %v9228_v63 = vadd.f32 %v9224_v11, %v12673_v42 }
 0x45c   :  { %11046 = vpow2.f32 %v9822_v41  ;;  %v9823_v33 = vmul.f32 -1.442695, %v9228_v63 }
 0x45d   :  { %11048 = vtanh.f32 %v9228_v63 }
 0x469   :  { %v11047_v44 = vpop.eup %11046 }
 0x46a   :  { %v9232_v48 = vadd.f32 1.0, %v11047_v44  ;;  %v11049_v6 = vpop.eup %11048 }
 0x46c   :  { %11050 = vrcp.f32 %v9232_v48  ;;  %v9833_v48 = vld [vmem:[%s12727_s8] ss:$0 sm:$0xff] }
 0x46d   :  { %11052 = vpow2.f32 %v9823_v33 }
 0x479   :  { %v11051_v18 = vpop.eup %11050 }
 0x47a   :  { %v9243_v50 = vmul.f32 %v11051_v18, %v11049_v6  ;;  %v11053_v37 = vpop.eup %11052  ;;  %v9242_v47 = vmul.f32 0.0, %v11051_v18 }
 0x47b   :  { %v9239_v62 = vadd.f32 1.0, %v11053_v37 }
 0x47c   :  { %9245 = vrot.lane.b32.xlu0 %v9243_v50, %s11172_s6 }
 0x47d   :  { %11054 = vrcp.f32 %v9239_v62 }
 0x48a   :  { %v11055_v55 = vpop.eup %11054 }
 0x4ee   :  { %v9246_v19 = vpop.permute.xlu0 %9245 }
 0x4ef   :  { %v9248_v5 = vadd.f32 %v9246_v19, %v9242_v47 }
 0x4f1   :  { %11056 = vtanh.f32 %v9248_v5 }
 0x4fe   :  { %v11057_v16 = vpop.eup %11056 }
 0x4ff   :  { %v9250_v45 = vmul.f32 %v11057_v16, %v11055_v55 }
 0x501   :  { %9252 = vrot.lane.b32.xlu1 %v9250_v45, %s11172_s6 }
 0x573   :  { %v9253_v46 = vpop.permute.xlu1 %9252 }
 0x574   :  { %9824 = vmatmul.mubr.msk.f32.vlgmr.msra.gmra.mxu0 %vm9062_vm8, %v9253_v46 }
 0x575   :  { %9493 = vmatpush1.msra.mxu0 %v12547_v23  ;;  %9540 = vmatprep.mubr.f32.mxu0 %v12732_v3 }
 0x576   :  { %9494 = vmatprep.subr.mxu0 %v12549_v27 }
 0x577   :  { %9495 = vmatpush1.msra.mxu0 %v12552_v22 }
 0x578   :  { %9496 = vmatprep.subr.mxu0 %v12572_v58 }
 0x579   :  { %9497 = vmatpush1.msra.mxu0 %v12579_v7 }
 0x57a   :  { %9498 = vmatprep.subr.mxu0 %v12582_v28 }
 0x57b   :  { %9499 = vmatpush1.msra.mxu0 %v12587_v61 }
 0x57c   :  { %9500 = vmatprep.subr.mxu0 %v12591_v30 }
 0x57d   :  { %9501 = vmatpush1.msra.mxu0 %v12594_v2 }
 0x57e   :  { %9502 = vmatprep.subr.mxu0 %v12597_v38  ;;  %v9349_v38 = vrot.slane %v9248_v5, 6 }
 0x57f   :  { %9503 = vmatpush1.msra.mxu0 %v12600_v60 }
 0x580   :  { %9504 = vmatprep.subr.mxu0 %v12606_v1 }
 0x581   :  { %9505 = vmatpush1.msra.mxu0 %v12612_v51 }
 0x582   :  { %9506 = vmatprep.subr.mxu0 %v12616_v0 }
 0x583   :  { %9507 = vmatpush1.msra.mxu0 %v12619_v54 }
 0x634   :  { %v9322_v3 = vpop.f32.mrf.mxu0 }
 0x635   :  { %v9329_v23 = vrot.slane %v9322_v3, 6 }
 0x636   :  { %v9324_v58 = vpop.f32.mrf.mxu0 }
 0x637   :  { %v9333_v27 = vadd.f32 %v9329_v23, %v12670_v40  ;;  %v9330_v7 = vrot.slane %v9324_v58, 6 }
 0x639   :  { %v9825_v22 = vmul.f32 -1.442695, %v9333_v27  ;;  %v9334_v28 = vadd.f32 %v9330_v7, %v12673_v42 }
 0x63b   :  { %11058 = vpow2.f32 %v9825_v22  ;;  %v9826_v0 = vmul.f32 -1.442695, %v9334_v28 }
 0x63c   :  { %11060 = vtanh.f32 %v9334_v28 }
 0x648   :  { %v11059_v61 = vpop.eup %11058 }
 0x649   :  { %v9338_v30 = vadd.f32 1.0, %v11059_v61  ;;  %v11061_v2 = vpop.eup %11060 }
 0x64b   :  { %11062 = vrcp.f32 %v9338_v30 }
 0x64c   :  { %11064 = vpow2.f32 %v9826_v0 }
 0x658   :  { %v11063_v60 = vpop.eup %11062 }
 0x659   :  { %v9352_v1 = vmul.f32 %v11063_v60, %v11061_v2  ;;  %v9351_v51 = vmul.f32 %v11063_v60, %v9349_v38  ;;  %v11065_v54 = vpop.eup %11064  ;;  %v9599_v60 = vstv %s12728_s9 }
 0x65a   :  { %v9345_v17 = vadd.f32 1.0, %v11065_v54 }
 0x65b   :  { %9354 = vrot.lane.b32.xlu0 %v9352_v1, %s11172_s6 }
 0x65c   :  { %11066 = vrcp.f32 %v9345_v17 }
 0x669   :  { %v11067_v20 = vpop.eup %11066 }
 0x6cd   :  { %v9355_v4 = vpop.permute.xlu0 %9354 }
 0x6ce   :  { %v9357_v15 = vadd.f32 %v9355_v4, %v9351_v51 }
 0x6d0   :  { %11068 = vtanh.f32 %v9357_v15  ;;  %v9459_v35 = vrot.slane %v9357_v15, 6 }
 0x6dd   :  { %v11069_v9 = vpop.eup %11068 }
 0x6de   :  { %v9359_v14 = vmul.f32 %v11069_v9, %v11067_v20 }
 0x6e0   :  { %v9361_v26 = vrot.slane %v9359_v14, 2 }
 0x6e2   :  { %9362 = vrot.lane.b32.xlu1 %v9361_v26, %s11172_s6 }
 0x754   :  { %v9363_v34 = vpop.permute.xlu1 %9362 }
 0x755   :  { %9827 = vmatmul.mubr.msk.f32.vlgmr.msra.gmra.mxu1 %vm9062_vm8, %v9363_v34 }
 0x815   :  { %v9432_v39 = vpop.f32.mrf.mxu1 }
 0x816   :  { %v9439_v21 = vrot.slane %v9432_v39, 4 }
 0x817   :  { %v9434_v59 = vpop.f32.mrf.mxu1 }
 0x818   :  { %v9443_v53 = vadd.f32 %v9439_v21, %v12670_v40  ;;  %v9440_v31 = vrot.slane %v9434_v59, 4 }
 0x81a   :  { %v9828_v25 = vmul.f32 -1.442695, %v9443_v53  ;;  %v9444_v24 = vadd.f32 %v9440_v31, %v12673_v42 }
 0x81c   :  { %11070 = vpow2.f32 %v9828_v25  ;;  %v9829_v36 = vmul.f32 -1.442695, %v9444_v24 }
 0x81d   :  { %11072 = vtanh.f32 %v9444_v24 }
 0x829   :  { %v11071_v8 = vpop.eup %11070 }
 0x82a   :  { %v9448_v32 = vadd.f32 1.0, %v11071_v8  ;;  %v11073_v43 = vpop.eup %11072 }
 0x82c   :  { %11074 = vrcp.f32 %v9448_v32 }
 0x82d   :  { %11076 = vpow2.f32 %v9829_v36 }
 0x839   :  { %v11075_v13 = vpop.eup %11074 }
 0x83a   :  { %v9462_v49 = vmul.f32 %v11075_v13, %v11073_v43  ;;  %v9461_v29 = vmul.f32 %v11075_v13, %v9459_v35  ;;  %v11077_v57 = vpop.eup %11076 }
 0x83b   :  { %v9455_v12 = vadd.f32 1.0, %v11077_v57 }
 0x83c   :  { %9464 = vrot.lane.b32.xlu0 %v9462_v49, %s11172_s6 }
 0x83d   :  { %11078 = vrcp.f32 %v9455_v12 }
 0x84a   :  { %v11079_v56 = vpop.eup %11078 }
 0x8ae   :  { %v9465_v41 = vpop.permute.xlu0 %9464 }
 0x8af   :  { %v9467_v52 = vadd.f32 %v9465_v41, %v9461_v29 }
 0x8b1   :  { %11080 = vtanh.f32 %v9467_v52  ;;  %v9569_v16 = vrot.slane %v9467_v52, 6 }
 0x8be   :  { %v11081_v10 = vpop.eup %11080 }
 0x8bf   :  { %v9469_v11 = vmul.f32 %v11081_v10, %v11079_v56 }
 0x8c1   :  { %v9471_v63 = vrot.slane %v9469_v11, 4 }
 0x8c3   :  { %9472 = vrot.lane.b32.xlu1 %v9471_v63, %s11172_s6 }
 0x8c7   :  { %9586 = vrot.lane.b32.xlu1 %v9833_v48, %s11172_s6 }
 0x935   :  { %v9473_v44 = vpop.permute.xlu1 %9472 }
 0x936   :  { %9830 = vmatmul.mubr.msk.f32.vlgmr.msra.gmra.mxu0 %vm9062_vm8, %v9473_v44 }
 0x939   :  { %v9587_v28 = vpop.permute.xlu1 %9586 }
 0x9f6   :  { %v9542_v6 = vpop.f32.mrf.mxu0 }
 0x9f7   :  { %v9549_v18 = vrot.slane %v9542_v6, 2 }
 0x9f8   :  { %v9544_v37 = vpop.f32.mrf.mxu0 }
 0x9f9   :  { %v9553_v50 = vadd.f32 %v9549_v18, %v12670_v40  ;;  %v9550_v62 = vrot.slane %v9544_v37, 2 }
 0x9fb   :  { %v9831_v33 = vmul.f32 -1.442695, %v9553_v50  ;;  %v9554_v47 = vadd.f32 %v9550_v62, %v12673_v42 }
 0x9fd   :  { %11082 = vpow2.f32 %v9831_v33  ;;  %v9832_v23 = vmul.f32 -1.442695, %v9554_v47 }
 0x9fe   :  { %11084 = vtanh.f32 %v9554_v47 }
 0xa0a   :  { %v11083_v19 = vpop.eup %11082 }
 0xa0b   :  { %v9558_v5 = vadd.f32 1.0, %v11083_v19  ;;  %v11085_v55 = vpop.eup %11084 }
 0xa0d   :  { %11086 = vrcp.f32 %v9558_v5 }
 0xa0e   :  { %11088 = vpow2.f32 %v9832_v23 }
 0xa1a   :  { %v11087_v45 = vpop.eup %11086 }
 0xa1b   :  { %v9572_v46 = vmul.f32 %v11087_v45, %v11085_v55  ;;  %v9571_v3 = vmul.f32 %v11087_v45, %v9569_v16  ;;  %v11089_v40 = vpop.eup %11088 }
 0xa1c   :  { %v9565_v27 = vadd.f32 1.0, %v11089_v40 }
 0xa1d   :  { %9574 = vrot.lane.b32.xlu0 %v9572_v46, %s11172_s6 }
 0xa1e   :  { %11090 = vrcp.f32 %v9565_v27 }
 0xa2b   :  { %v11091_v42 = vpop.eup %11090 }
 0xa8f   :  { %v9575_v22 = vpop.permute.xlu0 %9574 }
 0xa90   :  { %v9577_v58 = vadd.f32 %v9575_v22, %v9571_v3 }
 0xa92   :  { %11092 = vtanh.f32 %v9577_v58 }
 0xa9f   :  { %v11093_v7 = vpop.eup %11092 }
 0xaa0   :  { %v9579_v61 = vmul.f32 %v11093_v7, %v11091_v42 }
 0xaa2   :  { %v9589_v30 = vmul.f32 %v9587_v28, %v9579_v61 }
 0xaa4   :  { %9591 = vrot.lane.b32.xlu0 %v9589_v30, %s11172_s6 }
 0xb16   :  { %v9592_v2 = vpop.permute.xlu0 %9591 }
 0xb17   :  { %v9595_v38 = vsel %vm9594_vm9, %v9592_v2, 0.0 }
 0xb18   :  { %9596 = vadd.xlane.f32.xlu1 %v9595_v38 }
 0xba1   :  { %v9597_v1 = vpop.xlane.xlu1 %9596 }
 0xba2   :  { %v9600_v51 = vadd.f32 %v9599_v60, %v9597_v1 }
 0xba4   :  { %v9834_v0 = vmul.f32 -1.442695, %v9600_v51 }
 0xba6   :  { %11094 = vpow2.f32 %v9834_v0 }
 0xbb3   :  { %v11095_v54 = vpop.eup %11094 }
 0xbb4   :  { %v9604_v17 = vadd.f32 1.0, %v11095_v54 }
 0xbb6   :  { %11096 = vrcp.f32 %v9604_v17 }
 0xbc3   :  { %v11097_v4 = vpop.eup %11096 }
 0xbc4   :  { %9608 = vst.msk [vmem:[%s12729_s10 - $0x6] sm:$0xc0] %vm9607_vm10, %v11097_v4 }
 0xbc5   :  { %9613 = vsyncpa [#allocation6], 1 }
 0xbc6   :  { %9614 = vsyncpa [#allocation8], 1 }

</bundles_post_ra>
